<compile_context>
chip_gen: v7x
topology: tpu7x:2x2x1
jax: 0.10.0
libtpu: 0.0.40
codegen_flags: <defaults>
</compile_context>

<pallas_src>
import math

import jax
import jax.numpy as jnp
from jax import lax
from jax.experimental import pallas as pl
from jax.experimental.pallas import tpu as pltpu

# ------------------------- tiny synthetic "phi" config -------------------------
IMG_DIM = 512                 # fixed by nn.Linear(512, hidden_size)
HIDDEN = 64                   # phi_model.config.hidden_size (small synthetic value)
N_HEADS = 4
HEAD_DIM = HIDDEN // N_HEADS
PARTIAL_ROTARY_FACTOR = 0.5   # HF PhiConfig default (partial rotary)
ROTARY_DIM = int(HEAD_DIM * PARTIAL_ROTARY_FACTOR)
INTERMEDIATE = 128
VOCAB = 128
N_LAYERS = 2
SEQ = 8
BATCH = 2
LN_EPS = 1e-5
T_PAD = 16                    # S + 1 = 9 padded to a sublane-friendly 16
BT = BATCH * T_PAD            # batch folded into the sublane axis -> 32 rows

VEC_W = 5 * HIDDEN            # packed bias/LN table width (widest row: fused qkv bias)
_ROWS_PER_LAYER = 6           # ln_g, ln_b, bqkv5, bo, b1, b2


# ------------------------------ fused Pallas kernel -----------------------------
def _phi_decoder_kernel(h0_ref, bias_ref, rope_ref, vecs_ref,
                        wqkv_ref, wo_ref, w1_ref, w2_ref, lmw_ref, out_ref):
    f32 = jnp.float32
    bf16 = jnp.bfloat16
    H, H2 = HIDDEN, 2 * HIDDEN

    h = h0_ref[...]                               # (BT, H) f32 combined embeddings
    attn_bias = bias_ref[...]                     # (BT, BT) additive mask (0 / -1e30)
    cos_qk = rope_ref[0:BT, :]                    # (BT, 2H) rope cos for the q|k slab
    sin_qk = rope_ref[BT:2 * BT, :]               # (BT, 2H)

    scale = 1.0 / math.sqrt(HEAD_DIM)
    c_gelu = math.sqrt(2.0 / math.pi)

    def vec(row, width):                          # packed (1, width) f32 bias/LN row
        return vecs_ref[row:row + 1, 0:width]

    def layernorm(x, g, b):
        mean = jnp.mean(x, axis=-1, keepdims=True)
        cent = x - mean
        var = jnp.mean(cent * cent, axis=-1, keepdims=True)
        return cent * lax.rsqrt(var + LN_EPS) * g + b

    for li in range(N_LAYERS):                    # static unroll
        r = _ROWS_PER_LAYER * li
        ln_g, ln_b = vec(r + 0, H), vec(r + 1, H)
        bqkv, bo = vec(r + 2, 5 * H), vec(r + 3, H)
        b1, b2 = vec(r + 4, INTERMEDIATE), vec(r + 5, H)

        x = layernorm(h, ln_g, ln_b)              # (BT, H) f32
        xb = x.astype(bf16)

        # fused projection: [q | k | q@R | k@R | v] in one (BT,H)x(H,5H) MXU matmul
        qkv = jnp.dot(xb, wqkv_ref[li], preferred_element_type=f32) + bqkv
        # RoPE on q and k together as one 128-lane slab (all slices 128-aligned)
        qk = qkv[:, :H2] * cos_qk + qkv[:, H2:2 * H2] * sin_qk
        qkb = qk.astype(bf16)                     # (BT, 2H) = [q | k]
        vb = qkv[:, 2 * H2:].astype(bf16)         # (BT, H)

        wo_l = wo_ref[li]                         # (H, H) bf16
        attn_out = jnp.zeros((BT, H), f32)
        for hh in range(N_HEADS):                 # static unroll over heads
            lo = hh * HEAD_DIM
            hi = lo + HEAD_DIM
            q_h = qkb[:, lo:hi]
            k_h = qkb[:, H + lo:H + hi]
            s = jnp.einsum('td,sd->ts', q_h, k_h,
                           preferred_element_type=f32) * scale + attn_bias
            s = s - jnp.max(s, axis=-1, keepdims=True)
            p = jnp.exp(s)
            p = p * pl.reciprocal(jnp.sum(p, axis=-1, keepdims=True))
            o_h = jnp.dot(p.astype(bf16), vb[:, lo:hi], preferred_element_type=f32)
            # accumulate straight into the Wo projection (no lane-dim concatenate)
            attn_out = attn_out + jnp.dot(o_h.astype(bf16), wo_l[lo:hi, :],
                                          preferred_element_type=f32)
        attn_out = attn_out + bo

        # parallel GELU MLP branch (phi-style parallel residual, same LN input)
        m = jnp.dot(xb, w1_ref[li], preferred_element_type=f32) + b1
        m = 0.5 * m * (1.0 + jnp.tanh(c_gelu * (m + 0.044715 * m * m * m)))
        mlp_out = jnp.dot(m.astype(bf16), w2_ref[li], preferred_element_type=f32) + b2

        h = h + attn_out + mlp_out                # residual add

    rf = _ROWS_PER_LAYER * N_LAYERS
    hf = layernorm(h, vec(rf + 0, H), vec(rf + 1, H))
    out_ref[...] = (jnp.dot(hf.astype(bf16), lmw_ref[...],
                            preferred_element_type=f32) + vec(rf + 2, VOCAB))


# ------------------------------- parameters -------------------------------------
def init_params(key):
    def dense(k, fan_in, fan_out):
        kw, kb = jax.random.split(k)
        w = jax.random.normal(kw, (fan_in, fan_out), jnp.float32) / math.sqrt(fan_in)
        b = 0.01 * jax.random.normal(kb, (fan_out,), jnp.float32)
        return w, b

    # rotate_half matrix (rows = source dim, cols = destination dim); columns of the
    # non-rotary pass-through dims are zero -> partial rotary handled for free.
    half = ROTARY_DIM // 2
    r_head = jnp.zeros((HEAD_DIM, HEAD_DIM), jnp.float32)
    r_head = r_head.at[jnp.arange(half) + half, jnp.arange(half)].set(-1.0)
    r_head = r_head.at[jnp.arange(half), jnp.arange(half) + half].set(1.0)
    rot = jnp.kron(jnp.eye(N_HEADS, dtype=jnp.float32), r_head)          # (H, H)

    keys = jax.random.split(key, 3 + N_LAYERS)
    proj_w, proj_b = dense(keys[0], IMG_DIM, HIDDEN)
    embed = 0.02 * jax.random.normal(keys[1], (VOCAB, HIDDEN), jnp.float32)
    lm_w, lm_b = dense(keys[2], HIDDEN, VOCAB)

    def pad_row(v):
        return jnp.pad(v, (0, VEC_W - v.shape[0])).reshape(1, VEC_W)

    wqkv, wo, w1, w2 = [], [], [], []
    vec_rows = []
    for li in range(N_LAYERS):
        lk = jax.random.split(keys[3 + li], 6)
        wq, bq = dense(lk[0], HIDDEN, HIDDEN)
        wk, bk = dense(lk[1], HIDDEN, HIDDEN)
        wv, bv = dense(lk[2], HIDDEN, HIDDEN)
        wo_i, bo_i = dense(lk[3], HIDDEN, HIDDEN)
        w1_i, b1_i = dense(lk[4], HIDDEN, INTERMEDIATE)
        w2_i, b2_i = dense(lk[5], INTERMEDIATE, HIDDEN)
        # fold rotate_half into the fused qkv weights: [q | k | q@R | k@R | v]
        wqkv.append(jnp.concatenate([wq, wk, wq @ rot, wk @ rot, wv], axis=1))
        bqkv5 = jnp.concatenate([bq, bk, bq @ rot, bk @ rot, bv], axis=0)
        wo.append(wo_i)
        w1.append(w1_i)
        w2.append(w2_i)
        vec_rows += [pad_row(jnp.ones((HIDDEN,), jnp.float32)),      # ln_g
                     pad_row(jnp.zeros((HIDDEN,), jnp.float32)),     # ln_b
                     pad_row(bqkv5), pad_row(bo_i),
                     pad_row(b1_i), pad_row(b2_i)]

    vec_rows += [pad_row(jnp.ones((HIDDEN,), jnp.float32)),          # final ln gamma
                 pad_row(jnp.zeros((HIDDEN,), jnp.float32)),         # final ln beta
                 pad_row(lm_b)]                                      # lm_head bias
    n_rows = len(vec_rows)
    vecs = jnp.concatenate(vec_rows, axis=0)
    vecs = jnp.pad(vecs, ((0, (-n_rows) % 8), (0, 0)))               # sublane-pad

    bf = jnp.bfloat16
    return {
        # prologue params (used in the XLA wrapper, exact f32)
        'proj_w': proj_w, 'proj_b': proj_b, 'embed': embed,
        # kernel weights (bf16, f32 accumulation on the MXU)
        'wqkv': jnp.stack(wqkv).astype(bf),        # (L, H, 5H)
        'wo': jnp.stack(wo).astype(bf),            # (L, H, H)
        'w1': jnp.stack(w1).astype(bf),            # (L, H, I)
        'w2': jnp.stack(w2).astype(bf),            # (L, I, H)
        'lm_w': lm_w.astype(bf),                   # (H, V)
        # packed biases / LayerNorm params / lm_head bias (f32)
        'vecs': vecs,                              # (16, 5H)
    }


# --------------------------------- wrapper ---------------------------------------
def multimodal_phi_forward(params, image_embeddings, input_ids, attention_mask):
    b, s = input_ids.shape
    t = s + 1
    assert t <= T_PAD and b * T_PAD == BT
    pad = T_PAD - t

    # --- explicit prologue of MultimodalPhi.forward, hoisted to XLA (perf review):
    # image projection (M=1 GEMM), token-embedding gather, concat, pad to T_PAD.
    proj = (image_embeddings.astype(jnp.float32) @ params['proj_w']
            + params['proj_b'])                                        # (b, H)
    tok = params['embed'][input_ids]                                   # (b, s, H)
    h0 = jnp.concatenate([proj[:, None, :], tok,
                          jnp.zeros((b, pad, HIDDEN), jnp.float32)], axis=1)
    h0 = h0.reshape(BT, HIDDEN)                      # batch folded into sublanes

    # extended attention mask (image token always attended) -> one additive bias
    # table that is block-diagonal over the folded batch + causal + key padding.
    key_ok = jnp.concatenate([jnp.ones((b, 1), jnp.float32),
                              attention_mask.astype(jnp.float32),
                              jnp.zeros((b, pad), jnp.float32)], axis=1).reshape(1, BT)
    idx = jnp.arange(BT, dtype=jnp.int32)
    same_ex = (idx[:, None] // T_PAD) == (idx[None, :] // T_PAD)
    causal = idx[:, None] >= idx[None, :]
    allowed = same_ex & causal & (key_ok > 0.5)
    attn_bias = jnp.where(allowed, 0.0, -1e30).astype(jnp.float32)     # (BT, BT)

    # partial-rotary RoPE tables for the fused q|k slab, replicated over the batch
    rot_d = ROTARY_DIM
    inv_freq = 1.0 / (10000.0 ** (jnp.arange(0, rot_d, 2, dtype=jnp.float32) / rot_d))
    freqs = jnp.outer(jnp.arange(T_PAD, dtype=jnp.float32), inv_freq)  # (T, rot_d/2)
    emb = jnp.concatenate([freqs, freqs], axis=-1)                     # (T, rot_d)
    ones_pass = jnp.ones((T_PAD, HEAD_DIM - rot_d), jnp.float32)
    zeros_pass = jnp.zeros((T_PAD, HEAD_DIM - rot_d), jnp.float32)
    cos = jnp.tile(jnp.concatenate([jnp.cos(emb), ones_pass], -1), (1, 2 * N_HEADS))
    sin = jnp.tile(jnp.concatenate([jnp.sin(emb), zeros_pass], -1), (1, 2 * N_HEADS))
    rope = jnp.concatenate([jnp.tile(cos, (b, 1)),
                            jnp.tile(sin, (b, 1))], axis=0)            # (2*BT, 2H)

    vspec = pl.BlockSpec(memory_space=pltpu.MemorySpace.VMEM)
    logits = pl.pallas_call(
        _phi_decoder_kernel,
        out_shape=jax.ShapeDtypeStruct((BT, VOCAB), jnp.float32),
        in_specs=[vspec] * 9,
        out_specs=vspec,
    )(h0, attn_bias, rope, params['vecs'],
      params['wqkv'], params['wo'], params['w1'], params['w2'], params['lm_w'])

    return logits.reshape(b, T_PAD, VOCAB)[:, :t, :]
    # TODO(synk): the image_embeddings-is-None branch (plain phi_model(input_ids=...))
    # is the same decoder kernel fed with token embeddings only; omitted here.


if __name__ == "__main__":
    key = jax.random.PRNGKey(0)
    pkey, ikey, idkey = jax.random.split(key, 3)
    params = init_params(pkey)

    image_embeddings = jax.random.normal(ikey, (BATCH, IMG_DIM), jnp.float32)
    input_ids = jax.random.randint(idkey, (BATCH, SEQ), 0, VOCAB, dtype=jnp.int32)
    # last two tokens padded, to exercise the attention-mask path
    attention_mask = jnp.concatenate(
        [jnp.ones((BATCH, SEQ - 2), jnp.float32),
         jnp.zeros((BATCH, 2), jnp.float32)], axis=1)

    fwd = jax.jit(multimodal_phi_forward)
    logits = fwd(params, image_embeddings, input_ids, attention_mask)
    jax.block_until_ready(logits)

    assert logits.shape == (BATCH, SEQ + 1, VOCAB), logits.shape
    assert bool(jnp.all(jnp.isfinite(logits)))
    print("KERNEL_OK")
</pallas_src>

<mosaic_0001>
module attributes {stable_mosaic.version = 11 : i64} {
  func.func @_phi_decoder_kernel(%arg0: memref<32x64xf32, #tpu.memory_space<vmem>>, %arg1: memref<32x32xf32, #tpu.memory_space<vmem>>, %arg2: memref<64x128xf32, #tpu.memory_space<vmem>>, %arg3: memref<16x320xf32, #tpu.memory_space<vmem>>, %arg4: memref<2x64x320xbf16, #tpu.memory_space<vmem>>, %arg5: memref<2x64x64xbf16, #tpu.memory_space<vmem>>, %arg6: memref<2x64x128xbf16, #tpu.memory_space<vmem>>, %arg7: memref<2x128x64xbf16, #tpu.memory_space<vmem>>, %arg8: memref<64x128xbf16, #tpu.memory_space<vmem>>, %arg9: memref<32x128xf32, #tpu.memory_space<vmem>>) attributes {dimension_semantics = [], scalar_prefetch = 0 : i64, scratch_operands = 0 : i64, tpu.core_type = #tpu.core_type<tc>} {
    %c0 = arith.constant 0 : index
    %c0_0 = arith.constant 0 : index
    %0 = vector.load %arg0[%c0, %c0_0] : memref<32x64xf32, #tpu.memory_space<vmem>>, vector<32x64xf32>
    %c0_1 = arith.constant 0 : index
    %c0_2 = arith.constant 0 : index
    %1 = vector.load %arg1[%c0_1, %c0_2] : memref<32x32xf32, #tpu.memory_space<vmem>>, vector<32x32xf32>
    %c0_3 = arith.constant 0 : index
    %c0_4 = arith.constant 0 : index
    %2 = vector.load %arg2[%c0_3, %c0_4] : memref<64x128xf32, #tpu.memory_space<vmem>>, vector<32x128xf32>
    %c32 = arith.constant 32 : index
    %c0_5 = arith.constant 0 : index
    %3 = vector.load %arg2[%c32, %c0_5] : memref<64x128xf32, #tpu.memory_space<vmem>>, vector<32x128xf32>
    %c0_6 = arith.constant 0 : index
    %c0_7 = arith.constant 0 : index
    %4 = vector.load %arg3[%c0_6, %c0_7] : memref<16x320xf32, #tpu.memory_space<vmem>>, vector<1x64xf32>
    %c1 = arith.constant 1 : index
    %c0_8 = arith.constant 0 : index
    %5 = vector.load %arg3[%c1, %c0_8] : memref<16x320xf32, #tpu.memory_space<vmem>>, vector<1x64xf32>
    %c2 = arith.constant 2 : index
    %c0_9 = arith.constant 0 : index
    %6 = vector.load %arg3[%c2, %c0_9] : memref<16x320xf32, #tpu.memory_space<vmem>>, vector<1x320xf32>
    %c3 = arith.constant 3 : index
    %c0_10 = arith.constant 0 : index
    %7 = vector.load %arg3[%c3, %c0_10] : memref<16x320xf32, #tpu.memory_space<vmem>>, vector<1x64xf32>
    %c4 = arith.constant 4 : index
    %c0_11 = arith.constant 0 : index
    %8 = vector.load %arg3[%c4, %c0_11] : memref<16x320xf32, #tpu.memory_space<vmem>>, vector<1x128xf32>
    %c5 = arith.constant 5 : index
    %c0_12 = arith.constant 0 : index
    %9 = vector.load %arg3[%c5, %c0_12] : memref<16x320xf32, #tpu.memory_space<vmem>>, vector<1x64xf32>
    %cst = arith.constant dense<0.000000e+00> : vector<32xf32>
    %10 = vector.multi_reduction <add>, %0, %cst [1] : vector<32x64xf32> to vector<32xf32>
    %11 = vector.shape_cast %10 : vector<32xf32> to vector<32x1xf32>
    %cst_13 = arith.constant 6.400000e+01 : f32
    %12 = vector.broadcast %cst_13 : f32 to vector<32x1xf32>
    %13 = arith.divf %11, %12 : vector<32x1xf32>
    %14 = vector.broadcast %13 : vector<32x1xf32> to vector<32x64xf32>
    %15 = arith.subf %0, %14 : vector<32x64xf32>
    %16 = arith.mulf %15, %15 : vector<32x64xf32>
    %cst_14 = arith.constant dense<0.000000e+00> : vector<32xf32>
    %17 = vector.multi_reduction <add>, %16, %cst_14 [1] : vector<32x64xf32> to vector<32xf32>
    %18 = vector.shape_cast %17 : vector<32xf32> to vector<32x1xf32>
    %cst_15 = arith.constant 6.400000e+01 : f32
    %19 = vector.broadcast %cst_15 : f32 to vector<32x1xf32>
    %20 = arith.divf %18, %19 : vector<32x1xf32>
    %cst_16 = arith.constant 9.99999974E-6 : f32
    %21 = vector.broadcast %cst_16 : f32 to vector<32x1xf32>
    %22 = arith.addf %20, %21 : vector<32x1xf32>
    %23 = math.rsqrt %22 : vector<32x1xf32>
    %24 = vector.broadcast %23 : vector<32x1xf32> to vector<32x64xf32>
    %25 = arith.mulf %15, %24 : vector<32x64xf32>
    %26 = vector.broadcast %4 : vector<1x64xf32> to vector<32x64xf32>
    %27 = arith.mulf %25, %26 : vector<32x64xf32>
    %28 = vector.broadcast %5 : vector<1x64xf32> to vector<32x64xf32>
    %29 = arith.addf %27, %28 : vector<32x64xf32>
    %30 = arith.truncf %29 : vector<32x64xf32> to vector<32x64xbf16>
    %c0_17 = arith.constant 0 : index
    %c0_18 = arith.constant 0 : index
    %c0_19 = arith.constant 0 : index
    %31 = vector.load %arg4[%c0_17, %c0_18, %c0_19] : memref<2x64x320xbf16, #tpu.memory_space<vmem>>, vector<1x64x320xbf16>
    %32 = vector.shape_cast %31 : vector<1x64x320xbf16> to vector<64x320xbf16>
    %cst_20 = arith.constant dense<0.000000e+00> : vector<32x320xf32>
    %33 = tpu.matmul %30, %32, %cst_20 {dimension_numbers = #tpu.dot_dimension_numbers<[1], [0], [0], [1], [0, 0, 1, 1], [], []>} : vector<32x64xbf16>, vector<64x320xbf16>, vector<32x320xf32> -> vector<32x320xf32>
    %34 = vector.broadcast %6 : vector<1x320xf32> to vector<32x320xf32>
    %35 = arith.addf %33, %34 : vector<32x320xf32>
    %36 = vector.extract_strided_slice %35 {offsets = [0, 0], sizes = [32, 128], strides = [1, 1]} : vector<32x320xf32> to vector<32x128xf32>
    %37 = arith.mulf %36, %2 : vector<32x128xf32>
    %38 = vector.extract_strided_slice %35 {offsets = [0, 128], sizes = [32, 128], strides = [1, 1]} : vector<32x320xf32> to vector<32x128xf32>
    %39 = arith.mulf %38, %3 : vector<32x128xf32>
    %40 = arith.addf %37, %39 : vector<32x128xf32>
    %41 = arith.truncf %40 : vector<32x128xf32> to vector<32x128xbf16>
    %42 = vector.extract_strided_slice %35 {offsets = [0, 256], sizes = [32, 64], strides = [1, 1]} : vector<32x320xf32> to vector<32x64xf32>
    %43 = arith.truncf %42 : vector<32x64xf32> to vector<32x64xbf16>
    %c0_21 = arith.constant 0 : index
    %c0_22 = arith.constant 0 : index
    %c0_23 = arith.constant 0 : index
    %44 = vector.load %arg5[%c0_21, %c0_22, %c0_23] : memref<2x64x64xbf16, #tpu.memory_space<vmem>>, vector<1x64x64xbf16>
    %45 = vector.shape_cast %44 : vector<1x64x64xbf16> to vector<64x64xbf16>
    %cst_24 = arith.constant 0.000000e+00 : f32
    %46 = vector.broadcast %cst_24 : f32 to vector<32x64xf32>
    %47 = vector.extract_strided_slice %41 {offsets = [0, 0], sizes = [32, 16], strides = [1, 1]} : vector<32x128xbf16> to vector<32x16xbf16>
    %48 = vector.extract_strided_slice %41 {offsets = [0, 64], sizes = [32, 16], strides = [1, 1]} : vector<32x128xbf16> to vector<32x16xbf16>
    "tpu.trace_start"() <{level = 10 : i32, message = "td,sd->ts"}> : () -> ()
    %cst_25 = arith.constant dense<0.000000e+00> : vector<32x32xf32>
    %49 = tpu.matmul %47, %48, %cst_25 {dimension_numbers = #tpu.dot_dimension_numbers<[1], [1], [0], [0], [0, 0, 1, 0], [], []>} : vector<32x16xbf16>, vector<32x16xbf16>, vector<32x32xf32> -> vector<32x32xf32>
    "tpu.trace_stop"() : () -> ()
    %cst_26 = arith.constant 2.500000e-01 : f32
    %50 = vector.broadcast %cst_26 : f32 to vector<32x32xf32>
    %51 = arith.mulf %49, %50 : vector<32x32xf32>
    %52 = arith.addf %51, %1 : vector<32x32xf32>
    %cst_27 = arith.constant dense<0xFF800000> : vector<32xf32>
    %53 = vector.multi_reduction <maximumf>, %52, %cst_27 [1] : vector<32x32xf32> to vector<32xf32>
    %54 = vector.shape_cast %53 : vector<32xf32> to vector<32x1xf32>
    %55 = vector.broadcast %54 : vector<32x1xf32> to vector<32x32xf32>
    %56 = arith.subf %52, %55 : vector<32x32xf32>
    %57 = math.exp %56 : vector<32x32xf32>
    %cst_28 = arith.constant dense<0.000000e+00> : vector<32xf32>
    %58 = vector.multi_reduction <add>, %57, %cst_28 [1] : vector<32x32xf32> to vector<32xf32>
    %59 = vector.shape_cast %58 : vector<32xf32> to vector<32x1xf32>
    %60 = tpu.reciprocal %59 : vector<32x1xf32> -> vector<32x1xf32>
    %61 = vector.broadcast %60 : vector<32x1xf32> to vector<32x32xf32>
    %62 = arith.mulf %57, %61 : vector<32x32xf32>
    %63 = arith.truncf %62 : vector<32x32xf32> to vector<32x32xbf16>
    %64 = vector.extract_strided_slice %43 {offsets = [0, 0], sizes = [32, 16], strides = [1, 1]} : vector<32x64xbf16> to vector<32x16xbf16>
    %cst_29 = arith.constant dense<0.000000e+00> : vector<32x16xf32>
    %65 = tpu.matmul %63, %64, %cst_29 {dimension_numbers = #tpu.dot_dimension_numbers<[1], [0], [0], [1], [0, 0, 1, 1], [], []>} : vector<32x32xbf16>, vector<32x16xbf16>, vector<32x16xf32> -> vector<32x16xf32>
    %66 = arith.truncf %65 : vector<32x16xf32> to vector<32x16xbf16>
    %67 = vector.extract_strided_slice %45 {offsets = [0, 0], sizes = [16, 64], strides = [1, 1]} : vector<64x64xbf16> to vector<16x64xbf16>
    %cst_30 = arith.constant dense<0.000000e+00> : vector<32x64xf32>
    %68 = tpu.matmul %66, %67, %cst_30 {dimension_numbers = #tpu.dot_dimension_numbers<[1], [0], [0], [1], [0, 0, 1, 1], [], []>} : vector<32x16xbf16>, vector<16x64xbf16>, vector<32x64xf32> -> vector<32x64xf32>
    %69 = arith.addf %46, %68 : vector<32x64xf32>
    %70 = vector.extract_strided_slice %41 {offsets = [0, 16], sizes = [32, 16], strides = [1, 1]} : vector<32x128xbf16> to vector<32x16xbf16>
    %71 = vector.extract_strided_slice %41 {offsets = [0, 80], sizes = [32, 16], strides = [1, 1]} : vector<32x128xbf16> to vector<32x16xbf16>
    "tpu.trace_start"() <{level = 10 : i32, message = "td,sd->ts"}> : () -> ()
    %cst_31 = arith.constant dense<0.000000e+00> : vector<32x32xf32>
    %72 = tpu.matmul %70, %71, %cst_31 {dimension_numbers = #tpu.dot_dimension_numbers<[1], [1], [0], [0], [0, 0, 1, 0], [], []>} : vector<32x16xbf16>, vector<32x16xbf16>, vector<32x32xf32> -> vector<32x32xf32>
    "tpu.trace_stop"() : () -> ()
    %cst_32 = arith.constant 2.500000e-01 : f32
    %73 = vector.broadcast %cst_32 : f32 to vector<32x32xf32>
    %74 = arith.mulf %72, %73 : vector<32x32xf32>
    %75 = arith.addf %74, %1 : vector<32x32xf32>
    %cst_33 = arith.constant dense<0xFF800000> : vector<32xf32>
    %76 = vector.multi_reduction <maximumf>, %75, %cst_33 [1] : vector<32x32xf32> to vector<32xf32>
    %77 = vector.shape_cast %76 : vector<32xf32> to vector<32x1xf32>
    %78 = vector.broadcast %77 : vector<32x1xf32> to vector<32x32xf32>
    %79 = arith.subf %75, %78 : vector<32x32xf32>
    %80 = math.exp %79 : vector<32x32xf32>
    %cst_34 = arith.constant dense<0.000000e+00> : vector<32xf32>
    %81 = vector.multi_reduction <add>, %80, %cst_34 [1] : vector<32x32xf32> to vector<32xf32>
    %82 = vector.shape_cast %81 : vector<32xf32> to vector<32x1xf32>
    %83 = tpu.reciprocal %82 : vector<32x1xf32> -> vector<32x1xf32>
    %84 = vector.broadcast %83 : vector<32x1xf32> to vector<32x32xf32>
    %85 = arith.mulf %80, %84 : vector<32x32xf32>
    %86 = arith.truncf %85 : vector<32x32xf32> to vector<32x32xbf16>
    %87 = vector.extract_strided_slice %43 {offsets = [0, 16], sizes = [32, 16], strides = [1, 1]} : vector<32x64xbf16> to vector<32x16xbf16>
    %cst_35 = arith.constant dense<0.000000e+00> : vector<32x16xf32>
    %88 = tpu.matmul %86, %87, %cst_35 {dimension_numbers = #tpu.dot_dimension_numbers<[1], [0], [0], [1], [0, 0, 1, 1], [], []>} : vector<32x32xbf16>, vector<32x16xbf16>, vector<32x16xf32> -> vector<32x16xf32>
    %89 = arith.truncf %88 : vector<32x16xf32> to vector<32x16xbf16>
    %90 = vector.extract_strided_slice %45 {offsets = [16, 0], sizes = [16, 64], strides = [1, 1]} : vector<64x64xbf16> to vector<16x64xbf16>
    %cst_36 = arith.constant dense<0.000000e+00> : vector<32x64xf32>
    %91 = tpu.matmul %89, %90, %cst_36 {dimension_numbers = #tpu.dot_dimension_numbers<[1], [0], [0], [1], [0, 0, 1, 1], [], []>} : vector<32x16xbf16>, vector<16x64xbf16>, vector<32x64xf32> -> vector<32x64xf32>
    %92 = arith.addf %69, %91 : vector<32x64xf32>
    %93 = vector.extract_strided_slice %41 {offsets = [0, 32], sizes = [32, 16], strides = [1, 1]} : vector<32x128xbf16> to vector<32x16xbf16>
    %94 = vector.extract_strided_slice %41 {offsets = [0, 96], sizes = [32, 16], strides = [1, 1]} : vector<32x128xbf16> to vector<32x16xbf16>
    "tpu.trace_start"() <{level = 10 : i32, message = "td,sd->ts"}> : () -> ()
    %cst_37 = arith.constant dense<0.000000e+00> : vector<32x32xf32>
    %95 = tpu.matmul %93, %94, %cst_37 {dimension_numbers = #tpu.dot_dimension_numbers<[1], [1], [0], [0], [0, 0, 1, 0], [], []>} : vector<32x16xbf16>, vector<32x16xbf16>, vector<32x32xf32> -> vector<32x32xf32>
    "tpu.trace_stop"() : () -> ()
    %cst_38 = arith.constant 2.500000e-01 : f32
    %96 = vector.broadcast %cst_38 : f32 to vector<32x32xf32>
    %97 = arith.mulf %95, %96 : vector<32x32xf32>
    %98 = arith.addf %97, %1 : vector<32x32xf32>
    %cst_39 = arith.constant dense<0xFF800000> : vector<32xf32>
    %99 = vector.multi_reduction <maximumf>, %98, %cst_39 [1] : vector<32x32xf32> to vector<32xf32>
    %100 = vector.shape_cast %99 : vector<32xf32> to vector<32x1xf32>
    %101 = vector.broadcast %100 : vector<32x1xf32> to vector<32x32xf32>
    %102 = arith.subf %98, %101 : vector<32x32xf32>
    %103 = math.exp %102 : vector<32x32xf32>
    %cst_40 = arith.constant dense<0.000000e+00> : vector<32xf32>
    %104 = vector.multi_reduction <add>, %103, %cst_40 [1] : vector<32x32xf32> to vector<32xf32>
    %105 = vector.shape_cast %104 : vector<32xf32> to vector<32x1xf32>
    %106 = tpu.reciprocal %105 : vector<32x1xf32> -> vector<32x1xf32>
    %107 = vector.broadcast %106 : vector<32x1xf32> to vector<32x32xf32>
    %108 = arith.mulf %103, %107 : vector<32x32xf32>
    %109 = arith.truncf %108 : vector<32x32xf32> to vector<32x32xbf16>
    %110 = vector.extract_strided_slice %43 {offsets = [0, 32], sizes = [32, 16], strides = [1, 1]} : vector<32x64xbf16> to vector<32x16xbf16>
    %cst_41 = arith.constant dense<0.000000e+00> : vector<32x16xf32>
    %111 = tpu.matmul %109, %110, %cst_41 {dimension_numbers = #tpu.dot_dimension_numbers<[1], [0], [0], [1], [0, 0, 1, 1], [], []>} : vector<32x32xbf16>, vector<32x16xbf16>, vector<32x16xf32> -> vector<32x16xf32>
    %112 = arith.truncf %111 : vector<32x16xf32> to vector<32x16xbf16>
    %113 = vector.extract_strided_slice %45 {offsets = [32, 0], sizes = [16, 64], strides = [1, 1]} : vector<64x64xbf16> to vector<16x64xbf16>
    %cst_42 = arith.constant dense<0.000000e+00> : vector<32x64xf32>
    %114 = tpu.matmul %112, %113, %cst_42 {dimension_numbers = #tpu.dot_dimension_numbers<[1], [0], [0], [1], [0, 0, 1, 1], [], []>} : vector<32x16xbf16>, vector<16x64xbf16>, vector<32x64xf32> -> vector<32x64xf32>
    %115 = arith.addf %92, %114 : vector<32x64xf32>
    %116 = vector.extract_strided_slice %41 {offsets = [0, 48], sizes = [32, 16], strides = [1, 1]} : vector<32x128xbf16> to vector<32x16xbf16>
    %117 = vector.extract_strided_slice %41 {offsets = [0, 112], sizes = [32, 16], strides = [1, 1]} : vector<32x128xbf16> to vector<32x16xbf16>
    "tpu.trace_start"() <{level = 10 : i32, message = "td,sd->ts"}> : () -> ()
    %cst_43 = arith.constant dense<0.000000e+00> : vector<32x32xf32>
    %118 = tpu.matmul %116, %117, %cst_43 {dimension_numbers = #tpu.dot_dimension_numbers<[1], [1], [0], [0], [0, 0, 1, 0], [], []>} : vector<32x16xbf16>, vector<32x16xbf16>, vector<32x32xf32> -> vector<32x32xf32>
    "tpu.trace_stop"() : () -> ()
    %cst_44 = arith.constant 2.500000e-01 : f32
    %119 = vector.broadcast %cst_44 : f32 to vector<32x32xf32>
    %120 = arith.mulf %118, %119 : vector<32x32xf32>
    %121 = arith.addf %120, %1 : vector<32x32xf32>
    %cst_45 = arith.constant dense<0xFF800000> : vector<32xf32>
    %122 = vector.multi_reduction <maximumf>, %121, %cst_45 [1] : vector<32x32xf32> to vector<32xf32>
    %123 = vector.shape_cast %122 : vector<32xf32> to vector<32x1xf32>
    %124 = vector.broadcast %123 : vector<32x1xf32> to vector<32x32xf32>
    %125 = arith.subf %121, %124 : vector<32x32xf32>
    %126 = math.exp %125 : vector<32x32xf32>
    %cst_46 = arith.constant dense<0.000000e+00> : vector<32xf32>
    %127 = vector.multi_reduction <add>, %126, %cst_46 [1] : vector<32x32xf32> to vector<32xf32>
    %128 = vector.shape_cast %127 : vector<32xf32> to vector<32x1xf32>
    %129 = tpu.reciprocal %128 : vector<32x1xf32> -> vector<32x1xf32>
    %130 = vector.broadcast %129 : vector<32x1xf32> to vector<32x32xf32>
    %131 = arith.mulf %126, %130 : vector<32x32xf32>
    %132 = arith.truncf %131 : vector<32x32xf32> to vector<32x32xbf16>
    %133 = vector.extract_strided_slice %43 {offsets = [0, 48], sizes = [32, 16], strides = [1, 1]} : vector<32x64xbf16> to vector<32x16xbf16>
    %cst_47 = arith.constant dense<0.000000e+00> : vector<32x16xf32>
    %134 = tpu.matmul %132, %133, %cst_47 {dimension_numbers = #tpu.dot_dimension_numbers<[1], [0], [0], [1], [0, 0, 1, 1], [], []>} : vector<32x32xbf16>, vector<32x16xbf16>, vector<32x16xf32> -> vector<32x16xf32>
    %135 = arith.truncf %134 : vector<32x16xf32> to vector<32x16xbf16>
    %136 = vector.extract_strided_slice %45 {offsets = [48, 0], sizes = [16, 64], strides = [1, 1]} : vector<64x64xbf16> to vector<16x64xbf16>
    %cst_48 = arith.constant dense<0.000000e+00> : vector<32x64xf32>
    %137 = tpu.matmul %135, %136, %cst_48 {dimension_numbers = #tpu.dot_dimension_numbers<[1], [0], [0], [1], [0, 0, 1, 1], [], []>} : vector<32x16xbf16>, vector<16x64xbf16>, vector<32x64xf32> -> vector<32x64xf32>
    %138 = arith.addf %115, %137 : vector<32x64xf32>
    %139 = vector.broadcast %7 : vector<1x64xf32> to vector<32x64xf32>
    %140 = arith.addf %138, %139 : vector<32x64xf32>
    %c0_49 = arith.constant 0 : index
    %c0_50 = arith.constant 0 : index
    %c0_51 = arith.constant 0 : index
    %141 = vector.load %arg6[%c0_49, %c0_50, %c0_51] : memref<2x64x128xbf16, #tpu.memory_space<vmem>>, vector<1x64x128xbf16>
    %142 = vector.shape_cast %141 : vector<1x64x128xbf16> to vector<64x128xbf16>
    %cst_52 = arith.constant dense<0.000000e+00> : vector<32x128xf32>
    %143 = tpu.matmul %30, %142, %cst_52 {dimension_numbers = #tpu.dot_dimension_numbers<[1], [0], [0], [1], [0, 0, 1, 1], [], []>} : vector<32x64xbf16>, vector<64x128xbf16>, vector<32x128xf32> -> vector<32x128xf32>
    %144 = vector.broadcast %8 : vector<1x128xf32> to vector<32x128xf32>
    %145 = arith.addf %143, %144 : vector<32x128xf32>
    %cst_53 = arith.constant 5.000000e-01 : f32
    %146 = vector.broadcast %cst_53 : f32 to vector<32x128xf32>
    %147 = arith.mulf %146, %145 : vector<32x128xf32>
    %cst_54 = arith.constant 4.471500e-02 : f32
    %148 = vector.broadcast %cst_54 : f32 to vector<32x128xf32>
    %149 = arith.mulf %148, %145 : vector<32x128xf32>
    %150 = arith.mulf %149, %145 : vector<32x128xf32>
    %151 = arith.mulf %150, %145 : vector<32x128xf32>
    %152 = arith.addf %145, %151 : vector<32x128xf32>
    %cst_55 = arith.constant 0.797884583 : f32
    %153 = vector.broadcast %cst_55 : f32 to vector<32x128xf32>
    %154 = arith.mulf %153, %152 : vector<32x128xf32>
    %155 = math.tanh %154 : vector<32x128xf32>
    %cst_56 = arith.constant 1.000000e+00 : f32
    %156 = vector.broadcast %cst_56 : f32 to vector<32x128xf32>
    %157 = arith.addf %156, %155 : vector<32x128xf32>
    %158 = arith.mulf %147, %157 : vector<32x128xf32>
    %159 = arith.truncf %158 : vector<32x128xf32> to vector<32x128xbf16>
    %c0_57 = arith.constant 0 : index
    %c0_58 = arith.constant 0 : index
    %c0_59 = arith.constant 0 : index
    %160 = vector.load %arg7[%c0_57, %c0_58, %c0_59] : memref<2x128x64xbf16, #tpu.memory_space<vmem>>, vector<1x128x64xbf16>
    %161 = vector.shape_cast %160 : vector<1x128x64xbf16> to vector<128x64xbf16>
    %cst_60 = arith.constant dense<0.000000e+00> : vector<32x64xf32>
    %162 = tpu.matmul %159, %161, %cst_60 {dimension_numbers = #tpu.dot_dimension_numbers<[1], [0], [0], [1], [0, 0, 1, 1], [], []>} : vector<32x128xbf16>, vector<128x64xbf16>, vector<32x64xf32> -> vector<32x64xf32>
    %163 = vector.broadcast %9 : vector<1x64xf32> to vector<32x64xf32>
    %164 = arith.addf %162, %163 : vector<32x64xf32>
    %165 = arith.addf %0, %140 : vector<32x64xf32>
    %166 = arith.addf %165, %164 : vector<32x64xf32>
    %c6 = arith.constant 6 : index
    %c0_61 = arith.constant 0 : index
    %167 = vector.load %arg3[%c6, %c0_61] : memref<16x320xf32, #tpu.memory_space<vmem>>, vector<1x64xf32>
    %c7 = arith.constant 7 : index
    %c0_62 = arith.constant 0 : index
    %168 = vector.load %arg3[%c7, %c0_62] : memref<16x320xf32, #tpu.memory_space<vmem>>, vector<1x64xf32>
    %c8 = arith.constant 8 : index
    %c0_63 = arith.constant 0 : index
    %169 = vector.load %arg3[%c8, %c0_63] : memref<16x320xf32, #tpu.memory_space<vmem>>, vector<1x320xf32>
    %c9 = arith.constant 9 : index
    %c0_64 = arith.constant 0 : index
    %170 = vector.load %arg3[%c9, %c0_64] : memref<16x320xf32, #tpu.memory_space<vmem>>, vector<1x64xf32>
    %c10 = arith.constant 10 : index
    %c0_65 = arith.constant 0 : index
    %171 = vector.load %arg3[%c10, %c0_65] : memref<16x320xf32, #tpu.memory_space<vmem>>, vector<1x128xf32>
    %c11 = arith.constant 11 : index
    %c0_66 = arith.constant 0 : index
    %172 = vector.load %arg3[%c11, %c0_66] : memref<16x320xf32, #tpu.memory_space<vmem>>, vector<1x64xf32>
    %cst_67 = arith.constant dense<0.000000e+00> : vector<32xf32>
    %173 = vector.multi_reduction <add>, %166, %cst_67 [1] : vector<32x64xf32> to vector<32xf32>
    %174 = vector.shape_cast %173 : vector<32xf32> to vector<32x1xf32>
    %cst_68 = arith.constant 6.400000e+01 : f32
    %175 = vector.broadcast %cst_68 : f32 to vector<32x1xf32>
    %176 = arith.divf %174, %175 : vector<32x1xf32>
    %177 = vector.broadcast %176 : vector<32x1xf32> to vector<32x64xf32>
    %178 = arith.subf %166, %177 : vector<32x64xf32>
    %179 = arith.mulf %178, %178 : vector<32x64xf32>
    %cst_69 = arith.constant dense<0.000000e+00> : vector<32xf32>
    %180 = vector.multi_reduction <add>, %179, %cst_69 [1] : vector<32x64xf32> to vector<32xf32>
    %181 = vector.shape_cast %180 : vector<32xf32> to vector<32x1xf32>
    %cst_70 = arith.constant 6.400000e+01 : f32
    %182 = vector.broadcast %cst_70 : f32 to vector<32x1xf32>
    %183 = arith.divf %181, %182 : vector<32x1xf32>
    %cst_71 = arith.constant 9.99999974E-6 : f32
    %184 = vector.broadcast %cst_71 : f32 to vector<32x1xf32>
    %185 = arith.addf %183, %184 : vector<32x1xf32>
    %186 = math.rsqrt %185 : vector<32x1xf32>
    %187 = vector.broadcast %186 : vector<32x1xf32> to vector<32x64xf32>
    %188 = arith.mulf %178, %187 : vector<32x64xf32>
    %189 = vector.broadcast %167 : vector<1x64xf32> to vector<32x64xf32>
    %190 = arith.mulf %188, %189 : vector<32x64xf32>
    %191 = vector.broadcast %168 : vector<1x64xf32> to vector<32x64xf32>
    %192 = arith.addf %190, %191 : vector<32x64xf32>
    %193 = arith.truncf %192 : vector<32x64xf32> to vector<32x64xbf16>
    %c1_72 = arith.constant 1 : index
    %c0_73 = arith.constant 0 : index
    %c0_74 = arith.constant 0 : index
    %194 = vector.load %arg4[%c1_72, %c0_73, %c0_74] : memref<2x64x320xbf16, #tpu.memory_space<vmem>>, vector<1x64x320xbf16>
    %195 = vector.shape_cast %194 : vector<1x64x320xbf16> to vector<64x320xbf16>
    %cst_75 = arith.constant dense<0.000000e+00> : vector<32x320xf32>
    %196 = tpu.matmul %193, %195, %cst_75 {dimension_numbers = #tpu.dot_dimension_numbers<[1], [0], [0], [1], [0, 0, 1, 1], [], []>} : vector<32x64xbf16>, vector<64x320xbf16>, vector<32x320xf32> -> vector<32x320xf32>
    %197 = vector.broadcast %169 : vector<1x320xf32> to vector<32x320xf32>
    %198 = arith.addf %196, %197 : vector<32x320xf32>
    %199 = vector.extract_strided_slice %198 {offsets = [0, 0], sizes = [32, 128], strides = [1, 1]} : vector<32x320xf32> to vector<32x128xf32>
    %200 = arith.mulf %199, %2 : vector<32x128xf32>
    %201 = vector.extract_strided_slice %198 {offsets = [0, 128], sizes = [32, 128], strides = [1, 1]} : vector<32x320xf32> to vector<32x128xf32>
    %202 = arith.mulf %201, %3 : vector<32x128xf32>
    %203 = arith.addf %200, %202 : vector<32x128xf32>
    %204 = arith.truncf %203 : vector<32x128xf32> to vector<32x128xbf16>
    %205 = vector.extract_strided_slice %198 {offsets = [0, 256], sizes = [32, 64], strides = [1, 1]} : vector<32x320xf32> to vector<32x64xf32>
    %206 = arith.truncf %205 : vector<32x64xf32> to vector<32x64xbf16>
    %c1_76 = arith.constant 1 : index
    %c0_77 = arith.constant 0 : index
    %c0_78 = arith.constant 0 : index
    %207 = vector.load %arg5[%c1_76, %c0_77, %c0_78] : memref<2x64x64xbf16, #tpu.memory_space<vmem>>, vector<1x64x64xbf16>
    %208 = vector.shape_cast %207 : vector<1x64x64xbf16> to vector<64x64xbf16>
    %cst_79 = arith.constant 0.000000e+00 : f32
    %209 = vector.broadcast %cst_79 : f32 to vector<32x64xf32>
    %210 = vector.extract_strided_slice %204 {offsets = [0, 0], sizes = [32, 16], strides = [1, 1]} : vector<32x128xbf16> to vector<32x16xbf16>
    %211 = vector.extract_strided_slice %204 {offsets = [0, 64], sizes = [32, 16], strides = [1, 1]} : vector<32x128xbf16> to vector<32x16xbf16>
    "tpu.trace_start"() <{level = 10 : i32, message = "td,sd->ts"}> : () -> ()
    %cst_80 = arith.constant dense<0.000000e+00> : vector<32x32xf32>
    %212 = tpu.matmul %210, %211, %cst_80 {dimension_numbers = #tpu.dot_dimension_numbers<[1], [1], [0], [0], [0, 0, 1, 0], [], []>} : vector<32x16xbf16>, vector<32x16xbf16>, vector<32x32xf32> -> vector<32x32xf32>
    "tpu.trace_stop"() : () -> ()
    %cst_81 = arith.constant 2.500000e-01 : f32
    %213 = vector.broadcast %cst_81 : f32 to vector<32x32xf32>
    %214 = arith.mulf %212, %213 : vector<32x32xf32>
    %215 = arith.addf %214, %1 : vector<32x32xf32>
    %cst_82 = arith.constant dense<0xFF800000> : vector<32xf32>
    %216 = vector.multi_reduction <maximumf>, %215, %cst_82 [1] : vector<32x32xf32> to vector<32xf32>
    %217 = vector.shape_cast %216 : vector<32xf32> to vector<32x1xf32>
    %218 = vector.broadcast %217 : vector<32x1xf32> to vector<32x32xf32>
    %219 = arith.subf %215, %218 : vector<32x32xf32>
    %220 = math.exp %219 : vector<32x32xf32>
    %cst_83 = arith.constant dense<0.000000e+00> : vector<32xf32>
    %221 = vector.multi_reduction <add>, %220, %cst_83 [1] : vector<32x32xf32> to vector<32xf32>
    %222 = vector.shape_cast %221 : vector<32xf32> to vector<32x1xf32>
    %223 = tpu.reciprocal %222 : vector<32x1xf32> -> vector<32x1xf32>
    %224 = vector.broadcast %223 : vector<32x1xf32> to vector<32x32xf32>
    %225 = arith.mulf %220, %224 : vector<32x32xf32>
    %226 = arith.truncf %225 : vector<32x32xf32> to vector<32x32xbf16>
    %227 = vector.extract_strided_slice %206 {offsets = [0, 0], sizes = [32, 16], strides = [1, 1]} : vector<32x64xbf16> to vector<32x16xbf16>
    %cst_84 = arith.constant dense<0.000000e+00> : vector<32x16xf32>
    %228 = tpu.matmul %226, %227, %cst_84 {dimension_numbers = #tpu.dot_dimension_numbers<[1], [0], [0], [1], [0, 0, 1, 1], [], []>} : vector<32x32xbf16>, vector<32x16xbf16>, vector<32x16xf32> -> vector<32x16xf32>
    %229 = arith.truncf %228 : vector<32x16xf32> to vector<32x16xbf16>
    %230 = vector.extract_strided_slice %208 {offsets = [0, 0], sizes = [16, 64], strides = [1, 1]} : vector<64x64xbf16> to vector<16x64xbf16>
    %cst_85 = arith.constant dense<0.000000e+00> : vector<32x64xf32>
    %231 = tpu.matmul %229, %230, %cst_85 {dimension_numbers = #tpu.dot_dimension_numbers<[1], [0], [0], [1], [0, 0, 1, 1], [], []>} : vector<32x16xbf16>, vector<16x64xbf16>, vector<32x64xf32> -> vector<32x64xf32>
    %232 = arith.addf %209, %231 : vector<32x64xf32>
    %233 = vector.extract_strided_slice %204 {offsets = [0, 16], sizes = [32, 16], strides = [1, 1]} : vector<32x128xbf16> to vector<32x16xbf16>
    %234 = vector.extract_strided_slice %204 {offsets = [0, 80], sizes = [32, 16], strides = [1, 1]} : vector<32x128xbf16> to vector<32x16xbf16>
    "tpu.trace_start"() <{level = 10 : i32, message = "td,sd->ts"}> : () -> ()
    %cst_86 = arith.constant dense<0.000000e+00> : vector<32x32xf32>
    %235 = tpu.matmul %233, %234, %cst_86 {dimension_numbers = #tpu.dot_dimension_numbers<[1], [1], [0], [0], [0, 0, 1, 0], [], []>} : vector<32x16xbf16>, vector<32x16xbf16>, vector<32x32xf32> -> vector<32x32xf32>
    "tpu.trace_stop"() : () -> ()
    %cst_87 = arith.constant 2.500000e-01 : f32
    %236 = vector.broadcast %cst_87 : f32 to vector<32x32xf32>
    %237 = arith.mulf %235, %236 : vector<32x32xf32>
    %238 = arith.addf %237, %1 : vector<32x32xf32>
    %cst_88 = arith.constant dense<0xFF800000> : vector<32xf32>
    %239 = vector.multi_reduction <maximumf>, %238, %cst_88 [1] : vector<32x32xf32> to vector<32xf32>
    %240 = vector.shape_cast %239 : vector<32xf32> to vector<32x1xf32>
    %241 = vector.broadcast %240 : vector<32x1xf32> to vector<32x32xf32>
    %242 = arith.subf %238, %241 : vector<32x32xf32>
    %243 = math.exp %242 : vector<32x32xf32>
    %cst_89 = arith.constant dense<0.000000e+00> : vector<32xf32>
    %244 = vector.multi_reduction <add>, %243, %cst_89 [1] : vector<32x32xf32> to vector<32xf32>
    %245 = vector.shape_cast %244 : vector<32xf32> to vector<32x1xf32>
    %246 = tpu.reciprocal %245 : vector<32x1xf32> -> vector<32x1xf32>
    %247 = vector.broadcast %246 : vector<32x1xf32> to vector<32x32xf32>
    %248 = arith.mulf %243, %247 : vector<32x32xf32>
    %249 = arith.truncf %248 : vector<32x32xf32> to vector<32x32xbf16>
    %250 = vector.extract_strided_slice %206 {offsets = [0, 16], sizes = [32, 16], strides = [1, 1]} : vector<32x64xbf16> to vector<32x16xbf16>
    %cst_90 = arith.constant dense<0.000000e+00> : vector<32x16xf32>
    %251 = tpu.matmul %249, %250, %cst_90 {dimension_numbers = #tpu.dot_dimension_numbers<[1], [0], [0], [1], [0, 0, 1, 1], [], []>} : vector<32x32xbf16>, vector<32x16xbf16>, vector<32x16xf32> -> vector<32x16xf32>
    %252 = arith.truncf %251 : vector<32x16xf32> to vector<32x16xbf16>
    %253 = vector.extract_strided_slice %208 {offsets = [16, 0], sizes = [16, 64], strides = [1, 1]} : vector<64x64xbf16> to vector<16x64xbf16>
    %cst_91 = arith.constant dense<0.000000e+00> : vector<32x64xf32>
    %254 = tpu.matmul %252, %253, %cst_91 {dimension_numbers = #tpu.dot_dimension_numbers<[1], [0], [0], [1], [0, 0, 1, 1], [], []>} : vector<32x16xbf16>, vector<16x64xbf16>, vector<32x64xf32> -> vector<32x64xf32>
    %255 = arith.addf %232, %254 : vector<32x64xf32>
    %256 = vector.extract_strided_slice %204 {offsets = [0, 32], sizes = [32, 16], strides = [1, 1]} : vector<32x128xbf16> to vector<32x16xbf16>
    %257 = vector.extract_strided_slice %204 {offsets = [0, 96], sizes = [32, 16], strides = [1, 1]} : vector<32x128xbf16> to vector<32x16xbf16>
    "tpu.trace_start"() <{level = 10 : i32, message = "td,sd->ts"}> : () -> ()
    %cst_92 = arith.constant dense<0.000000e+00> : vector<32x32xf32>
    %258 = tpu.matmul %256, %257, %cst_92 {dimension_numbers = #tpu.dot_dimension_numbers<[1], [1], [0], [0], [0, 0, 1, 0], [], []>} : vector<32x16xbf16>, vector<32x16xbf16>, vector<32x32xf32> -> vector<32x32xf32>
    "tpu.trace_stop"() : () -> ()
    %cst_93 = arith.constant 2.500000e-01 : f32
    %259 = vector.broadcast %cst_93 : f32 to vector<32x32xf32>
    %260 = arith.mulf %258, %259 : vector<32x32xf32>
    %261 = arith.addf %260, %1 : vector<32x32xf32>
    %cst_94 = arith.constant dense<0xFF800000> : vector<32xf32>
    %262 = vector.multi_reduction <maximumf>, %261, %cst_94 [1] : vector<32x32xf32> to vector<32xf32>
    %263 = vector.shape_cast %262 : vector<32xf32> to vector<32x1xf32>
    %264 = vector.broadcast %263 : vector<32x1xf32> to vector<32x32xf32>
    %265 = arith.subf %261, %264 : vector<32x32xf32>
    %266 = math.exp %265 : vector<32x32xf32>
    %cst_95 = arith.constant dense<0.000000e+00> : vector<32xf32>
    %267 = vector.multi_reduction <add>, %266, %cst_95 [1] : vector<32x32xf32> to vector<32xf32>
    %268 = vector.shape_cast %267 : vector<32xf32> to vector<32x1xf32>
    %269 = tpu.reciprocal %268 : vector<32x1xf32> -> vector<32x1xf32>
    %270 = vector.broadcast %269 : vector<32x1xf32> to vector<32x32xf32>
    %271 = arith.mulf %266, %270 : vector<32x32xf32>
    %272 = arith.truncf %271 : vector<32x32xf32> to vector<32x32xbf16>
    %273 = vector.extract_strided_slice %206 {offsets = [0, 32], sizes = [32, 16], strides = [1, 1]} : vector<32x64xbf16> to vector<32x16xbf16>
    %cst_96 = arith.constant dense<0.000000e+00> : vector<32x16xf32>
    %274 = tpu.matmul %272, %273, %cst_96 {dimension_numbers = #tpu.dot_dimension_numbers<[1], [0], [0], [1], [0, 0, 1, 1], [], []>} : vector<32x32xbf16>, vector<32x16xbf16>, vector<32x16xf32> -> vector<32x16xf32>
    %275 = arith.truncf %274 : vector<32x16xf32> to vector<32x16xbf16>
    %276 = vector.extract_strided_slice %208 {offsets = [32, 0], sizes = [16, 64], strides = [1, 1]} : vector<64x64xbf16> to vector<16x64xbf16>
    %cst_97 = arith.constant dense<0.000000e+00> : vector<32x64xf32>
    %277 = tpu.matmul %275, %276, %cst_97 {dimension_numbers = #tpu.dot_dimension_numbers<[1], [0], [0], [1], [0, 0, 1, 1], [], []>} : vector<32x16xbf16>, vector<16x64xbf16>, vector<32x64xf32> -> vector<32x64xf32>
    %278 = arith.addf %255, %277 : vector<32x64xf32>
    %279 = vector.extract_strided_slice %204 {offsets = [0, 48], sizes = [32, 16], strides = [1, 1]} : vector<32x128xbf16> to vector<32x16xbf16>
    %280 = vector.extract_strided_slice %204 {offsets = [0, 112], sizes = [32, 16], strides = [1, 1]} : vector<32x128xbf16> to vector<32x16xbf16>
    "tpu.trace_start"() <{level = 10 : i32, message = "td,sd->ts"}> : () -> ()
    %cst_98 = arith.constant dense<0.000000e+00> : vector<32x32xf32>
    %281 = tpu.matmul %279, %280, %cst_98 {dimension_numbers = #tpu.dot_dimension_numbers<[1], [1], [0], [0], [0, 0, 1, 0], [], []>} : vector<32x16xbf16>, vector<32x16xbf16>, vector<32x32xf32> -> vector<32x32xf32>
    "tpu.trace_stop"() : () -> ()
    %cst_99 = arith.constant 2.500000e-01 : f32
    %282 = vector.broadcast %cst_99 : f32 to vector<32x32xf32>
    %283 = arith.mulf %281, %282 : vector<32x32xf32>
    %284 = arith.addf %283, %1 : vector<32x32xf32>
    %cst_100 = arith.constant dense<0xFF800000> : vector<32xf32>
    %285 = vector.multi_reduction <maximumf>, %284, %cst_100 [1] : vector<32x32xf32> to vector<32xf32>
    %286 = vector.shape_cast %285 : vector<32xf32> to vector<32x1xf32>
    %287 = vector.broadcast %286 : vector<32x1xf32> to vector<32x32xf32>
    %288 = arith.subf %284, %287 : vector<32x32xf32>
    %289 = math.exp %288 : vector<32x32xf32>
    %cst_101 = arith.constant dense<0.000000e+00> : vector<32xf32>
    %290 = vector.multi_reduction <add>, %289, %cst_101 [1] : vector<32x32xf32> to vector<32xf32>
    %291 = vector.shape_cast %290 : vector<32xf32> to vector<32x1xf32>
    %292 = tpu.reciprocal %291 : vector<32x1xf32> -> vector<32x1xf32>
    %293 = vector.broadcast %292 : vector<32x1xf32> to vector<32x32xf32>
    %294 = arith.mulf %289, %293 : vector<32x32xf32>
    %295 = arith.truncf %294 : vector<32x32xf32> to vector<32x32xbf16>
    %296 = vector.extract_strided_slice %206 {offsets = [0, 48], sizes = [32, 16], strides = [1, 1]} : vector<32x64xbf16> to vector<32x16xbf16>
    %cst_102 = arith.constant dense<0.000000e+00> : vector<32x16xf32>
    %297 = tpu.matmul %295, %296, %cst_102 {dimension_numbers = #tpu.dot_dimension_numbers<[1], [0], [0], [1], [0, 0, 1, 1], [], []>} : vector<32x32xbf16>, vector<32x16xbf16>, vector<32x16xf32> -> vector<32x16xf32>
    %298 = arith.truncf %297 : vector<32x16xf32> to vector<32x16xbf16>
    %299 = vector.extract_strided_slice %208 {offsets = [48, 0], sizes = [16, 64], strides = [1, 1]} : vector<64x64xbf16> to vector<16x64xbf16>
    %cst_103 = arith.constant dense<0.000000e+00> : vector<32x64xf32>
    %300 = tpu.matmul %298, %299, %cst_103 {dimension_numbers = #tpu.dot_dimension_numbers<[1], [0], [0], [1], [0, 0, 1, 1], [], []>} : vector<32x16xbf16>, vector<16x64xbf16>, vector<32x64xf32> -> vector<32x64xf32>
    %301 = arith.addf %278, %300 : vector<32x64xf32>
    %302 = vector.broadcast %170 : vector<1x64xf32> to vector<32x64xf32>
    %303 = arith.addf %301, %302 : vector<32x64xf32>
    %c1_104 = arith.constant 1 : index
    %c0_105 = arith.constant 0 : index
    %c0_106 = arith.constant 0 : index
    %304 = vector.load %arg6[%c1_104, %c0_105, %c0_106] : memref<2x64x128xbf16, #tpu.memory_space<vmem>>, vector<1x64x128xbf16>
    %305 = vector.shape_cast %304 : vector<1x64x128xbf16> to vector<64x128xbf16>
    %cst_107 = arith.constant dense<0.000000e+00> : vector<32x128xf32>
    %306 = tpu.matmul %193, %305, %cst_107 {dimension_numbers = #tpu.dot_dimension_numbers<[1], [0], [0], [1], [0, 0, 1, 1], [], []>} : vector<32x64xbf16>, vector<64x128xbf16>, vector<32x128xf32> -> vector<32x128xf32>
    %307 = vector.broadcast %171 : vector<1x128xf32> to vector<32x128xf32>
    %308 = arith.addf %306, %307 : vector<32x128xf32>
    %cst_108 = arith.constant 5.000000e-01 : f32
    %309 = vector.broadcast %cst_108 : f32 to vector<32x128xf32>
    %310 = arith.mulf %309, %308 : vector<32x128xf32>
    %cst_109 = arith.constant 4.471500e-02 : f32
    %311 = vector.broadcast %cst_109 : f32 to vector<32x128xf32>
    %312 = arith.mulf %311, %308 : vector<32x128xf32>
    %313 = arith.mulf %312, %308 : vector<32x128xf32>
    %314 = arith.mulf %313, %308 : vector<32x128xf32>
    %315 = arith.addf %308, %314 : vector<32x128xf32>
    %cst_110 = arith.constant 0.797884583 : f32
    %316 = vector.broadcast %cst_110 : f32 to vector<32x128xf32>
    %317 = arith.mulf %316, %315 : vector<32x128xf32>
    %318 = math.tanh %317 : vector<32x128xf32>
    %cst_111 = arith.constant 1.000000e+00 : f32
    %319 = vector.broadcast %cst_111 : f32 to vector<32x128xf32>
    %320 = arith.addf %319, %318 : vector<32x128xf32>
    %321 = arith.mulf %310, %320 : vector<32x128xf32>
    %322 = arith.truncf %321 : vector<32x128xf32> to vector<32x128xbf16>
    %c1_112 = arith.constant 1 : index
    %c0_113 = arith.constant 0 : index
    %c0_114 = arith.constant 0 : index
    %323 = vector.load %arg7[%c1_112, %c0_113, %c0_114] : memref<2x128x64xbf16, #tpu.memory_space<vmem>>, vector<1x128x64xbf16>
    %324 = vector.shape_cast %323 : vector<1x128x64xbf16> to vector<128x64xbf16>
    %cst_115 = arith.constant dense<0.000000e+00> : vector<32x64xf32>
    %325 = tpu.matmul %322, %324, %cst_115 {dimension_numbers = #tpu.dot_dimension_numbers<[1], [0], [0], [1], [0, 0, 1, 1], [], []>} : vector<32x128xbf16>, vector<128x64xbf16>, vector<32x64xf32> -> vector<32x64xf32>
    %326 = vector.broadcast %172 : vector<1x64xf32> to vector<32x64xf32>
    %327 = arith.addf %325, %326 : vector<32x64xf32>
    %328 = arith.addf %166, %303 : vector<32x64xf32>
    %329 = arith.addf %328, %327 : vector<32x64xf32>
    %c12 = arith.constant 12 : index
    %c0_116 = arith.constant 0 : index
    %330 = vector.load %arg3[%c12, %c0_116] : memref<16x320xf32, #tpu.memory_space<vmem>>, vector<1x64xf32>
    %c13 = arith.constant 13 : index
    %c0_117 = arith.constant 0 : index
    %331 = vector.load %arg3[%c13, %c0_117] : memref<16x320xf32, #tpu.memory_space<vmem>>, vector<1x64xf32>
    %cst_118 = arith.constant dense<0.000000e+00> : vector<32xf32>
    %332 = vector.multi_reduction <add>, %329, %cst_118 [1] : vector<32x64xf32> to vector<32xf32>
    %333 = vector.shape_cast %332 : vector<32xf32> to vector<32x1xf32>
    %cst_119 = arith.constant 6.400000e+01 : f32
    %334 = vector.broadcast %cst_119 : f32 to vector<32x1xf32>
    %335 = arith.divf %333, %334 : vector<32x1xf32>
    %336 = vector.broadcast %335 : vector<32x1xf32> to vector<32x64xf32>
    %337 = arith.subf %329, %336 : vector<32x64xf32>
    %338 = arith.mulf %337, %337 : vector<32x64xf32>
    %cst_120 = arith.constant dense<0.000000e+00> : vector<32xf32>
    %339 = vector.multi_reduction <add>, %338, %cst_120 [1] : vector<32x64xf32> to vector<32xf32>
    %340 = vector.shape_cast %339 : vector<32xf32> to vector<32x1xf32>
    %cst_121 = arith.constant 6.400000e+01 : f32
    %341 = vector.broadcast %cst_121 : f32 to vector<32x1xf32>
    %342 = arith.divf %340, %341 : vector<32x1xf32>
    %cst_122 = arith.constant 9.99999974E-6 : f32
    %343 = vector.broadcast %cst_122 : f32 to vector<32x1xf32>
    %344 = arith.addf %342, %343 : vector<32x1xf32>
    %345 = math.rsqrt %344 : vector<32x1xf32>
    %346 = vector.broadcast %345 : vector<32x1xf32> to vector<32x64xf32>
    %347 = arith.mulf %337, %346 : vector<32x64xf32>
    %348 = vector.broadcast %330 : vector<1x64xf32> to vector<32x64xf32>
    %349 = arith.mulf %347, %348 : vector<32x64xf32>
    %350 = vector.broadcast %331 : vector<1x64xf32> to vector<32x64xf32>
    %351 = arith.addf %349, %350 : vector<32x64xf32>
    %352 = arith.truncf %351 : vector<32x64xf32> to vector<32x64xbf16>
    %c0_123 = arith.constant 0 : index
    %c0_124 = arith.constant 0 : index
    %353 = vector.load %arg8[%c0_123, %c0_124] : memref<64x128xbf16, #tpu.memory_space<vmem>>, vector<64x128xbf16>
    %cst_125 = arith.constant dense<0.000000e+00> : vector<32x128xf32>
    %354 = tpu.matmul %352, %353, %cst_125 {dimension_numbers = #tpu.dot_dimension_numbers<[1], [0], [0], [1], [0, 0, 1, 1], [], []>} : vector<32x64xbf16>, vector<64x128xbf16>, vector<32x128xf32> -> vector<32x128xf32>
    %c14 = arith.constant 14 : index
    %c0_126 = arith.constant 0 : index
    %355 = vector.load %arg3[%c14, %c0_126] : memref<16x320xf32, #tpu.memory_space<vmem>>, vector<1x128xf32>
    %356 = vector.broadcast %355 : vector<1x128xf32> to vector<32x128xf32>
    %357 = arith.addf %354, %356 : vector<32x128xf32>
    %c0_127 = arith.constant 0 : index
    %c0_128 = arith.constant 0 : index
    %358 = vector.load %arg9[%c0_127, %c0_128] : memref<32x128xf32, #tpu.memory_space<vmem>>, vector<32x128xf32>
    tpu.vector_store %arg9[%c0_127, %c0_128], %357 {strides = array<i32>} : memref<32x128xf32, #tpu.memory_space<vmem>>, vector<32x128xf32>,
    return
  }
}

</mosaic_0001>

<bundles_post_ra>
// kernel: multimodal_phi_forward.1
= control target key start
LH: loop header
LB: loop body
LE: loop exit
PB: predicated region body
PF: predicated region fallthrough
CT: control target
= control target key end

     0   :  { %vm56_vm0 = vcmask 523264   ;;  %v4203_v34 = vmov 0   ;;  %vm354_vm1 = vcmask 130048   ;;  %s4204_s21 = smov 64   ;;  %vm424_vm2 = vcmask 261120   ;;  %s4205_s30 = smov 48   ;;  %s5167_s0 = inlined_call_operand.vmem [shape: f32[32,64], index: 0, kind: input, shape index: {}]   ;;  %s5168_s4 = inlined_call_operand.vmem [shape: bf16[2,64,320], index: 4, kind: input, shape index: {}]   ;;  %s5169_s3 = inlined_call_operand.vmem [shape: f32[16,320], index: 3, kind: input, shape index: {}]   ;;  %s5170_s2 = inlined_call_operand.vmem [shape: f32[64,128], index: 2, kind: input, shape index: {}]   ;;  %s5171_s1 = inlined_call_operand.vmem [shape: f32[32,32], index: 1, kind: input, shape index: {}]   ;;  %s5172_s6 = inlined_call_operand.vmem [shape: bf16[2,64,128], index: 6, kind: input, shape index: {}]   ;;  %s5173_s5 = inlined_call_operand.vmem [shape: bf16[2,64,64], index: 5, kind: input, shape index: {}]   ;;  %s5174_s7 = inlined_call_operand.vmem [shape: bf16[2,128,64], index: 7, kind: input, shape index: {}]   ;;  %s5175_s8 = inlined_call_operand.vmem [shape: bf16[64,128], index: 8, kind: input, shape index: {}]   ;;  %s5176_s9 = inlined_call_operand.vmem [shape: f32[32,128], index: 9, kind: output, shape index: {}]  }
   0x1   :  { %v33_v0 = vld [vmem:[%s5167_s0] sm:$0xff]  ;;  %v35_v1 = vld [vmem:[%s5167_s0 + $0x10] sm:$0xff]  ;;  %v34_v2 = vld [vmem:[%s5167_s0 + $0x8] sm:$0xff]  ;;  %254 = vmatprep.mubr.bf16.mxu0 %v4203_v34  ;;  %s4206_s10 = smov 112   ;;  %s4207_s11 = smov 32  }
   0x2   :  { %v57_v3 = vsel %vm56_vm0, %v33_v0, 0.0  ;;  %v63_v4 = vsel %vm56_vm0, %v35_v1, 0.0  ;;  %v36_v5 = vld [vmem:[%s5167_s0 + $0x18] sm:$0xff]  ;;  %v60_v6 = vsel %vm56_vm0, %v34_v2, 0.0  ;;  %v3945_v28 = vld [vmem:[%s5168_s4 + $0x4] ss:$12 sps:$4 sm:$0xff]  }
   0x3   :  { %58 = vadd.xlane.f32.xlu0 %v57_v3  ;;  %64 = vadd.xlane.f32.xlu1 %v63_v4  ;;  %v66_v7 = vsel %vm56_vm0, %v36_v5, 0.0  ;;  %v3947_v29 = vld [vmem:[%s5168_s4] ss:$12 sps:$4 sm:$0xff]   ;;  %v3948_v30 = vld [vmem:[%s5168_s4 + $0x1c] ss:$12 sps:$4 sm:$0xff]   ;;  %s4208_s12 = smov 96  }
   0x4   :  { %222 = vmatprep.subr.bf16.mxu0 %v3945_v28  ;;  %v3950_v31 = vld [vmem:[%s5168_s4 + $0x8] ss:$12 sps:$4 sm:$0xff]   ;;  %v3951_v32 = vld [vmem:[%s5168_s4 + $0x18] ss:$12 sps:$4 sm:$0xff]   ;;  %v3954_v35 = vld [vmem:[%s5168_s4 + $0x20] ss:$12 sps:$4 sm:$0xff]  }
   0x5   :  { %223 = vmatpush1.bf16.msra.mxu0 %v3947_v29  ;;  %v3952_v33 = vld [vmem:[%s5168_s4 + $0x34] ss:$12 sps:$4 sm:$0xff]   ;;  %3589 = vmatprep.subr.bf16.mxu1 %v3950_v31  ;;  %v3955_v36 = vld [vmem:[%s5168_s4 + $0x30] ss:$12 sps:$4 sm:$0xff]   ;;  %v3958_v37 = vld [vmem:[%s5168_s4 + $0x38] ss:$12 sps:$4 sm:$0xff]  }
   0x6   :  { %224 = vmatprep.subr.bf16.mxu0 %v3948_v30  ;;  %3590 = vmatpush3.bf16.msra.mxu1 %v3950_v31  ;;  %v3956_v38 = vld [vmem:[%s5168_s4 + $0x4c] ss:$12 sps:$4 sm:$0xff]   ;;  %v3959_v39 = vld [vmem:[%s5168_s4 + $0x48] ss:$12 sps:$4 sm:$0xff]   ;;  %v3960_v40 = vld [vmem:[%s5168_s4 + $0x50] ss:$12 sps:$4 sm:$0xff]  }
   0x7   :  { %61 = vadd.xlane.f32.xlu0 %v60_v6  ;;  %67 = vadd.xlane.f32.xlu1 %v66_v7  ;;  %v49_v55 = vld [vmem:[%s5169_s3] ss:$0 sm:$0xff]  ;;  %v50_v60 = vld [vmem:[%s5169_s3 + $0x1] ss:$0 sm:$0xff]  ;;  %s4209_s13 = smov 16   ;;  %s4210_s14 = smov 80  }
   0x8   :  { %3591 = vmatprep.subr.bf16.mxu1 %v3954_v35 }
   0x9   :  { %225 = vmatpush1.bf16.msra.mxu0 %v3951_v32 }
   0xa   :  { %226 = vmatprep.subr.bf16.mxu0 %v3952_v33  ;;  %3592 = vmatpush3.bf16.msra.mxu1 %v3954_v35 }
   0xb   :  { %3593 = vmatprep.subr.bf16.mxu1 %v3958_v37 }
   0xd   :  { %227 = vmatpush1.bf16.msra.mxu0 %v3955_v36 }
   0xe   :  { %228 = vmatprep.subr.bf16.mxu0 %v3956_v38  ;;  %3594 = vmatpush3.bf16.msra.mxu1 %v3958_v37 }
   0xf   :  { %3595 = vmatprep.subr.bf16.mxu1 %v3960_v40 }
  0x11   :  { %229 = vmatpush1.bf16.msra.mxu0 %v3959_v39 }
  0x12   :  { %3596 = vmatpush3.bf16.msra.mxu1 %v3960_v40 }
  0x90   :  { %v59_v8 = vpop.xlane.xlu0 %58  ;;  %v65_v9 = vpop.xlane.xlu1 %64 }
  0x91   :  { %v70_v10 = vmul.f32 0.015625, %v59_v8  ;;  %v72_v11 = vmul.f32 0.015625, %v65_v9  ;;  %v137_v9 = vlaneseq }
  0x93   :  { %v4277_v12 = vsub.f32 %v33_v0, %v70_v10  ;;  %v4279_v13 = vsub.f32 %v35_v1, %v72_v11  ;;  %v4357_v10 = vshrl.u32 %v137_v9, 7 }
  0x94   :  { %v62_v14 = vpop.xlane.xlu0 %61  ;;  %v68_v15 = vpop.xlane.xlu1 %67 }
  0x95   :  { %v71_v16 = vmul.f32 0.015625, %v62_v14  ;;  %v73_v17 = vmul.f32 0.015625, %v68_v15  ;;  %v78_v18 = vmul.f32 %v4277_v12, %v4277_v12  ;;  %v80_v19 = vmul.f32 %v4279_v13, %v4279_v13 }
  0x96   :  { %v139_v11 = vsub.s32 0, %v4357_v10 }
  0x97   :  { %v4285_v20 = vsub.f32 %v34_v2, %v71_v16  ;;  %v4287_v21 = vsub.f32 %v36_v5, %v73_v17  ;;  %v82_v22 = vsel %vm56_vm0, %v78_v18, 0.0  ;;  %v88_v23 = vsel %vm56_vm0, %v80_v19, 0.0  ;;  %v41_v17 = vld [vmem:[%s5170_s2] sm:$0xff] }
  0x98   :  { %83 = vadd.xlane.f32.xlu0 %v82_v22  ;;  %v147_v16 = vsub.s32 2, %v4357_v10 }
  0x99   :  { %v79_v24 = vmul.f32 %v4285_v20, %v4285_v20  ;;  %v81_v25 = vmul.f32 %v4287_v21, %v4287_v21 }
  0x9b   :  { %v85_v26 = vsel %vm56_vm0, %v79_v24, 0.0  ;;  %v91_v27 = vsel %vm56_vm0, %v81_v25, 0.0 }
  0x9c   :  { %89 = vadd.xlane.f32.xlu0 %v88_v23  ;;  %86 = vadd.xlane.f32.xlu1 %v85_v26  ;;  %v42_v23 = vld [vmem:[%s5170_s2 + $0x8] sm:$0xff] }
  0xa0   :  { %92 = vadd.xlane.f32.xlu1 %v91_v27  ;;  %v46_v27 = vld [vmem:[%s5170_s2 + $0x28] sm:$0xff] }
 0x125   :  { %v84_v41 = vpop.xlane.xlu0 %83 }
 0x126   :  { %v94_v42 = vmul.f32 0.015625, %v84_v41 }
 0x128   :  { %v98_v43 = vadd.f32 1e-05, %v94_v42 }
 0x129   :  { %v87_v44 = vpop.xlane.xlu1 %86  ;;  %v90_v45 = vpop.xlane.xlu0 %89 }
 0x12a   :  { %4013 = vrsqrt.f32 %v98_v43  ;;  %v95_v46 = vmul.f32 0.015625, %v87_v44  ;;  %v96_v47 = vmul.f32 0.015625, %v90_v45  ;;  %v43_v45 = vld [vmem:[%s5170_s2 + $0x10] sm:$0xff] }
 0x12c   :  { %v99_v48 = vadd.f32 1e-05, %v95_v46  ;;  %v100_v49 = vadd.f32 1e-05, %v96_v47 }
 0x12d   :  { %v93_v50 = vpop.xlane.xlu1 %92 }
 0x12e   :  { %4015 = vrsqrt.f32 %v99_v48  ;;  %v97_v51 = vmul.f32 0.015625, %v93_v50 }
 0x12f   :  { %4017 = vrsqrt.f32 %v100_v49  ;;  %v47_v49 = vld [vmem:[%s5170_s2 + $0x30] sm:$0xff] }
 0x130   :  { %v101_v52 = vadd.f32 1e-05, %v97_v51 }
 0x132   :  { %4019 = vrsqrt.f32 %v101_v52 }
 0x134   :  { %v4014_v53 = vpop.eup %4013 }
 0x135   :  { %v106_v54 = vmul.f32 %v4014_v53, %v4277_v12  ;;  %v3279_v12 = vld [vmem:[%s5169_s3 + $0x2] ss:$8 sm:$0x7] }
 0x136   :  { %v140_v14 = vrot.slane %v3279_v12, %v139_v11  ;;  %v148_v29 = vrot.slane %v3279_v12, %v147_v16 }
 0x137   :  { %v110_v59 = vmul.f32 %v106_v54, %v49_v55  ;;  %v44_v54 = vld [vmem:[%s5170_s2 + $0x18] sm:$0xff] }
 0x138   :  { %v4016_v56 = vpop.eup %4015 }
 0x139   :  { %v4018_v57 = vpop.eup %4017  ;;  %v107_v58 = vmul.f32 %v4016_v56, %v4285_v20  ;;  %v114_v0 = vadd.f32 %v110_v59, %v50_v60  ;;  %v45_v20 = vld [vmem:[%s5170_s2 + $0x20] sm:$0xff] }
 0x13a   :  { %v108_v61 = vmul.f32 %v4018_v57, %v4279_v13  ;;  %v143_v13 = vsub.s32 1, %v4357_v10 }
 0x13b   :  { %v111_v62 = vmul.f32 %v107_v58, %v49_v55  ;;  %v48_v58 = vld [vmem:[%s5170_s2 + $0x38] sm:$0xff] }
 0x13c   :  { %v4020_v63 = vpop.eup %4019  ;;  %v112_v3 = vmul.f32 %v108_v61, %v49_v55  ;;  %v144_v15 = vrot.slane %v3279_v12, %v143_v13 }
 0x13d   :  { %v115_v1 = vadd.f32 %v111_v62, %v50_v60  ;;  %v109_v2 = vmul.f32 %v4020_v63, %v4287_v21 }
 0x13e   :  { %v116_v6 = vadd.f32 %v112_v3, %v50_v60 }
 0x13f   :  { %v4344_v4 = vpack.c.bf16 %v115_v1, %v114_v0  ;;  %v113_v5 = vmul.f32 %v109_v2, %v49_v55 }
 0x141   :  { %3292 = vmatmul.mubr.msk.bf16.vlgmr.msra.gmra.mrb[0].mxu0 %vm56_vm0, %v4344_v4  ;;  %3597 = vmatprep.mubr.msk.bf16.mxu1 %vm56_vm0, %v4344_v4  ;;  %v117_v7 = vadd.f32 %v113_v5, %v50_v60 }
 0x142   :  { %264 = vmatprep.mubr.bf16.mxu0 %v4203_v34 }
 0x143   :  { %v4351_v8 = vpack.c.bf16 %v117_v7, %v116_v6 }
 0x145   :  { %3598 = vmatmul.mubr.msk.bf16.vlgmr.msra.gmra.mrb[0].mxu1 %vm56_vm0, %v4351_v8 }
 0x149   :  { %3293 = vmatmul.mubr.msk.bf16.gmra.mrb[4].mxu0 %vm56_vm0, %v4351_v8 }
 0x214   :  { %v256_v18 = vpop.f32.mrb[0].mxu0 }
 0x215   :  { %v257_v19 = vadd.f32 %v256_v18, %v140_v14  ;;  %v258_v21 = vpop.f32.mrb[1].mxu0 }
 0x216   :  { %v259_v22 = vadd.f32 %v258_v21, %v144_v15  ;;  %v260_v24 = vpop.f32.mrb[2].mxu0  ;;  %v4432_v21 = vld [vmem:[%s5171_s1 + $0x18] sm:$0xff] }
 0x217   :  { %v324_v25 = vmul.f32 %v257_v19, %v41_v17  ;;  %v261_v26 = vadd.f32 %v260_v24, %v140_v14  ;;  %v262_v28 = vpop.f32.mrb[3].mxu0 }
 0x218   :  { %v328_v30 = vmul.f32 %v259_v22, %v45_v20  ;;  %v263_v31 = vadd.f32 %v262_v28, %v144_v15  ;;  %v3599_v32 = vpop.f32.mrb[0].mxu1  ;;  %v4427_v20 = vld [vmem:[%s5171_s1 + $0x8] sm:$0xff] }
 0x219   :  { %v325_v33 = vmul.f32 %v261_v26, %v42_v23  ;;  %v309_v35 = vpop.f32.mrb[1].mxu1  ;;  %v318_v39 = vadd.f32 %v3599_v32, %v148_v29 }
 0x21a   :  { %v332_v36 = vadd.f32 %v328_v30, %v324_v25  ;;  %v329_v37 = vmul.f32 %v263_v31, %v46_v27  ;;  %v3600_v38 = vpop.f32.mrb[2].mxu1  ;;  %v310_v43 = vadd.f32 %v309_v35, %v148_v29  ;;  %v4438_v25 = vld [vmem:[%s5171_s1 + $0x10] sm:$0xff] }
 0x21b   :  { %v321_v40 = vadd.f32 %v3600_v38, %v148_v29  ;;  %v312_v41 = vpop.f32.mrb[3].mxu1 }
 0x21c   :  { %v333_v42 = vadd.f32 %v329_v37, %v325_v33  ;;  %v313_v44 = vadd.f32 %v312_v41, %v148_v29  ;;  %v266_v46 = vpop.f32.mrb[4].mxu0 }
 0x21d   :  { %v4386_v47 = vpack.c.bf16 %v321_v40, %v318_v39  ;;  %v267_v48 = vadd.f32 %v266_v46, %v140_v14  ;;  %v268_v50 = vpop.f32.mrb[5].mxu0 }
 0x21e   :  { %v4391_v51 = vpack.c.bf16 %v333_v42, %v332_v36  ;;  %v4393_v52 = vpack.c.bf16 %v313_v44, %v310_v43  ;;  %v269_v53 = vadd.f32 %v268_v50, %v144_v15  ;;  %v270_v55 = vpop.f32.mrb[6].mxu0 }
 0x21f   :  { %v326_v56 = vmul.f32 %v267_v48, %v43_v45  ;;  %v271_v57 = vadd.f32 %v270_v55, %v140_v14  ;;  %v272_v59 = vpop.f32.mrb[7].mxu0  ;;  %v4422_v14 = vld [vmem:[%s5171_s1] sm:$0xff] }
 0x220   :  { %v330_v60 = vmul.f32 %v269_v53, %v47_v49  ;;  %v273_v61 = vadd.f32 %v272_v59, %v144_v15  ;;  %350 = vrot.lane.b32.xlu0 %v4391_v51, %s4204_s21  ;;  %3605 = vmatprep.mubr.msk.bf16.mxu0 %vm354_vm1, %v4391_v51 }
 0x221   :  { %v327_v62 = vmul.f32 %v271_v57, %v44_v54  ;;  %3609 = vmatprep.subr.bf16.mxu1 %v4393_v52 }
 0x222   :  { %v334_v63 = vadd.f32 %v330_v60, %v326_v56  ;;  %v331_v0 = vmul.f32 %v273_v61, %v48_v58  ;;  %3610 = vmatpush3.bf16.msra.mxu1 %v4393_v52 }
 0x223   :  { %3611 = vmatprep.subr.bf16.mxu1 %v4386_v47 }
 0x224   :  { %v335_v1 = vadd.f32 %v331_v0, %v327_v62 }
 0x226   :  { %v4408_v2 = vpack.c.bf16 %v335_v1, %v334_v63  ;;  %3612 = vmatpush3.bf16.msra.mxu1 %v4386_v47 }
 0x228   :  { %352 = vrot.lane.b32.xlu1 %v4408_v2, %s4204_s21 }
 0x292   :  { %v351_v3 = vpop.permute.xlu0 %350 }
 0x293   :  { %3921 = vmatprep.subr.msk.bf16.mxu0 %vm354_vm1, %v351_v3  ;;  %v362_v5 = vsel %vm354_vm1, %v351_v3, 0 }
 0x294   :  { %3602 = vmatpush3.bf16.xpose.msra.mxu0 %v362_v5 }
 0x29a   :  { %v353_v6 = vpop.permute.xlu1 %352 }
 0x29b   :  { %3922 = vmatprep.subr.msk.bf16.mxu0 %vm354_vm1, %v353_v6  ;;  %v365_v7 = vsel %vm354_vm1, %v353_v6, 0 }
 0x29c   :  { %3604 = vmatpush3.bf16.xpose.msra.mxu0 %v365_v7 }
 0x2a3   :  { %3606 = vmatmul.mubr.msk.bf16.vlgmr.msra.gmra.mrb[8].mxu0 %vm354_vm1, %v4408_v2 }
 0x376   :  { %v3607_v9 = vpop.f32.mrb[8].mxu0 }
 0x377   :  { %v401_v12 = vpop.f32.mrb[9].mxu0  ;;  %v418_v22 = vmul.f32 0.25, %v3607_v9 }
 0x378   :  { %v416_v15 = vmul.f32 0.25, %v401_v12  ;;  %v3608_v17 = vpop.f32.mrb[10].mxu0 }
 0x379   :  { %v419_v18 = vmul.f32 0.25, %v3608_v17  ;;  %v404_v19 = vpop.f32.mrb[11].mxu0  ;;  %v422_v30 = vadd.f32 %v418_v22, %v4438_v25 }
 0x37a   :  { %v417_v23 = vmul.f32 0.25, %v404_v19  ;;  %v420_v24 = vadd.f32 %v416_v15, %v4422_v14 }
 0x37b   :  { %v423_v28 = vadd.f32 %v419_v18, %v4432_v21  ;;  %v431_v32 = vsel %vm424_vm2, %v422_v30, -inf }
 0x37c   :  { %v425_v26 = vsel %vm424_vm2, %v420_v24, -inf  ;;  %v421_v27 = vadd.f32 %v417_v23, %v4427_v20 }
 0x37d   :  { %426 = vmax.xlane.f32.xlu1 %v425_v26  ;;  %v434_v31 = vsel %vm424_vm2, %v423_v28, -inf }
 0x37e   :  { %v428_v29 = vsel %vm424_vm2, %v421_v27, -inf }
 0x37f   :  { %429 = vmax.xlane.f32.xlu0 %v428_v29 }
 0x381   :  { %435 = vmax.xlane.f32.xlu1 %v434_v31 }
 0x383   :  { %432 = vmax.xlane.f32.xlu0 %v431_v32 }
 0x40a   :  { %v427_v33 = vpop.xlane.xlu1 %426 }
 0x40b   :  { %v437_v38 = vsub.f32 %v420_v24, %v427_v33 }
 0x40c   :  { %v430_v35 = vpop.xlane.xlu0 %429 }
 0x40d   :  { %v438_v36 = vsub.f32 %v421_v27, %v430_v35  ;;  %v441_v44 = vmul.f32 1.442695, %v437_v38 }
 0x40e   :  { %v436_v37 = vpop.xlane.xlu1 %435 }
 0x40f   :  { %v443_v39 = vmul.f32 1.442695, %v438_v36  ;;  %v440_v40 = vsub.f32 %v423_v28, %v436_v37 }
 0x410   :  { %v433_v41 = vpop.xlane.xlu0 %432 }
 0x411   :  { %4021 = vpow2.f32 %v443_v39  ;;  %v447_v42 = vmul.f32 1.442695, %v440_v40  ;;  %v439_v43 = vsub.f32 %v422_v30, %v433_v41 }
 0x413   :  { %4023 = vpow2.f32 %v447_v42  ;;  %v445_v45 = vmul.f32 1.442695, %v439_v43 }
 0x415   :  { %4025 = vpow2.f32 %v445_v45 }
 0x416   :  { %4027 = vpow2.f32 %v441_v44 }
 0x41b   :  { %v4022_v46 = vpop.eup %4021 }
 0x41c   :  { %v452_v48 = vsel %vm424_vm2, %v4022_v46, 0.0 }
 0x41d   :  { %v4024_v49 = vpop.eup %4023  ;;  %453 = vadd.xlane.f32.xlu1 %v452_v48 }
 0x41e   :  { %v458_v53 = vsel %vm424_vm2, %v4024_v49, 0.0 }
 0x41f   :  { %v4026_v50 = vpop.eup %4025 }
 0x420   :  { %v455_v54 = vsel %vm424_vm2, %v4026_v50, 0.0  ;;  %v4028_v55 = vpop.eup %4027 }
 0x421   :  { %459 = vadd.xlane.f32.xlu1 %v458_v53  ;;  %456 = vadd.xlane.f32.xlu0 %v455_v54  ;;  %v449_v56 = vsel %vm424_vm2, %v4028_v55, 0.0 }
 0x425   :  { %450 = vadd.xlane.f32.xlu0 %v449_v56 }
 0x432   :  { %534 = vrot.lane.b32.xlu1 %v4408_v2, %s4205_s30 }
 0x436   :  { %528 = vrot.lane.b32.xlu1 %v4391_v51, %s4206_s10 }
 0x43a   :  { %530 = vrot.lane.b32.xlu1 %v4408_v2, %s4206_s10 }
 0x43b   :  { %532 = vrot.lane.b32.xlu0 %v4391_v51, %s4205_s30 }
 0x4aa   :  { %v454_v57 = vpop.xlane.xlu1 %453 }
 0x4ae   :  { %v460_v58 = vpop.xlane.xlu1 %459  ;;  %v457_v59 = vpop.xlane.xlu0 %456 }
 0x4af   :  { %4029 = vrcp.f32 %v460_v58 }
 0x4b0   :  { %4031 = vrcp.f32 %v457_v59 }
 0x4b1   :  { %4033 = vrcp.f32 %v454_v57 }
 0x4b2   :  { %v451_v60 = vpop.xlane.xlu0 %450  ;;  %v535_v6 = vpop.permute.xlu1 %534 }
 0x4b3   :  { %4035 = vrcp.f32 %v451_v60  ;;  %v546_v19 = vsel %vm354_vm1, %v535_v6, 0 }
 0x4b6   :  { %v533_v61 = vpop.permute.xlu0 %532  ;;  %v529_v17 = vpop.permute.xlu1 %528 }
 0x4b7   :  { %3923 = vmatprep.subr.msk.bf16.mxu1 %vm354_vm1, %v533_v61  ;;  %v543_v18 = vsel %vm354_vm1, %v533_v61, 0 }
 0x4b9   :  { %v4030_v62 = vpop.eup %4029 }
 0x4ba   :  { %v4032_v63 = vpop.eup %4031  ;;  %v468_v3 = vmul.f32 %v4030_v62, %v4024_v49  ;;  %v531_v22 = vpop.permute.xlu1 %530 }
 0x4bb   :  { %v4034_v0 = vpop.eup %4033  ;;  %v467_v5 = vmul.f32 %v4032_v63, %v4026_v50 }
 0x4bc   :  { %v466_v9 = vmul.f32 %v4034_v0, %v4022_v46 }
 0x4bd   :  { %v4036_v1 = vpop.eup %4035  ;;  %v470_v15 = vpack.c.bf16 %v468_v3, %v467_v5 }
 0x4be   :  { %v465_v7 = vmul.f32 %v4036_v1, %v4028_v55 }
 0x4c0   :  { %v469_v12 = vpack.c.bf16 %v466_v9, %v465_v7 }
 0x4c2   :  { %3613 = vmatprep.mubr.msk.bf16.mxu1 %vm424_vm2, %v469_v12 }
 0x4c3   :  { %3614 = vmatmul.mubr.msk.bf16.vlgmr.msra.gmra.mrb[4].mxu1 %vm424_vm2, %v470_v15 }
 0x4c4   :  { %3618 = vmatpush3.bf16.xpose.msra.mxu1 %v543_v18  ;;  %3621 = vmatprep.mubr.msk.bf16.mxu1 %vm354_vm1, %v529_v17 }
 0x4c5   :  { %3924 = vmatprep.subr.msk.bf16.mxu1 %vm354_vm1, %v535_v6 }
 0x4cc   :  { %3620 = vmatpush3.bf16.xpose.msra.mxu1 %v546_v19 }
 0x4d3   :  { %3622 = vmatmul.mubr.msk.bf16.vlgmr.msra.gmra.mrb[8].mxu1 %vm354_vm1, %v531_v22 }
 0x596   :  { %v4467_v23 = vpop.f32.mrb[4].mxu1 }
 0x597   :  { %v4469_v24 = vpop.f32.mrb[5].mxu1 }
 0x598   :  { %v4471_v26 = vpop.f32.mrb[6].mxu1 }
 0x599   :  { %v527_v27 = vpack.c.bf16 %v4471_v26, %v4467_v23  ;;  %v4475_v28 = vpop.f32.mrb[7].mxu1 }
 0x59a   :  { %v526_v29 = vpack.c.bf16 %v4475_v28, %v4469_v24 }
 0x5a6   :  { %v3623_v30 = vpop.f32.mrb[8].mxu1 }
 0x5a7   :  { %v582_v31 = vpop.f32.mrb[9].mxu1  ;;  %v599_v32 = vmul.f32 0.25, %v3623_v30 }
 0x5a8   :  { %v597_v33 = vmul.f32 0.25, %v582_v31  ;;  %v3624_v35 = vpop.f32.mrb[10].mxu1 }
 0x5a9   :  { %v585_v36 = vpop.f32.mrb[11].mxu1  ;;  %v600_v39 = vmul.f32 0.25, %v3624_v35  ;;  %v603_v42 = vadd.f32 %v599_v32, %v4438_v25 }
 0x5aa   :  { %v598_v37 = vmul.f32 0.25, %v585_v36  ;;  %v601_v38 = vadd.f32 %v597_v33, %v4422_v14 }
 0x5ab   :  { %v611_v44 = vsel %vm424_vm2, %v603_v42, -inf  ;;  %v604_v45 = vadd.f32 %v600_v39, %v4432_v21 }
 0x5ac   :  { %v605_v40 = vsel %vm424_vm2, %v601_v38, -inf  ;;  %v602_v41 = vadd.f32 %v598_v37, %v4427_v20 }
 0x5ad   :  { %606 = vmax.xlane.f32.xlu0 %v605_v40  ;;  %v614_v46 = vsel %vm424_vm2, %v604_v45, -inf }
 0x5ae   :  { %v608_v43 = vsel %vm424_vm2, %v602_v41, -inf }
 0x5af   :  { %609 = vmax.xlane.f32.xlu1 %v608_v43 }
 0x5b1   :  { %612 = vmax.xlane.f32.xlu0 %v611_v44 }
 0x5b5   :  { %615 = vmax.xlane.f32.xlu0 %v614_v46 }
 0x5c0   :  { %655 = vrot.lane.b32.xlu1 %v4386_v47, %s4206_s10 }
 0x63a   :  { %v607_v48 = vpop.xlane.xlu0 %606 }
 0x63b   :  { %v617_v49 = vsub.f32 %v601_v38, %v607_v48 }
 0x63c   :  { %v610_v50 = vpop.xlane.xlu1 %609 }
 0x63d   :  { %v621_v55 = vmul.f32 1.442695, %v617_v49  ;;  %v618_v56 = vsub.f32 %v602_v41, %v610_v50  ;;  %v3961_v49 = vld [vmem:[%s5172_s6] sm:$0xff]  }
 0x63e   :  { %v613_v53 = vpop.xlane.xlu0 %612 }
 0x63f   :  { %v619_v54 = vsub.f32 %v603_v42, %v613_v53  ;;  %v623_v60 = vmul.f32 1.442695, %v618_v56  ;;  %v3962_v53 = vld [vmem:[%s5172_s6 + $0x8] sm:$0xff]   ;;  %v3964_v56 = vld [vmem:[%s5172_s6 + $0x18] sm:$0xff]  }
 0x640   :  { %v656_v9 = vpop.permute.xlu1 %655 }
 0x641   :  { %v625_v57 = vmul.f32 1.442695, %v619_v54 }
 0x642   :  { %v616_v58 = vpop.xlane.xlu0 %615 }
 0x643   :  { %4037 = vpow2.f32 %v625_v57  ;;  %v620_v59 = vsub.f32 %v604_v45, %v616_v58  ;;  %v3966_v57 = vld [vmem:[%s5173_s5] sm:$0xff]  }
 0x644   :  { %4039 = vpow2.f32 %v621_v55  ;;  %v3963_v55 = vld [vmem:[%s5172_s6 + $0x10] sm:$0xff]  }
 0x645   :  { %v627_v61 = vmul.f32 1.442695, %v620_v59 }
 0x647   :  { %4041 = vpow2.f32 %v627_v61 }
 0x648   :  { %4043 = vpow2.f32 %v623_v60 }
 0x64d   :  { %v4038_v62 = vpop.eup %4037 }
 0x64e   :  { %v635_v63 = vsel %vm424_vm2, %v4038_v62, 0.0  ;;  %v4040_v0 = vpop.eup %4039 }
 0x64f   :  { %636 = vadd.xlane.f32.xlu0 %v635_v63  ;;  %v629_v3 = vsel %vm424_vm2, %v4040_v0, 0.0 }
 0x651   :  { %v4042_v1 = vpop.eup %4041 }
 0x652   :  { %v638_v5 = vsel %vm424_vm2, %v4042_v1, 0.0  ;;  %v4044_v6 = vpop.eup %4043 }
 0x653   :  { %630 = vadd.xlane.f32.xlu0 %v629_v3  ;;  %639 = vadd.xlane.f32.xlu1 %v638_v5  ;;  %v632_v7 = vsel %vm424_vm2, %v4044_v6, 0.0 }
 0x657   :  { %633 = vadd.xlane.f32.xlu1 %v632_v7 }
 0x668   :  { %842 = vrot.lane.b32.xlu1 %v4391_v51, %s4207_s11 }
 0x669   :  { %653 = vrot.lane.b32.xlu0 %v4393_v52, %s4206_s10 }
 0x66c   :  { %844 = vrot.lane.b32.xlu1 %v4408_v2, %s4207_s11 }
 0x66d   :  { %838 = vrot.lane.b32.xlu0 %v4391_v51, %s4208_s12 }
 0x670   :  { %840 = vrot.lane.b32.xlu1 %v4408_v2, %s4208_s12 }
 0x671   :  { %1093 = vrot.lane.b32.xlu0 %v4391_v51, %s4209_s13 }
 0x674   :  { %1095 = vrot.lane.b32.xlu1 %v4408_v2, %s4209_s13 }
 0x675   :  { %1089 = vrot.lane.b32.xlu0 %v4391_v51, %s4210_s14 }
 0x678   :  { %1091 = vrot.lane.b32.xlu1 %v4408_v2, %s4210_s14 }
 0x6dc   :  { %v637_v12 = vpop.xlane.xlu0 %636 }
 0x6e0   :  { %v631_v15 = vpop.xlane.xlu0 %630  ;;  %v640_v17 = vpop.xlane.xlu1 %639 }
 0x6e1   :  { %4045 = vrcp.f32 %v640_v17 }
 0x6e2   :  { %4047 = vrcp.f32 %v631_v15 }
 0x6e3   :  { %4049 = vrcp.f32 %v637_v12 }
 0x6e4   :  { %v654_v18 = vpop.permute.xlu0 %653  ;;  %v634_v19 = vpop.xlane.xlu1 %633 }
 0x6e5   :  { %4051 = vrcp.f32 %v634_v19  ;;  %3625 = vmatprep.subr.bf16.mxu1 %v654_v18 }
 0x6e6   :  { %3626 = vmatpush3.bf16.msra.mxu1 %v654_v18 }
 0x6e7   :  { %3627 = vmatprep.subr.bf16.mxu1 %v656_v9 }
 0x6e8   :  { %v843_v22 = vpop.permute.xlu1 %842  ;;  %v839_v39 = vpop.permute.xlu0 %838 }
 0x6e9   :  { %v853_v40 = vsel %vm354_vm1, %v843_v22, 0 }
 0x6ea   :  { %3628 = vmatpush3.bf16.msra.mxu1 %v656_v9 }
 0x6eb   :  { %3925 = vmatprep.subr.msk.bf16.mxu1 %vm354_vm1, %v843_v22  ;;  %v4046_v51 = vpop.eup %4045 }
 0x6ec   :  { %v4048_v30 = vpop.eup %4047  ;;  %v648_v32 = vmul.f32 %v4046_v51, %v4042_v1  ;;  %v845_v41 = vpop.permute.xlu1 %844  ;;  %v54_v51 = vld [vmem:[%s5169_s3 + $0x4] ss:$0 sm:$0xff] }
 0x6ed   :  { %v4050_v2 = vpop.eup %4049  ;;  %v645_v33 = vmul.f32 %v4048_v30, %v4040_v0  ;;  %v856_v42 = vsel %vm354_vm1, %v845_v41, 0  ;;  %v1094_v43 = vpop.permute.xlu0 %1093 }
 0x6ee   :  { %v647_v36 = vmul.f32 %v4050_v2, %v4038_v62  ;;  %v1104_v45 = vsel %vm354_vm1, %v1094_v43, 0 }
 0x6ef   :  { %v4052_v31 = vpop.eup %4051 }
 0x6f0   :  { %v646_v35 = vmul.f32 %v4052_v31, %v4044_v6  ;;  %v650_v38 = vpack.c.bf16 %v648_v32, %v647_v36  ;;  %v841_v44 = vpop.permute.xlu1 %840 }
 0x6f1   :  { %v1090_v46 = vpop.permute.xlu0 %1089 }
 0x6f2   :  { %v649_v37 = vpack.c.bf16 %v646_v35, %v645_v33 }
 0x6f4   :  { %3629 = vmatprep.mubr.msk.bf16.mxu1 %vm424_vm2, %v649_v37  ;;  %v1096_v48 = vpop.permute.xlu1 %1095 }
 0x6f5   :  { %3630 = vmatmul.mubr.msk.bf16.vlgmr.msra.gmra.mrb[12].mxu1 %vm424_vm2, %v650_v38  ;;  %v1107_v50 = vsel %vm354_vm1, %v1096_v48, 0 }
 0x6f6   :  { %3646 = vmatpush3.bf16.xpose.msra.mxu1 %v853_v40  ;;  %3649 = vmatprep.mubr.msk.bf16.mxu1 %vm354_vm1, %v839_v39 }
 0x6f7   :  { %3926 = vmatprep.subr.msk.bf16.mxu1 %vm354_vm1, %v845_v41 }
 0x6f8   :  { %v1092_v54 = vpop.permute.xlu1 %1091 }
 0x6fe   :  { %3648 = vmatpush3.bf16.xpose.msra.mxu1 %v856_v42 }
 0x6ff   :  { %3927 = vmatprep.subr.msk.bf16.mxu1 %vm354_vm1, %v1094_v43 }
 0x705   :  { %3650 = vmatmul.mubr.msk.bf16.vlgmr.msra.gmra.mrb[16].mxu1 %vm354_vm1, %v841_v44 }
 0x706   :  { %3668 = vmatpush3.bf16.xpose.msra.mxu1 %v1104_v45  ;;  %3671 = vmatprep.mubr.msk.bf16.mxu1 %vm354_vm1, %v1090_v46 }
 0x707   :  { %3928 = vmatprep.subr.msk.bf16.mxu1 %vm354_vm1, %v1096_v48 }
 0x70e   :  { %3670 = vmatpush3.bf16.xpose.msra.mxu1 %v1107_v50 }
 0x70f   :  { %3689 = vmatprep.subr.bf16.mxu1 %v3961_v49 }
 0x715   :  { %3672 = vmatmul.mubr.msk.bf16.vlgmr.msra.gmra.mrb[20].mxu1 %vm354_vm1, %v1092_v54 }
 0x716   :  { %3690 = vmatpush3.bf16.msra.mxu1 %v3961_v49  ;;  %3697 = vmatprep.mubr.msk.bf16.mxu1 %vm56_vm0, %v4344_v4  ;;  %v3965_v4 = vld [vmem:[%s5173_s5 + $0x8] sm:$0xff]  }
 0x717   :  { %3691 = vmatprep.subr.bf16.mxu1 %v3962_v53  ;;  %3633 = vmatprep.subr.bf16.mxu0 %v3965_v4 }
 0x718   :  { %3634 = vmatpush3.bf16.msra.mxu0 %v3965_v4 }
 0x719   :  { %3639 = vmatprep.subr.bf16.mxu0 %v3966_v57 }
 0x71a   :  { %3692 = vmatpush3.bf16.msra.mxu1 %v3962_v53 }
 0x71b   :  { %3693 = vmatprep.subr.bf16.mxu1 %v3963_v55 }
 0x71e   :  { %3694 = vmatpush3.bf16.msra.mxu1 %v3963_v55 }
 0x71f   :  { %3695 = vmatprep.subr.bf16.mxu1 %v3964_v56 }
 0x722   :  { %3696 = vmatpush3.bf16.msra.mxu1 %v3964_v56 }
 0x725   :  { %3698 = vmatmul.mubr.msk.bf16.vlgmr.msra.gmra.mrb[24].mxu1 %vm56_vm0, %v4351_v8 }
 0x726   :  { %1788 = vmatprep.mubr.bf16.mxu1 %v4203_v34 }
 0x7c8   :  { %v3631_v58 = vpop.f32.mrb[12].mxu1 }
 0x7c9   :  { %v699_v59 = vpop.f32.mrb[13].mxu1 }
 0x7ca   :  { %v3632_v60 = vpop.f32.mrb[14].mxu1 }
 0x7cb   :  { %v715_v61 = vpack.c.bf16 %v3632_v60, %v3631_v58  ;;  %v702_v62 = vpop.f32.mrb[15].mxu1 }
 0x7cc   :  { %v714_v63 = vpack.c.bf16 %v702_v62, %v699_v59 }
 0x7ce   :  { %3635 = vmatprep.mubr.msk.bf16.mxu0 %vm354_vm1, %v714_v63 }
 0x7cf   :  { %3636 = vmatmul.mubr.msk.bf16.vlgmr.msra.gmra.mrb[12].mxu0 %vm354_vm1, %v715_v61 }
 0x7d0   :  { %3641 = vmatprep.mubr.msk.bf16.mxu0 %vm354_vm1, %v526_v29  ;;  %3640 = vmatpush3.bf16.msra.mxu0 %v3966_v57 }
 0x7d8   :  { %v3651_v8 = vpop.f32.mrb[16].mxu1 }
 0x7d9   :  { %v892_v0 = vpop.f32.mrb[17].mxu1  ;;  %v909_v1 = vmul.f32 0.25, %v3651_v8 }
 0x7da   :  { %v907_v3 = vmul.f32 0.25, %v892_v0  ;;  %v3652_v5 = vpop.f32.mrb[18].mxu1 }
 0x7db   :  { %v895_v6 = vpop.f32.mrb[19].mxu1  ;;  %3642 = vmatmul.mubr.msk.bf16.vlgmr.msra.gmra.mrb[12].mxu0 %vm354_vm1, %v527_v27  ;;  %v910_v12 = vmul.f32 0.25, %v3652_v5  ;;  %v4567_v29 = vadd.f32 %v909_v1, %v4438_v25 }
 0x7dc   :  { %v908_v7 = vmul.f32 0.25, %v895_v6  ;;  %v4559_v9 = vadd.f32 %v907_v3, %v4422_v14 }
 0x7dd   :  { %v921_v26 = vsel %vm424_vm2, %v4567_v29, -inf  ;;  %v4574_v27 = vadd.f32 %v910_v12, %v4432_v21 }
 0x7de   :  { %v915_v24 = vsel %vm424_vm2, %v4559_v9, -inf  ;;  %v4564_v28 = vadd.f32 %v908_v7, %v4427_v20 }
 0x7df   :  { %916 = vmax.xlane.f32.xlu0 %v915_v24  ;;  %v924_v15 = vsel %vm424_vm2, %v4574_v27, -inf }
 0x7e0   :  { %v918_v23 = vsel %vm424_vm2, %v4564_v28, -inf }
 0x7e1   :  { %919 = vmax.xlane.f32.xlu1 %v918_v23 }
 0x7e3   :  { %922 = vmax.xlane.f32.xlu0 %v921_v26 }
 0x7e7   :  { %925 = vmax.xlane.f32.xlu0 %v924_v15 }
 0x7e8   :  { %v4578_v17 = vpop.f32.mrb[20].mxu1 }
 0x7e9   :  { %v4580_v18 = vpop.f32.mrb[21].mxu1 }
 0x7ea   :  { %v4582_v19 = vpop.f32.mrb[22].mxu1 }
 0x7eb   :  { %v4584_v22 = vpop.f32.mrb[23].mxu1 }
 0x7f8   :  { %v3699_v30 = vpop.f32.mrb[24].mxu1 }
 0x7f9   :  { %v1419_v2 = vadd.f32 %v3699_v30, %v54_v51  ;;  %v1410_v31 = vpop.f32.mrb[25].mxu1 }
 0x7fa   :  { %v1411_v32 = vadd.f32 %v1410_v31, %v54_v51  ;;  %v3700_v33 = vpop.f32.mrb[26].mxu1 }
 0x7fb   :  { %v1431_v35 = vmul.f32 0.044715, %v1419_v2  ;;  %v1422_v36 = vadd.f32 %v3700_v33, %v54_v51  ;;  %v1413_v37 = vpop.f32.mrb[27].mxu1  ;;  %v1427_v1 = vmul.f32 0.5, %v1419_v2 }
 0x7fc   :  { %v1429_v38 = vmul.f32 0.044715, %v1411_v32  ;;  %v1414_v39 = vadd.f32 %v1413_v37, %v54_v51  ;;  %v1425_v6 = vmul.f32 0.5, %v1411_v32 }
 0x7fd   :  { %v1435_v40 = vmul.f32 %v1431_v35, %v1419_v2  ;;  %v1432_v41 = vmul.f32 0.044715, %v1422_v36  ;;  %v1428_v3 = vmul.f32 0.5, %v1422_v36 }
 0x7fe   :  { %v1433_v42 = vmul.f32 %v1429_v38, %v1411_v32  ;;  %v1430_v43 = vmul.f32 0.044715, %v1414_v39  ;;  %v1426_v7 = vmul.f32 0.5, %v1414_v39 }
 0x7ff   :  { %v1439_v44 = vmul.f32 %v1435_v40, %v1419_v2  ;;  %v1436_v45 = vmul.f32 %v1432_v41, %v1422_v36 }
 0x800   :  { %v1437_v46 = vmul.f32 %v1433_v42, %v1411_v32  ;;  %v1434_v48 = vmul.f32 %v1430_v43, %v1414_v39 }
 0x801   :  { %v1443_v49 = vadd.f32 %v1439_v44, %v1419_v2  ;;  %v1440_v50 = vmul.f32 %v1436_v45, %v1422_v36 }
 0x802   :  { %v1438_v53 = vmul.f32 %v1434_v48, %v1414_v39  ;;  %v1441_v54 = vadd.f32 %v1437_v46, %v1411_v32  ;;  %v1159_v48 = vmul.f32 0.25, %v4584_v22 }
 0x803   :  { %v1447_v55 = vmul.f32 0.7978846, %v1443_v49  ;;  %v1444_v56 = vadd.f32 %v1440_v50, %v1422_v36  ;;  %v1160_v49 = vmul.f32 0.25, %v4578_v17  ;;  %v1158_v50 = vmul.f32 0.25, %v4580_v18 }
 0x804   :  { %v1442_v4 = vadd.f32 %v1438_v53, %v1414_v39  ;;  %v1445_v57 = vmul.f32 0.7978846, %v1441_v54  ;;  %v1163_v53 = vadd.f32 %v1159_v48, %v4427_v20  ;;  %v1161_v54 = vmul.f32 0.25, %v4582_v19 }
 0x805   :  { %4053 = vtanh.f32 %v1447_v55  ;;  %v1448_v58 = vmul.f32 0.7978846, %v1444_v56  ;;  %v1164_v56 = vadd.f32 %v1160_v49, %v4438_v25 }
 0x806   :  { %v1446_v59 = vmul.f32 0.7978846, %v1442_v4  ;;  %4055 = vtanh.f32 %v1445_v57  ;;  %v1169_v55 = vsel %vm424_vm2, %v1163_v53, -inf  ;;  %v1162_v4 = vadd.f32 %v1158_v50, %v4422_v14 }
 0x807   :  { %4057 = vtanh.f32 %v1448_v58  ;;  %v1172_v57 = vsel %vm424_vm2, %v1164_v56, -inf  ;;  %v1165_v22 = vadd.f32 %v1161_v54, %v4432_v21 }
 0x808   :  { %4059 = vtanh.f32 %v1446_v59  ;;  %v1166_v58 = vsel %vm424_vm2, %v1162_v4, -inf }
 0x809   :  { %v1175_v17 = vsel %vm424_vm2, %v1165_v22, -inf }
 0x80f   :  { %v4054_v60 = vpop.eup %4053 }
 0x810   :  { %v4056_v61 = vpop.eup %4055  ;;  %v1455_v62 = vadd.f32 1.0, %v4054_v60 }
 0x811   :  { %v4058_v63 = vpop.eup %4057  ;;  %v1453_v8 = vadd.f32 1.0, %v4056_v61 }
 0x812   :  { %v4060_v0 = vpop.eup %4059  ;;  %v1456_v5 = vadd.f32 1.0, %v4058_v63  ;;  %v4589_v24 = vmul.f32 %v1455_v62, %v1427_v1 }
 0x813   :  { %v1454_v12 = vadd.f32 1.0, %v4060_v0  ;;  %v4593_v26 = vmul.f32 %v1453_v8, %v1425_v6 }
 0x814   :  { %v4591_v23 = vmul.f32 %v1456_v5, %v1428_v3 }
 0x815   :  { %v4595_v15 = vmul.f32 %v1454_v12, %v1426_v7 }
 0x816   :  { %v1462_v51 = vpack.c.bf16 %v4591_v23, %v4589_v24  ;;  %v4183_v24 = vld [vmem:[%s5167_s0] sm:$0xff] }
 0x817   :  { %v1461_v30 = vpack.c.bf16 %v4595_v15, %v4593_v26  ;;  %v3974_v26 = vld [vmem:[%s5174_s7 + $0x28] sm:$0xff]   ;;  %v3975_v15 = vld [vmem:[%s5174_s7 + $0x30] sm:$0xff]  }
 0x86c   :  { %v917_v2 = vpop.xlane.xlu0 %916 }
 0x86d   :  { %v927_v31 = vsub.f32 %v4559_v9, %v917_v2 }
 0x86e   :  { %v920_v32 = vpop.xlane.xlu1 %919 }
 0x86f   :  { %v931_v36 = vmul.f32 1.442695, %v927_v31  ;;  %v928_v37 = vsub.f32 %v4564_v28, %v920_v32 }
 0x870   :  { %v923_v33 = vpop.xlane.xlu0 %922 }
 0x871   :  { %v929_v35 = vsub.f32 %v4567_v29, %v923_v33  ;;  %v933_v41 = vmul.f32 1.442695, %v928_v37 }
 0x873   :  { %v935_v38 = vmul.f32 1.442695, %v929_v35 }
 0x874   :  { %v926_v39 = vpop.xlane.xlu0 %925 }
 0x875   :  { %4061 = vpow2.f32 %v935_v38  ;;  %v930_v40 = vsub.f32 %v4574_v27, %v926_v39 }
 0x876   :  { %4063 = vpow2.f32 %v931_v36 }
 0x877   :  { %v937_v42 = vmul.f32 1.442695, %v930_v40 }
 0x879   :  { %4065 = vpow2.f32 %v937_v42 }
 0x87a   :  { %4067 = vpow2.f32 %v933_v41 }
 0x87f   :  { %v4062_v43 = vpop.eup %4061 }
 0x880   :  { %v945_v9 = vsel %vm424_vm2, %v4062_v43, 0.0  ;;  %v4064_v44 = vpop.eup %4063 }
 0x881   :  { %946 = vadd.xlane.f32.xlu0 %v945_v9  ;;  %v939_v29 = vsel %vm424_vm2, %v4064_v44, 0.0 }
 0x883   :  { %v4066_v45 = vpop.eup %4065 }
 0x884   :  { %v948_v28 = vsel %vm424_vm2, %v4066_v45, 0.0  ;;  %v4068_v46 = vpop.eup %4067 }
 0x885   :  { %940 = vadd.xlane.f32.xlu0 %v939_v29  ;;  %949 = vadd.xlane.f32.xlu1 %v948_v28  ;;  %v942_v27 = vsel %vm424_vm2, %v4068_v46, 0.0  ;;  %v3967_v28 = vld [vmem:[%s5173_s5 + $0x10] sm:$0xff]  }
 0x889   :  { %943 = vadd.xlane.f32.xlu1 %v942_v27 }
 0x89a   :  { %963 = vrot.lane.b32.xlu1 %v4386_v47, %s4208_s12 }
 0x89b   :  { %961 = vrot.lane.b32.xlu0 %v4393_v52, %s4208_s12 }
 0x8ba   :  { %1170 = vmax.xlane.f32.xlu0 %v1169_v55 }
 0x8be   :  { %1173 = vmax.xlane.f32.xlu0 %v1172_v57  ;;  %1167 = vmax.xlane.f32.xlu1 %v1166_v58 }
 0x8c2   :  { %1176 = vmax.xlane.f32.xlu1 %v1175_v17 }
 0x90e   :  { %v947_v20 = vpop.xlane.xlu0 %946 }
 0x912   :  { %v941_v18 = vpop.xlane.xlu0 %940  ;;  %v950_v19 = vpop.xlane.xlu1 %949 }
 0x913   :  { %4069 = vrcp.f32 %v950_v19 }
 0x914   :  { %4071 = vrcp.f32 %v941_v18 }
 0x915   :  { %4073 = vrcp.f32 %v947_v20 }
 0x916   :  { %v962_v25 = vpop.permute.xlu0 %961  ;;  %v944_v14 = vpop.xlane.xlu1 %943 }
 0x917   :  { %4075 = vrcp.f32 %v944_v14  ;;  %3653 = vmatprep.subr.bf16.mxu0 %v962_v25  ;;  %v3968_v14 = vld [vmem:[%s5173_s5 + $0x18] sm:$0xff]  }
 0x918   :  { %3654 = vmatpush3.bf16.msra.mxu0 %v962_v25 }
 0x91a   :  { %v964_v59 = vpop.permute.xlu1 %963 }
 0x91b   :  { %3655 = vmatprep.subr.bf16.mxu0 %v964_v59 }
 0x91c   :  { %3656 = vmatpush3.bf16.msra.mxu0 %v964_v59 }
 0x91d   :  { %v4070_v21 = vpop.eup %4069  ;;  %3661 = vmatprep.subr.bf16.mxu0 %v3967_v28 }
 0x91e   :  { %v4072_v60 = vpop.eup %4071  ;;  %v958_v63 = vmul.f32 %v4070_v21, %v4066_v45 }
 0x91f   :  { %v4074_v61 = vpop.eup %4073  ;;  %v955_v8 = vmul.f32 %v4072_v60, %v4064_v44  ;;  %v3969_v60 = vld [vmem:[%s5174_s7] sm:$0xff]  }
 0x920   :  { %v957_v1 = vmul.f32 %v4074_v61, %v4062_v43 }
 0x921   :  { %v4076_v62 = vpop.eup %4075 }
 0x922   :  { %v956_v0 = vmul.f32 %v4076_v62, %v4068_v46  ;;  %v960_v5 = vpack.c.bf16 %v958_v63, %v957_v1 }
 0x924   :  { %v959_v3 = vpack.c.bf16 %v956_v0, %v955_v8 }
 0x926   :  { %3657 = vmatprep.mubr.msk.bf16.mxu0 %vm424_vm2, %v959_v3  ;;  %v3970_v3 = vld [vmem:[%s5174_s7 + $0x8] sm:$0xff]  }
 0x927   :  { %3658 = vmatmul.mubr.msk.bf16.vlgmr.msra.gmra.mrb[16].mxu0 %vm424_vm2, %v960_v5  ;;  %v3971_v5 = vld [vmem:[%s5174_s7 + $0x10] sm:$0xff]  }
 0x928   :  { %3662 = vmatpush3.bf16.msra.mxu0 %v3967_v28 }
 0x947   :  { %v1171_v6 = vpop.xlane.xlu0 %1170 }
 0x948   :  { %v1179_v32 = vsub.f32 %v1163_v53, %v1171_v6  ;;  %v3972_v6 = vld [vmem:[%s5174_s7 + $0x18] sm:$0xff]  }
 0x94a   :  { %v1184_v38 = vmul.f32 1.442695, %v1179_v32  ;;  %v55_v32 = vld [vmem:[%s5169_s3 + $0x5] ss:$0 sm:$0xff] }
 0x94b   :  { %v1174_v7 = vpop.xlane.xlu0 %1173  ;;  %v1168_v12 = vpop.xlane.xlu1 %1167 }
 0x94c   :  { %v1180_v2 = vsub.f32 %v1164_v56, %v1174_v7  ;;  %v1178_v31 = vsub.f32 %v1162_v4, %v1168_v12  ;;  %v3973_v7 = vld [vmem:[%s5174_s7 + $0x20] sm:$0xff]  }
 0x94d   :  { %v53_v12 = vld [vmem:[%s5169_s3 + $0x3] ss:$0 sm:$0xff] }
 0x94e   :  { %v1186_v33 = vmul.f32 1.442695, %v1180_v2  ;;  %v1182_v35 = vmul.f32 1.442695, %v1178_v31  ;;  %v4181_v2 = vld [vmem:[%s5167_s0 + $0x8] sm:$0xff]  ;;  %v3868_v23 = vadd.f32 %v4183_v24, %v53_v12 }
 0x94f   :  { %v1177_v36 = vpop.xlane.xlu1 %1176  ;;  %v3874_v31 = vadd.f32 %v4181_v2, %v53_v12 }
 0x950   :  { %4077 = vpow2.f32 %v1186_v33  ;;  %v1181_v37 = vsub.f32 %v1165_v22, %v1177_v36  ;;  %v4182_v33 = vld [vmem:[%s5167_s0 + $0x10] sm:$0xff] }
 0x951   :  { %4079 = vpow2.f32 %v1182_v35  ;;  %v3865_v35 = vadd.f32 %v4182_v33, %v53_v12 }
 0x952   :  { %v1188_v39 = vmul.f32 1.442695, %v1181_v37 }
 0x954   :  { %4081 = vpow2.f32 %v1188_v39 }
 0x955   :  { %4083 = vpow2.f32 %v1184_v38  ;;  %v3875_v38 = vadd.f32 %v3874_v31, %v55_v32 }
 0x95a   :  { %v4078_v40 = vpop.eup %4077 }
 0x95b   :  { %v1196_v41 = vsel %vm424_vm2, %v4078_v40, 0.0  ;;  %v4080_v42 = vpop.eup %4079 }
 0x95c   :  { %1197 = vadd.xlane.f32.xlu0 %v1196_v41  ;;  %v1190_v9 = vsel %vm424_vm2, %v4080_v42, 0.0 }
 0x95e   :  { %v4082_v43 = vpop.eup %4081 }
 0x95f   :  { %v1199_v44 = vsel %vm424_vm2, %v4082_v43, 0.0  ;;  %v4084_v45 = vpop.eup %4083 }
 0x960   :  { %1191 = vadd.xlane.f32.xlu0 %v1190_v9  ;;  %1200 = vadd.xlane.f32.xlu1 %v1199_v44  ;;  %v1193_v29 = vsel %vm424_vm2, %v4084_v45, 0.0 }
 0x964   :  { %1194 = vadd.xlane.f32.xlu1 %v1193_v29 }
 0x975   :  { %1214 = vrot.lane.b32.xlu1 %v4386_v47, %s4210_s14 }
 0x976   :  { %1212 = vrot.lane.b32.xlu0 %v4393_v52, %s4210_s14 }
 0x9e9   :  { %v1198_v46 = vpop.xlane.xlu0 %1197 }
 0x9ed   :  { %v1192_v27 = vpop.xlane.xlu0 %1191  ;;  %v1201_v48 = vpop.xlane.xlu1 %1200 }
 0x9ee   :  { %4085 = vrcp.f32 %v1192_v27 }
 0x9f1   :  { %v1213_v49 = vpop.permute.xlu0 %1212  ;;  %v1195_v50 = vpop.xlane.xlu1 %1194 }
 0x9f2   :  { %4087 = vrcp.f32 %v1195_v50  ;;  %3675 = vmatprep.subr.bf16.mxu0 %v1213_v49 }
 0x9f3   :  { %4089 = vrcp.f32 %v1201_v48 }
 0x9f4   :  { %4091 = vrcp.f32 %v1198_v46 }
 0x9f5   :  { %v1215_v19 = vpop.permute.xlu1 %1214 }
 0x9f8   :  { %v4086_v53 = vpop.eup %4085 }
 0x9f9   :  { %v1206_v58 = vmul.f32 %v4086_v53, %v4080_v42 }
 0x9fa   :  { %v3659_v54 = vpop.f32.mrb[16].mxu0 }
 0x9fb   :  { %v1007_v55 = vpop.f32.mrb[17].mxu0 }
 0x9fc   :  { %v4088_v56 = vpop.eup %4087  ;;  %v3660_v4 = vpop.f32.mrb[18].mxu0 }
 0x9fd   :  { %v1023_v57 = vpack.c.bf16 %v3660_v4, %v3659_v54  ;;  %v1010_v47 = vpop.f32.mrb[19].mxu0  ;;  %v1207_v22 = vmul.f32 %v4088_v56, %v4084_v45  ;;  %v4090_v20 = vpop.eup %4089 }
 0x9fe   :  { %v1022_v52 = vpack.c.bf16 %v1010_v47, %v1007_v55  ;;  %v4092_v18 = vpop.eup %4091  ;;  %v1209_v25 = vmul.f32 %v4090_v20, %v4082_v43 }
 0x9ff   :  { %v1210_v17 = vpack.c.bf16 %v1207_v22, %v1206_v58  ;;  %v1208_v59 = vmul.f32 %v4092_v18, %v4078_v40 }
 0xa00   :  { %3663 = vmatprep.mubr.msk.bf16.mxu0 %vm354_vm1, %v1022_v52 }
 0xa01   :  { %3664 = vmatmul.mubr.msk.bf16.vlgmr.msra.gmra.mrb[12].mxu0 %vm354_vm1, %v1023_v57  ;;  %v1211_v21 = vpack.c.bf16 %v1209_v25, %v1208_v59 }
 0xa02   :  { %3676 = vmatpush3.bf16.msra.mxu0 %v1213_v49  ;;  %3679 = vmatprep.mubr.msk.bf16.mxu0 %vm424_vm2, %v1210_v17 }
 0xa03   :  { %3677 = vmatprep.subr.bf16.mxu0 %v1215_v19 }
 0xa06   :  { %3678 = vmatpush3.bf16.msra.mxu0 %v1215_v19 }
 0xa07   :  { %3683 = vmatprep.subr.bf16.mxu0 %v3968_v14 }
 0xa09   :  { %3680 = vmatmul.mubr.msk.bf16.vlgmr.msra.gmra.mrb[20].mxu0 %vm424_vm2, %v1211_v21 }
 0xa0a   :  { %3684 = vmatpush3.bf16.msra.mxu0 %v3968_v14 }
 0xa0b   :  { %3701 = vmatprep.subr.bf16.mxu0 %v3969_v60 }
 0xadc   :  { %v3681_v61 = vpop.f32.mrb[20].mxu0 }
 0xadd   :  { %v1258_v62 = vpop.f32.mrb[21].mxu0 }
 0xade   :  { %v3682_v63 = vpop.f32.mrb[22].mxu0 }
 0xadf   :  { %v1274_v8 = vpack.c.bf16 %v3682_v63, %v3681_v61  ;;  %v1261_v0 = vpop.f32.mrb[23].mxu0  ;;  %v3979_v61 = vld [vmem:[%s5168_s4 + $0x64] ss:$12 sps:$4 sm:$0xff]   ;;  %v3982_v63 = vld [vmem:[%s5168_s4 + $0x7c] ss:$12 sps:$4 sm:$0xff]  }
 0xae0   :  { %v1273_v1 = vpack.c.bf16 %v1261_v0, %v1258_v62  ;;  %v3977_v62 = vld [vmem:[%s5168_s4 + $0x60] ss:$12 sps:$4 sm:$0xff]   ;;  %1756 = vmatprep.subr.bf16.mxu1 %v3979_v61 }
 0xae1   :  { %1757 = vmatpush1.bf16.msra.mxu1 %v3977_v62  ;;  %v3985_v0 = vld [vmem:[%s5168_s4 + $0x94] ss:$12 sps:$4 sm:$0xff]  }
 0xae2   :  { %3685 = vmatprep.mubr.msk.bf16.mxu0 %vm354_vm1, %v1273_v1  ;;  %1758 = vmatprep.subr.bf16.mxu1 %v3982_v63  ;;  %v3983_v1 = vld [vmem:[%s5168_s4 + $0x90] ss:$12 sps:$4 sm:$0xff]   ;;  %v4186_v61 = vld [vmem:[%s5170_s2 + $0x20] sm:$0xff] }
 0xae3   :  { %3686 = vmatmul.mubr.msk.bf16.vlgmr.msra.gmra.mrb[12].mxu0 %vm354_vm1, %v1274_v8  ;;  %v3980_v8 = vld [vmem:[%s5168_s4 + $0x78] ss:$12 sps:$4 sm:$0xff]  }
 0xae4   :  { %3702 = vmatpush3.bf16.msra.mxu0 %v3969_v60  ;;  %3717 = vmatprep.mubr.bf16.mxu0 %v1461_v30  ;;  %v3976_v30 = vld [vmem:[%s5174_s7 + $0x38] sm:$0xff]  }
 0xae5   :  { %3703 = vmatprep.subr.bf16.mxu0 %v3970_v3  ;;  %1759 = vmatpush1.bf16.msra.mxu1 %v3980_v8 }
 0xae6   :  { %1760 = vmatprep.subr.bf16.mxu1 %v3985_v0  ;;  %v4188_v0 = vld [vmem:[%s5170_s2 + $0x28] sm:$0xff] }
 0xae8   :  { %3704 = vmatpush3.bf16.msra.mxu0 %v3970_v3  ;;  %v3988_v3 = vld [vmem:[%s5168_s4 + $0xac] ss:$12 sps:$4 sm:$0xff]  }
 0xae9   :  { %3705 = vmatprep.subr.bf16.mxu0 %v3971_v5  ;;  %1761 = vmatpush1.bf16.msra.mxu1 %v3983_v1 }
 0xaea   :  { %1762 = vmatprep.subr.bf16.mxu1 %v3988_v3 }
 0xaec   :  { %3706 = vmatpush3.bf16.msra.mxu0 %v3971_v5  ;;  %v3986_v5 = vld [vmem:[%s5168_s4 + $0xa8] ss:$12 sps:$4 sm:$0xff]  }
 0xaed   :  { %3707 = vmatprep.subr.bf16.mxu0 %v3972_v6  ;;  %1763 = vmatpush1.bf16.msra.mxu1 %v3986_v5 }
 0xaf0   :  { %3708 = vmatpush3.bf16.msra.mxu0 %v3972_v6  ;;  %v3989_v6 = vld [vmem:[%s5168_s4 + $0x68] ss:$12 sps:$4 sm:$0xff]  }
 0xaf1   :  { %3709 = vmatprep.subr.bf16.mxu0 %v3973_v7  ;;  %3721 = vmatprep.subr.bf16.mxu1 %v3989_v6 }
 0xaf4   :  { %3710 = vmatpush3.bf16.msra.mxu0 %v3973_v7 }
 0xaf5   :  { %3711 = vmatprep.subr.bf16.mxu0 %v3974_v26 }
 0xaf8   :  { %3712 = vmatpush3.bf16.msra.mxu0 %v3974_v26 }
 0xaf9   :  { %3713 = vmatprep.subr.bf16.mxu0 %v3975_v15 }
 0xafc   :  { %3714 = vmatpush3.bf16.msra.mxu0 %v3975_v15 }
 0xafd   :  { %3715 = vmatprep.subr.bf16.mxu0 %v3976_v30 }
 0xb00   :  { %3716 = vmatpush3.bf16.msra.mxu0 %v3976_v30 }
 0xb03   :  { %3718 = vmatmul.mubr.bf16.vlgmr.msra.gmra.mrb[12].mxu0 %v1462_v51  ;;  %v4184_v51 = vld [vmem:[%s5167_s0 + $0x18] sm:$0xff] }
 0xb04   :  { %v3871_v36 = vadd.f32 %v4184_v51, %v53_v12 }
 0xb06   :  { %v3872_v43 = vadd.f32 %v3871_v36, %v55_v32  ;;  %v1584_v36 = vld [vmem:[%s5169_s3 + $0x6] ss:$0 sm:$0xff] }
 0xbd6   :  { %v4695_v37 = vpop.f32.mrb[12].mxu0 }
 0xbd7   :  { %v4697_v39 = vpop.f32.mrb[13].mxu0  ;;  %v3866_v40 = vadd.f32 %v3865_v35, %v4695_v37 }
 0xbd8   :  { %v3869_v41 = vadd.f32 %v3868_v23, %v4697_v39  ;;  %v4701_v42 = vpop.f32.mrb[14].mxu0 }
 0xbd9   :  { %v4703_v9 = vpop.f32.mrb[15].mxu0  ;;  %v3873_v29 = vadd.f32 %v3872_v43, %v4701_v42  ;;  %v3867_v27 = vadd.f32 %v3866_v40, %v55_v32  ;;  %v1585_v43 = vld [vmem:[%s5169_s3 + $0x7] ss:$0 sm:$0xff] }
 0xbda   :  { %v3876_v44 = vadd.f32 %v3875_v38, %v4703_v9  ;;  %v3870_v45 = vadd.f32 %v3869_v41, %v55_v32 }
 0xbdb   :  { %v1600_v48 = vsel %vm56_vm0, %v3873_v29, 0.0  ;;  %v1597_v49 = vsel %vm56_vm0, %v3867_v27, 0.0 }
 0xbdc   :  { %v1591_v28 = vsel %vm56_vm0, %v3870_v45, 0.0  ;;  %v1594_v46 = vsel %vm56_vm0, %v3876_v44, 0.0 }
 0xbdd   :  { %1592 = vadd.xlane.f32.xlu1 %v1591_v28  ;;  %1595 = vadd.xlane.f32.xlu0 %v1594_v46 }
 0xbe1   :  { %1601 = vadd.xlane.f32.xlu1 %v1600_v48  ;;  %1598 = vadd.xlane.f32.xlu0 %v1597_v49 }
 0xc6a   :  { %v1593_v50 = vpop.xlane.xlu1 %1592  ;;  %v1596_v53 = vpop.xlane.xlu0 %1595 }
 0xc6b   :  { %v1603_v54 = vmul.f32 0.015625, %v1593_v50  ;;  %v1604_v55 = vmul.f32 0.015625, %v1596_v53  ;;  %v3990_v53 = vld [vmem:[%s5168_s4 + $0x80] ss:$12 sps:$4 sm:$0xff]  }
 0xc6d   :  { %v1607_v56 = vsub.f32 %v3870_v45, %v1603_v54  ;;  %v1608_v4 = vsub.f32 %v3876_v44, %v1604_v55 }
 0xc6e   :  { %v1602_v57 = vpop.xlane.xlu1 %1601  ;;  %v1599_v47 = vpop.xlane.xlu0 %1598 }
 0xc6f   :  { %v1606_v58 = vmul.f32 0.015625, %v1602_v57  ;;  %v1605_v22 = vmul.f32 0.015625, %v1599_v47  ;;  %v1611_v52 = vmul.f32 %v1607_v56, %v1607_v56  ;;  %v1612_v17 = vmul.f32 %v1608_v4, %v1608_v4  ;;  %v3991_v57 = vld [vmem:[%s5168_s4 + $0x98] ss:$12 sps:$4 sm:$0xff]  }
 0xc71   :  { %v1610_v20 = vsub.f32 %v3873_v29, %v1606_v58  ;;  %v1609_v18 = vsub.f32 %v3867_v27, %v1605_v22  ;;  %v1615_v19 = vsel %vm56_vm0, %v1611_v52, 0.0  ;;  %v1618_v25 = vsel %vm56_vm0, %v1612_v17, 0.0  ;;  %v3992_v58 = vld [vmem:[%s5168_s4 + $0xb0] ss:$12 sps:$4 sm:$0xff]  }
 0xc72   :  { %1616 = vadd.xlane.f32.xlu0 %v1615_v19  ;;  %1619 = vadd.xlane.f32.xlu1 %v1618_v25 }
 0xc73   :  { %v1614_v14 = vmul.f32 %v1610_v20, %v1610_v20  ;;  %v1613_v59 = vmul.f32 %v1609_v18, %v1609_v18 }
 0xc75   :  { %v1624_v21 = vsel %vm56_vm0, %v1614_v14, 0.0  ;;  %v1621_v60 = vsel %vm56_vm0, %v1613_v59, 0.0  ;;  %v4185_v14 = vld [vmem:[%s5170_s2] sm:$0xff] }
 0xc76   :  { %1625 = vadd.xlane.f32.xlu1 %v1624_v21  ;;  %1622 = vadd.xlane.f32.xlu0 %v1621_v60 }
 0xcff   :  { %v1620_v7 = vpop.xlane.xlu1 %1619  ;;  %v1617_v26 = vpop.xlane.xlu0 %1616 }
 0xd00   :  { %v1628_v15 = vmul.f32 0.015625, %v1620_v7  ;;  %v1627_v30 = vmul.f32 0.015625, %v1617_v26 }
 0xd02   :  { %v1632_v12 = vadd.f32 1e-05, %v1628_v15  ;;  %v1631_v2 = vadd.f32 1e-05, %v1627_v30 }
 0xd03   :  { %v1626_v31 = vpop.xlane.xlu1 %1625  ;;  %v1623_v32 = vpop.xlane.xlu0 %1622 }
 0xd04   :  { %4093 = vrsqrt.f32 %v1632_v12  ;;  %v1630_v33 = vmul.f32 0.015625, %v1626_v31  ;;  %v1629_v35 = vmul.f32 0.015625, %v1623_v32  ;;  %v4189_v12 = vld [vmem:[%s5170_s2 + $0x10] sm:$0xff] }
 0xd05   :  { %4095 = vrsqrt.f32 %v1631_v2 }
 0xd06   :  { %v1634_v24 = vadd.f32 1e-05, %v1630_v33  ;;  %v1633_v23 = vadd.f32 1e-05, %v1629_v35  ;;  %v4190_v33 = vld [vmem:[%s5170_s2 + $0x30] sm:$0xff] }
 0xd08   :  { %4097 = vrsqrt.f32 %v1634_v24 }
 0xd09   :  { %4099 = vrsqrt.f32 %v1633_v23  ;;  %v4191_v23 = vld [vmem:[%s5170_s2 + $0x18] sm:$0xff] }
 0xd0e   :  { %v4094_v51 = vpop.eup %4093 }
 0xd0f   :  { %v4096_v38 = vpop.eup %4095  ;;  %v1640_v40 = vmul.f32 %v4094_v51, %v1608_v4 }
 0xd10   :  { %v1639_v41 = vmul.f32 %v4096_v38, %v1607_v56  ;;  %v4192_v38 = vld [vmem:[%s5170_s2 + $0x38] sm:$0xff] }
 0xd11   :  { %v1644_v44 = vmul.f32 %v1640_v40, %v1584_v36 }
 0xd12   :  { %v4098_v45 = vpop.eup %4097  ;;  %v1643_v29 = vmul.f32 %v1639_v41, %v1584_v36 }
 0xd13   :  { %v4100_v28 = vpop.eup %4099  ;;  %v1642_v46 = vmul.f32 %v4098_v45, %v1610_v20  ;;  %v1648_v27 = vadd.f32 %v1644_v44, %v1585_v43 }
 0xd14   :  { %v1641_v48 = vmul.f32 %v4100_v28, %v1609_v18  ;;  %v1647_v49 = vadd.f32 %v1643_v29, %v1585_v43 }
 0xd15   :  { %v1646_v55 = vmul.f32 %v1642_v46, %v1584_v36 }
 0xd16   :  { %v4748_v50 = vpack.c.bf16 %v1648_v27, %v1647_v49  ;;  %v1645_v54 = vmul.f32 %v1641_v48, %v1584_v36 }
 0xd17   :  { %v1650_v4 = vadd.f32 %v1646_v55, %v1585_v43 }
 0xd18   :  { %3367 = vmatmul.mubr.msk.bf16.vlgmr.msra.gmra.mrb[28].mxu1 %vm56_vm0, %v4748_v50  ;;  %v1649_v56 = vadd.f32 %v1645_v54, %v1585_v43 }
 0xd19   :  { %3722 = vmatpush3.bf16.msra.mxu1 %v3989_v6  ;;  %1798 = vmatprep.mubr.bf16.mxu1 %v4203_v34  ;;  %v3338_v34 = vld [vmem:[%s5169_s3 + $0x18] ss:$8 sm:$0x7] }
 0xd1a   :  { %3723 = vmatprep.subr.bf16.mxu1 %v3990_v53  ;;  %v4759_v47 = vpack.c.bf16 %v1650_v4, %v1649_v56  ;;  %v1674_v22 = vrot.slane %v3338_v34, %v139_v11  ;;  %v1678_v52 = vrot.slane %v3338_v34, %v143_v13  ;;  %v4187_v13 = vld [vmem:[%s5170_s2 + $0x8] sm:$0xff]  ;;  %v1682_v41 = vrot.slane %v3338_v34, %v147_v16 }
 0xd1d   :  { %3724 = vmatpush3.bf16.msra.mxu1 %v3990_v53 }
 0xd1e   :  { %3725 = vmatprep.subr.bf16.mxu1 %v3991_v57 }
 0xd20   :  { %3368 = vmatmul.mubr.msk.bf16.gmra.mrb[32].mxu1 %vm56_vm0, %v4759_v47 }
 0xd21   :  { %3726 = vmatpush3.bf16.msra.mxu1 %v3991_v57  ;;  %3729 = vmatprep.mubr.msk.bf16.mxu1 %vm56_vm0, %v4748_v50 }
 0xd22   :  { %3727 = vmatprep.subr.bf16.mxu1 %v3992_v58 }
 0xd25   :  { %3728 = vmatpush3.bf16.msra.mxu1 %v3992_v58 }
 0xd28   :  { %3730 = vmatmul.mubr.msk.bf16.vlgmr.msra.gmra.mrb[36].mxu1 %vm56_vm0, %v4759_v47 }
 0xdeb   :  { %v1790_v17 = vpop.f32.mrb[28].mxu1 }
 0xdec   :  { %v1791_v20 = vadd.f32 %v1790_v17, %v1674_v22  ;;  %v1792_v18 = vpop.f32.mrb[29].mxu1 }
 0xded   :  { %v1793_v19 = vadd.f32 %v1792_v18, %v1678_v52  ;;  %v1794_v25 = vpop.f32.mrb[30].mxu1 }
 0xdee   :  { %v1858_v59 = vmul.f32 %v4185_v14, %v1791_v20  ;;  %v1795_v21 = vadd.f32 %v1794_v25, %v1674_v22  ;;  %v1796_v60 = vpop.f32.mrb[31].mxu1 }
 0xdef   :  { %v1862_v11 = vmul.f32 %v4186_v61, %v1793_v19  ;;  %v1797_v62 = vadd.f32 %v1796_v60, %v1678_v52  ;;  %v4830_v19 = vld [vmem:[%s5171_s1] sm:$0xff]  ;;  %v4843_v60 = vld [vmem:[%s5171_s1 + $0x18] sm:$0xff] }
 0xdf0   :  { %v1859_v63 = vmul.f32 %v4187_v13, %v1795_v21 }
 0xdf1   :  { %v1866_v8 = vadd.f32 %v1862_v11, %v1858_v59  ;;  %v1863_v1 = vmul.f32 %v4188_v0, %v1797_v62  ;;  %v4837_v59 = vld [vmem:[%s5171_s1 + $0x8] sm:$0xff]  ;;  %v4850_v62 = vld [vmem:[%s5171_s1 + $0x10] sm:$0xff] }
 0xdf3   :  { %v1867_v3 = vadd.f32 %v1863_v1, %v1859_v63  ;;  %v1800_v5 = vpop.f32.mrb[32].mxu1 }
 0xdf4   :  { %v1801_v6 = vadd.f32 %v1800_v5, %v1674_v22  ;;  %v1802_v7 = vpop.f32.mrb[33].mxu1 }
 0xdf5   :  { %v4789_v26 = vpack.c.bf16 %v1867_v3, %v1866_v8  ;;  %v1803_v15 = vadd.f32 %v1802_v7, %v1678_v52  ;;  %v1804_v30 = vpop.f32.mrb[34].mxu1 }
 0xdf6   :  { %v1860_v2 = vmul.f32 %v4189_v12, %v1801_v6  ;;  %v1805_v31 = vadd.f32 %v1804_v30, %v1674_v22  ;;  %v1806_v32 = vpop.f32.mrb[35].mxu1 }
 0xdf7   :  { %v1864_v35 = vmul.f32 %v4190_v33, %v1803_v15  ;;  %v1807_v24 = vadd.f32 %v1806_v32, %v1678_v52  ;;  %1885 = vrot.lane.b32.xlu0 %v4789_v26, %s4204_s21  ;;  %3737 = vmatprep.mubr.msk.bf16.mxu0 %vm354_vm1, %v4789_v26 }
 0xdf8   :  { %v1861_v51 = vmul.f32 %v4191_v23, %v1805_v31 }
 0xdf9   :  { %v1868_v36 = vadd.f32 %v1864_v35, %v1860_v2  ;;  %v1865_v40 = vmul.f32 %v4192_v38, %v1807_v24 }
 0xdfb   :  { %v1869_v43 = vadd.f32 %v1865_v40, %v1861_v51  ;;  %v3731_v44 = vpop.f32.mrb[36].mxu1 }
 0xdfc   :  { %v1843_v45 = vpop.f32.mrb[37].mxu1  ;;  %v1852_v46 = vadd.f32 %v3731_v44, %v1682_v41 }
 0xdfd   :  { %v4809_v29 = vpack.c.bf16 %v1869_v43, %v1868_v36  ;;  %v3732_v28 = vpop.f32.mrb[38].mxu1  ;;  %v1844_v49 = vadd.f32 %v1843_v45, %v1682_v41 }
 0xdfe   :  { %v1855_v27 = vadd.f32 %v3732_v28, %v1682_v41  ;;  %v1846_v48 = vpop.f32.mrb[39].mxu1 }
 0xdff   :  { %v1847_v53 = vadd.f32 %v1846_v48, %v1682_v41  ;;  %1887 = vrot.lane.b32.xlu1 %v4809_v29, %s4204_s21 }
 0xe00   :  { %v4813_v54 = vpack.c.bf16 %v1855_v27, %v1852_v46 }
 0xe01   :  { %v4815_v55 = vpack.c.bf16 %v1847_v53, %v1844_v49 }
 0xe03   :  { %3741 = vmatprep.subr.bf16.mxu1 %v4815_v55 }
 0xe04   :  { %3742 = vmatpush3.bf16.msra.mxu1 %v4815_v55 }
 0xe05   :  { %3743 = vmatprep.subr.bf16.mxu1 %v4813_v54 }
 0xe08   :  { %3744 = vmatpush3.bf16.msra.mxu1 %v4813_v54 }
 0xe69   :  { %v1886_v10 = vpop.permute.xlu0 %1885 }
 0xe6a   :  { %v1896_v16 = vsel %vm354_vm1, %v1886_v10, 0  ;;  %3929 = vmatprep.subr.msk.bf16.mxu0 %vm354_vm1, %v1886_v10 }
 0xe6b   :  { %3734 = vmatpush3.bf16.xpose.msra.mxu0 %v1896_v16 }
 0xe71   :  { %v1888_v56 = vpop.permute.xlu1 %1887 }
 0xe72   :  { %v1899_v4 = vsel %vm354_vm1, %v1888_v56, 0  ;;  %3930 = vmatprep.subr.msk.bf16.mxu0 %vm354_vm1, %v1888_v56 }
 0xe73   :  { %3736 = vmatpush3.bf16.xpose.msra.mxu0 %v1899_v4 }
 0xe7a   :  { %3738 = vmatmul.mubr.msk.bf16.vlgmr.msra.gmra.mrb[24].mxu0 %vm354_vm1, %v4809_v29 }
 0xf4d   :  { %v3739_v57 = vpop.f32.mrb[24].mxu0 }
 0xf4e   :  { %v1935_v58 = vpop.f32.mrb[25].mxu0  ;;  %v1952_v20 = vmul.f32 0.25, %v3739_v57 }
 0xf4f   :  { %v1950_v34 = vmul.f32 0.25, %v1935_v58  ;;  %v3740_v22 = vpop.f32.mrb[26].mxu0 }
 0xf50   :  { %v1953_v52 = vmul.f32 0.25, %v3740_v22  ;;  %v1938_v17 = vpop.f32.mrb[27].mxu0  ;;  %v1956_v13 = vadd.f32 %v4850_v62, %v1952_v20 }
 0xf51   :  { %v1951_v18 = vmul.f32 0.25, %v1938_v17  ;;  %v1954_v25 = vadd.f32 %v4830_v19, %v1950_v34 }
 0xf52   :  { %v1957_v61 = vadd.f32 %v4843_v60, %v1953_v52  ;;  %v1964_v8 = vsel %vm424_vm2, %v1956_v13, -inf }
 0xf53   :  { %v1958_v14 = vsel %vm424_vm2, %v1954_v25, -inf  ;;  %v1955_v21 = vadd.f32 %v4837_v59, %v1951_v18 }
 0xf54   :  { %1959 = vmax.xlane.f32.xlu1 %v1958_v14  ;;  %v1967_v63 = vsel %vm424_vm2, %v1957_v61, -inf }
 0xf55   :  { %v1961_v11 = vsel %vm424_vm2, %v1955_v21, -inf }
 0xf56   :  { %1962 = vmax.xlane.f32.xlu0 %v1961_v11 }
 0xf58   :  { %1968 = vmax.xlane.f32.xlu1 %v1967_v63 }
 0xf5a   :  { %1965 = vmax.xlane.f32.xlu0 %v1964_v8 }
 0xfe1   :  { %v1960_v0 = vpop.xlane.xlu1 %1959 }
 0xfe2   :  { %v1970_v6 = vsub.f32 %v1954_v25, %v1960_v0 }
 0xfe3   :  { %v1963_v1 = vpop.xlane.xlu0 %1962 }
 0xfe4   :  { %v1971_v3 = vsub.f32 %v1955_v21, %v1963_v1  ;;  %v1974_v31 = vmul.f32 1.442695, %v1970_v6 }
 0xfe5   :  { %v1969_v5 = vpop.xlane.xlu1 %1968 }
 0xfe6   :  { %v1976_v7 = vmul.f32 1.442695, %v1971_v3  ;;  %v1973_v15 = vsub.f32 %v1957_v61, %v1969_v5 }
 0xfe7   :  { %v1966_v30 = vpop.xlane.xlu0 %1965 }
 0xfe8   :  { %4101 = vpow2.f32 %v1976_v7  ;;  %v1980_v12 = vmul.f32 1.442695, %v1973_v15  ;;  %v1972_v2 = vsub.f32 %v1956_v13, %v1966_v30 }
 0xfea   :  { %4103 = vpow2.f32 %v1980_v12  ;;  %v1978_v32 = vmul.f32 1.442695, %v1972_v2 }
 0xfec   :  { %4105 = vpow2.f32 %v1978_v32 }
 0xfed   :  { %4107 = vpow2.f32 %v1974_v31 }
 0xff2   :  { %v4102_v33 = vpop.eup %4101 }
 0xff3   :  { %v1985_v35 = vsel %vm424_vm2, %v4102_v33, 0.0 }
 0xff4   :  { %v4104_v24 = vpop.eup %4103  ;;  %1986 = vadd.xlane.f32.xlu1 %v1985_v35 }
 0xff5   :  { %v1991_v51 = vsel %vm424_vm2, %v4104_v24, 0.0 }
 0xff6   :  { %v4106_v23 = vpop.eup %4105 }
 0xff7   :  { %v1988_v36 = vsel %vm424_vm2, %v4106_v23, 0.0  ;;  %v4108_v38 = vpop.eup %4107 }
 0xff8   :  { %1992 = vadd.xlane.f32.xlu1 %v1991_v51  ;;  %1989 = vadd.xlane.f32.xlu0 %v1988_v36  ;;  %v1982_v40 = vsel %vm424_vm2, %v4108_v38, 0.0 }
 0xffc   :  { %1983 = vadd.xlane.f32.xlu0 %v1982_v40 }
0x1009   :  { %2067 = vrot.lane.b32.xlu1 %v4809_v29, %s4205_s30 }
0x100d   :  { %2061 = vrot.lane.b32.xlu1 %v4789_v26, %s4206_s10 }
0x1011   :  { %2063 = vrot.lane.b32.xlu1 %v4809_v29, %s4206_s10 }
0x1012   :  { %2065 = vrot.lane.b32.xlu0 %v4789_v26, %s4205_s30 }
0x1015   :  { %2377 = vrot.lane.b32.xlu1 %v4809_v29, %s4207_s11 }
0x1016   :  { %2375 = vrot.lane.b32.xlu0 %v4789_v26, %s4207_s11 }
0x1019   :  { %2373 = vrot.lane.b32.xlu1 %v4809_v29, %s4208_s12 }
0x101a   :  { %2371 = vrot.lane.b32.xlu0 %v4789_v26, %s4208_s12 }
0x1081   :  { %v1987_v41 = vpop.xlane.xlu1 %1986 }
0x1085   :  { %v1993_v43 = vpop.xlane.xlu1 %1992  ;;  %v1990_v44 = vpop.xlane.xlu0 %1989 }
0x1086   :  { %4109 = vrcp.f32 %v1993_v43 }
0x1087   :  { %4111 = vrcp.f32 %v1990_v44 }
0x1088   :  { %4113 = vrcp.f32 %v1987_v41 }
0x1089   :  { %v1984_v45 = vpop.xlane.xlu0 %1983  ;;  %v2068_v16 = vpop.permute.xlu1 %2067 }
0x108a   :  { %4115 = vrcp.f32 %v1984_v45  ;;  %v2079_v52 = vsel %vm354_vm1, %v2068_v16, 0 }
0x108d   :  { %v2066_v28 = vpop.permute.xlu0 %2065  ;;  %v2062_v34 = vpop.permute.xlu1 %2061 }
0x108e   :  { %3931 = vmatprep.subr.msk.bf16.mxu1 %vm354_vm1, %v2066_v28  ;;  %v2076_v22 = vsel %vm354_vm1, %v2066_v28, 0 }
0x1090   :  { %v4110_v46 = vpop.eup %4109 }
0x1091   :  { %v4112_v27 = vpop.eup %4111  ;;  %v2001_v53 = vmul.f32 %v4110_v46, %v4104_v24  ;;  %v2376_v17 = vpop.permute.xlu0 %2375 }
0x1092   :  { %v4114_v48 = vpop.eup %4113  ;;  %v2000_v10 = vmul.f32 %v4112_v27, %v4106_v23  ;;  %v2064_v20 = vpop.permute.xlu1 %2063  ;;  %v2386_v18 = vsel %vm354_vm1, %v2376_v17, 0 }
0x1093   :  { %v1999_v4 = vmul.f32 %v4114_v48, %v4102_v33 }
0x1094   :  { %v4116_v49 = vpop.eup %4115  ;;  %v2003_v58 = vpack.c.bf16 %v2001_v53, %v2000_v10 }
0x1095   :  { %v1998_v56 = vmul.f32 %v4116_v49, %v4108_v38  ;;  %v2372_v25 = vpop.permute.xlu0 %2371 }
0x1096   :  { %v2378_v14 = vpop.permute.xlu1 %2377 }
0x1097   :  { %v2002_v57 = vpack.c.bf16 %v1999_v4, %v1998_v56  ;;  %v2389_v21 = vsel %vm354_vm1, %v2378_v14, 0 }
0x1099   :  { %3745 = vmatprep.mubr.msk.bf16.mxu1 %vm424_vm2, %v2002_v57 }
0x109a   :  { %3746 = vmatmul.mubr.msk.bf16.vlgmr.msra.gmra.mrb[40].mxu1 %vm424_vm2, %v2003_v58  ;;  %v2374_v61 = vpop.permute.xlu1 %2373 }
0x109b   :  { %3750 = vmatpush3.bf16.xpose.msra.mxu1 %v2076_v22  ;;  %3753 = vmatprep.mubr.msk.bf16.mxu1 %vm354_vm1, %v2062_v34 }
0x109c   :  { %3932 = vmatprep.subr.msk.bf16.mxu1 %vm354_vm1, %v2068_v16 }
0x10a3   :  { %3752 = vmatpush3.bf16.xpose.msra.mxu1 %v2079_v52 }
0x10a4   :  { %3933 = vmatprep.subr.msk.bf16.mxu1 %vm354_vm1, %v2376_v17 }
0x10aa   :  { %3754 = vmatmul.mubr.msk.bf16.vlgmr.msra.gmra.mrb[44].mxu1 %vm354_vm1, %v2064_v20 }
0x10ab   :  { %3778 = vmatpush3.bf16.xpose.msra.mxu1 %v2386_v18  ;;  %3781 = vmatprep.mubr.msk.bf16.mxu1 %vm354_vm1, %v2372_v25 }
0x10ac   :  { %3934 = vmatprep.subr.msk.bf16.mxu1 %vm354_vm1, %v2378_v14 }
0x10b3   :  { %3780 = vmatpush3.bf16.xpose.msra.mxu1 %v2389_v21 }
0x10ba   :  { %3782 = vmatmul.mubr.msk.bf16.vlgmr.msra.gmra.mrb[48].mxu1 %vm354_vm1, %v2374_v61 }
0x116d   :  { %v4889_v11 = vpop.f32.mrb[40].mxu1 }
0x116e   :  { %v4891_v13 = vpop.f32.mrb[41].mxu1 }
0x116f   :  { %v4893_v63 = vpop.f32.mrb[42].mxu1 }
0x1170   :  { %v2060_v8 = vpack.c.bf16 %v4893_v63, %v4889_v11  ;;  %v4897_v0 = vpop.f32.mrb[43].mxu1 }
0x1171   :  { %v2059_v1 = vpack.c.bf16 %v4897_v0, %v4891_v13 }
0x117d   :  { %v3755_v3 = vpop.f32.mrb[44].mxu1 }
0x117e   :  { %v2115_v5 = vpop.f32.mrb[45].mxu1  ;;  %v2132_v6 = vmul.f32 0.25, %v3755_v3 }
0x117f   :  { %v2130_v7 = vmul.f32 0.25, %v2115_v5  ;;  %v3756_v15 = vpop.f32.mrb[46].mxu1 }
0x1180   :  { %v2118_v30 = vpop.f32.mrb[47].mxu1  ;;  %v2133_v31 = vmul.f32 0.25, %v3756_v15  ;;  %v2136_v35 = vadd.f32 %v4850_v62, %v2132_v6 }
0x1181   :  { %v2131_v12 = vmul.f32 0.25, %v2118_v30  ;;  %v2134_v2 = vadd.f32 %v4830_v19, %v2130_v7 }
0x1182   :  { %v2144_v23 = vsel %vm424_vm2, %v2136_v35, -inf  ;;  %v2137_v51 = vadd.f32 %v4843_v60, %v2133_v31 }
0x1183   :  { %v2138_v32 = vsel %vm424_vm2, %v2134_v2, -inf  ;;  %v2135_v33 = vadd.f32 %v4837_v59, %v2131_v12 }
0x1184   :  { %2139 = vmax.xlane.f32.xlu0 %v2138_v32  ;;  %v2147_v36 = vsel %vm424_vm2, %v2137_v51, -inf }
0x1185   :  { %v2141_v24 = vsel %vm424_vm2, %v2135_v33, -inf }
0x1186   :  { %2142 = vmax.xlane.f32.xlu1 %v2141_v24 }
0x1188   :  { %2145 = vmax.xlane.f32.xlu0 %v2144_v23 }
0x118c   :  { %2148 = vmax.xlane.f32.xlu0 %v2147_v36 }
0x118d   :  { %v3783_v38 = vpop.f32.mrb[48].mxu1 }
0x118e   :  { %v2425_v40 = vpop.f32.mrb[49].mxu1  ;;  %v2442_v14 = vmul.f32 0.25, %v3783_v38 }
0x118f   :  { %v3784_v41 = vpop.f32.mrb[50].mxu1  ;;  %v2440_v25 = vmul.f32 0.25, %v2425_v40 }
0x1190   :  { %v2428_v43 = vpop.f32.mrb[51].mxu1  ;;  %v4929_v61 = vadd.f32 %v4850_v62, %v2442_v14  ;;  %v2443_v3 = vmul.f32 0.25, %v3784_v41 }
0x1191   :  { %v4926_v21 = vadd.f32 %v4830_v19, %v2440_v25  ;;  %v2441_v6 = vmul.f32 0.25, %v2428_v43 }
0x1193   :  { %v2448_v5 = vsel %vm424_vm2, %v4926_v21, -inf  ;;  %v4939_v7 = vadd.f32 %v4837_v59, %v2441_v6 }
0x1195   :  { %v2451_v30 = vsel %vm424_vm2, %v4939_v7, -inf }
0x1211   :  { %v2140_v44 = vpop.xlane.xlu0 %2139 }
0x1212   :  { %v2150_v45 = vsub.f32 %v2134_v2, %v2140_v44 }
0x1213   :  { %v2143_v28 = vpop.xlane.xlu1 %2142 }
0x1214   :  { %v2154_v48 = vmul.f32 1.442695, %v2150_v45  ;;  %v2151_v49 = vsub.f32 %v2135_v33, %v2143_v28 }
0x1215   :  { %v2146_v46 = vpop.xlane.xlu0 %2145 }
0x1216   :  { %v2152_v27 = vsub.f32 %v2136_v35, %v2146_v46  ;;  %v2156_v56 = vmul.f32 1.442695, %v2151_v49  ;;  %v3993_v49 = vld [vmem:[%s5172_s6 + $0x20] sm:$0xff]  }
0x1218   :  { %v2158_v53 = vmul.f32 1.442695, %v2152_v27 }
0x1219   :  { %v2149_v10 = vpop.xlane.xlu0 %2148 }
0x121a   :  { %4117 = vpow2.f32 %v2158_v53  ;;  %v2153_v16 = vsub.f32 %v2137_v51, %v2149_v10  ;;  %v3994_v10 = vld [vmem:[%s5172_s6 + $0x28] sm:$0xff]  }
0x121b   :  { %4119 = vpow2.f32 %v2154_v48 }
0x121c   :  { %v2160_v4 = vmul.f32 1.442695, %v2153_v16 }
0x121e   :  { %4121 = vpow2.f32 %v2160_v4  ;;  %v3996_v4 = vld [vmem:[%s5172_s6 + $0x38] sm:$0xff]  }
0x121f   :  { %4123 = vpow2.f32 %v2156_v56  ;;  %v3995_v56 = vld [vmem:[%s5172_s6 + $0x30] sm:$0xff]  }
0x1224   :  { %v4118_v57 = vpop.eup %4117 }
0x1225   :  { %v2168_v58 = vsel %vm424_vm2, %v4118_v57, 0.0  ;;  %v4120_v34 = vpop.eup %4119 }
0x1226   :  { %2169 = vadd.xlane.f32.xlu0 %v2168_v58  ;;  %v2162_v52 = vsel %vm424_vm2, %v4120_v34, 0.0 }
0x1228   :  { %v4122_v22 = vpop.eup %4121 }
0x1229   :  { %v2171_v17 = vsel %vm424_vm2, %v4122_v22, 0.0  ;;  %v4124_v20 = vpop.eup %4123 }
0x122a   :  { %2163 = vadd.xlane.f32.xlu0 %v2162_v52  ;;  %2172 = vadd.xlane.f32.xlu1 %v2171_v17  ;;  %v2165_v18 = vsel %vm424_vm2, %v4124_v20, 0.0 }
0x122e   :  { %2166 = vadd.xlane.f32.xlu1 %v2165_v18 }
0x123f   :  { %2188 = vrot.lane.b32.xlu1 %v4813_v54, %s4206_s10 }
0x1240   :  { %2186 = vrot.lane.b32.xlu0 %v4815_v55, %s4206_s10 }
0x1243   :  { %2626 = vrot.lane.b32.xlu1 %v4789_v26, %s4209_s13 }
0x1244   :  { %2622 = vrot.lane.b32.xlu0 %v4789_v26, %s4210_s14  ;;  %v4934_v26 = vadd.f32 %v4843_v60, %v2443_v3 }
0x1246   :  { %v2457_v15 = vsel %vm424_vm2, %v4934_v26, -inf }
0x1247   :  { %2628 = vrot.lane.b32.xlu1 %v4809_v29, %s4209_s13 }
0x124b   :  { %2624 = vrot.lane.b32.xlu1 %v4809_v29, %s4210_s14  ;;  %v2454_v29 = vsel %vm424_vm2, %v4929_v61, -inf }
0x1263   :  { %2449 = vmax.xlane.f32.xlu0 %v2448_v5 }
0x1267   :  { %2455 = vmax.xlane.f32.xlu0 %v2454_v29 }
0x126b   :  { %2458 = vmax.xlane.f32.xlu0 %v2457_v15  ;;  %v3997_v15 = vld [vmem:[%s5173_s5 + $0x28] sm:$0xff]  }
0x126f   :  { %2452 = vmax.xlane.f32.xlu1 %v2451_v30  ;;  %v3998_v30 = vld [vmem:[%s5173_s5 + $0x20] sm:$0xff]  }
0x12b3   :  { %v2170_v12 = vpop.xlane.xlu0 %2169 }
0x12b7   :  { %v2173_v2 = vpop.xlane.xlu1 %2172  ;;  %v2164_v31 = vpop.xlane.xlu0 %2163 }
0x12b8   :  { %4125 = vrcp.f32 %v2173_v2 }
0x12b9   :  { %4127 = vrcp.f32 %v2164_v31 }
0x12ba   :  { %4129 = vrcp.f32 %v2170_v12 }
0x12bb   :  { %v2167_v32 = vpop.xlane.xlu1 %2166  ;;  %v2187_v33 = vpop.permute.xlu0 %2186 }
0x12bc   :  { %4131 = vrcp.f32 %v2167_v32  ;;  %3757 = vmatprep.subr.bf16.mxu0 %v2187_v33 }
0x12bd   :  { %3758 = vmatpush3.bf16.msra.mxu0 %v2187_v33 }
0x12bf   :  { %v2189_v35 = vpop.permute.xlu1 %2188  ;;  %v2623_v24 = vpop.permute.xlu0 %2622 }
0x12c0   :  { %3759 = vmatprep.subr.bf16.mxu0 %v2189_v35  ;;  %3803 = vmatprep.mubr.msk.bf16.mxu1 %vm354_vm1, %v2623_v24 }
0x12c1   :  { %3760 = vmatpush3.bf16.msra.mxu0 %v2189_v35 }
0x12c2   :  { %v4126_v23 = vpop.eup %4125  ;;  %3765 = vmatprep.subr.bf16.mxu0 %v3997_v15 }
0x12c3   :  { %v2627_v51 = vpop.permute.xlu1 %2626  ;;  %v4128_v36 = vpop.eup %4127  ;;  %v2181_v43 = vmul.f32 %v4126_v23, %v4122_v22 }
0x12c4   :  { %v2637_v38 = vsel %vm354_vm1, %v2627_v51, 0  ;;  %3935 = vmatprep.subr.msk.bf16.mxu1 %vm354_vm1, %v2627_v51  ;;  %v4130_v40 = vpop.eup %4129  ;;  %v2178_v45 = vmul.f32 %v4128_v36, %v4120_v34 }
0x12c5   :  { %3800 = vmatpush3.bf16.xpose.msra.mxu1 %v2637_v38  ;;  %v2180_v46 = vmul.f32 %v4130_v40, %v4118_v57 }
0x12c6   :  { %v4132_v41 = vpop.eup %4131 }
0x12c7   :  { %v2629_v44 = vpop.permute.xlu1 %2628  ;;  %v2179_v28 = vmul.f32 %v4132_v41, %v4124_v20  ;;  %v2183_v48 = vpack.c.bf16 %v2181_v43, %v2180_v46 }
0x12c8   :  { %3936 = vmatprep.subr.msk.bf16.mxu1 %vm354_vm1, %v2629_v44  ;;  %v2640_v53 = vsel %vm354_vm1, %v2629_v44, 0 }
0x12c9   :  { %v2182_v27 = vpack.c.bf16 %v2179_v28, %v2178_v45 }
0x12cb   :  { %3761 = vmatprep.mubr.msk.bf16.mxu0 %vm424_vm2, %v2182_v27  ;;  %v2625_v16 = vpop.permute.xlu1 %2624 }
0x12cc   :  { %3762 = vmatmul.mubr.msk.bf16.vlgmr.msra.gmra.mrb[28].mxu0 %vm424_vm2, %v2183_v48 }
0x12cd   :  { %3802 = vmatpush3.bf16.xpose.msra.mxu1 %v2640_v53  ;;  %3766 = vmatpush3.bf16.msra.mxu0 %v3997_v15 }
0x12ce   :  { %3821 = vmatprep.subr.bf16.mxu1 %v3993_v49  ;;  %3771 = vmatprep.subr.bf16.mxu0 %v3998_v30 }
0x12d4   :  { %3804 = vmatmul.mubr.msk.bf16.vlgmr.msra.gmra.mrb[52].mxu1 %vm354_vm1, %v2625_v16 }
0x12d5   :  { %3822 = vmatpush3.bf16.msra.mxu1 %v3993_v49  ;;  %3829 = vmatprep.mubr.msk.bf16.mxu1 %vm56_vm0, %v4748_v50 }
0x12d6   :  { %3823 = vmatprep.subr.bf16.mxu1 %v3994_v10 }
0x12d9   :  { %3824 = vmatpush3.bf16.msra.mxu1 %v3994_v10 }
0x12da   :  { %3825 = vmatprep.subr.bf16.mxu1 %v3995_v56 }
0x12dd   :  { %3826 = vmatpush3.bf16.msra.mxu1 %v3995_v56 }
0x12de   :  { %3827 = vmatprep.subr.bf16.mxu1 %v3996_v4 }
0x12e1   :  { %3828 = vmatpush3.bf16.msra.mxu1 %v3996_v4 }
0x12e4   :  { %3830 = vmatmul.mubr.msk.bf16.vlgmr.msra.gmra.mrb[56].mxu1 %vm56_vm0, %v4759_v47 }
0x12f0   :  { %v2450_v57 = vpop.xlane.xlu0 %2449 }
0x12f1   :  { %v2460_v50 = vsub.f32 %v4926_v21, %v2450_v57 }
0x12f3   :  { %v2464_v22 = vmul.f32 1.442695, %v2460_v50 }
0x12f4   :  { %v2456_v58 = vpop.xlane.xlu0 %2455 }
0x12f5   :  { %v2462_v34 = vsub.f32 %v4929_v61, %v2456_v58 }
0x12f7   :  { %v2468_v52 = vmul.f32 1.442695, %v2462_v34  ;;  %v1589_v34 = vld [vmem:[%s5169_s3 + $0x1a] ss:$0 sm:$0xff] }
0x12f8   :  { %v2459_v17 = vpop.xlane.xlu0 %2458 }
0x12f9   :  { %4133 = vpow2.f32 %v2468_v52  ;;  %v2463_v20 = vsub.f32 %v4934_v26, %v2459_v17 }
0x12fa   :  { %4135 = vpow2.f32 %v2464_v22 }
0x12fb   :  { %v2470_v18 = vmul.f32 1.442695, %v2463_v20 }
0x12fc   :  { %v2453_v25 = vpop.xlane.xlu1 %2452 }
0x12fd   :  { %4137 = vpow2.f32 %v2470_v18  ;;  %v2461_v14 = vsub.f32 %v4939_v7, %v2453_v25 }
0x12ff   :  { %v2466_v3 = vmul.f32 1.442695, %v2461_v14 }
0x1301   :  { %4139 = vpow2.f32 %v2466_v3 }
0x1303   :  { %v4973_v47 = vpop.eup %4133 }
0x1304   :  { %v2478_v21 = vsel %vm424_vm2, %v4973_v47, 0.0  ;;  %v4136_v61 = vpop.eup %4135 }
0x1305   :  { %2479 = vadd.xlane.f32.xlu0 %v2478_v21  ;;  %v2472_v6 = vsel %vm424_vm2, %v4136_v61, 0.0 }
0x1307   :  { %v4977_v5 = vpop.eup %4137 }
0x1308   :  { %v2481_v26 = vsel %vm424_vm2, %v4977_v5, 0.0 }
0x1309   :  { %2473 = vadd.xlane.f32.xlu0 %v2472_v6  ;;  %2482 = vadd.xlane.f32.xlu1 %v2481_v26 }
0x130b   :  { %v4140_v29 = vpop.eup %4139 }
0x130c   :  { %v2475_v7 = vsel %vm424_vm2, %v4140_v29, 0.0 }
0x130d   :  { %2476 = vadd.xlane.f32.xlu1 %v2475_v7 }
0x131e   :  { %2496 = vrot.lane.b32.xlu1 %v4813_v54, %s4208_s12 }
0x131f   :  { %2494 = vrot.lane.b32.xlu0 %v4815_v55, %s4208_s12 }
0x1392   :  { %v2480_v2 = vpop.xlane.xlu0 %2479 }
0x1396   :  { %v2483_v12 = vpop.xlane.xlu1 %2482  ;;  %v2474_v32 = vpop.xlane.xlu0 %2473 }
0x139a   :  { %v2477_v31 = vpop.xlane.xlu1 %2476  ;;  %v2495_v38 = vpop.permute.xlu0 %2494 }
0x139b   :  { %4141 = vrcp.f32 %v2477_v31 }
0x139c   :  { %4143 = vrcp.f32 %v2474_v32 }
0x139d   :  { %4145 = vrcp.f32 %v2483_v12 }
0x139e   :  { %4147 = vrcp.f32 %v2480_v2  ;;  %v2497_v50 = vpop.permute.xlu1 %2496 }
0x139f   :  { %v3763_v33 = vpop.f32.mrb[28].mxu0 }
0x13a0   :  { %v2232_v35 = vpop.f32.mrb[29].mxu0 }
0x13a1   :  { %v3764_v24 = vpop.f32.mrb[30].mxu0 }
0x13a2   :  { %v2248_v23 = vpack.c.bf16 %v3764_v24, %v3763_v33  ;;  %v2235_v51 = vpop.f32.mrb[31].mxu0 }
0x13a3   :  { %v2247_v36 = vpack.c.bf16 %v2235_v51, %v2232_v35 }
0x13a5   :  { %3767 = vmatprep.mubr.msk.bf16.mxu0 %vm354_vm1, %v2247_v36  ;;  %v4142_v45 = vpop.eup %4141 }
0x13a6   :  { %3768 = vmatmul.mubr.msk.bf16.vlgmr.msra.gmra.mrb[32].mxu0 %vm354_vm1, %v2248_v23  ;;  %v4144_v53 = vpop.eup %4143 }
0x13a7   :  { %3772 = vmatpush3.bf16.msra.mxu0 %v3998_v30  ;;  %3773 = vmatprep.mubr.msk.bf16.mxu0 %vm354_vm1, %v2059_v1  ;;  %v3805_v40 = vpop.f32.mrb[52].mxu1  ;;  %v2489_v1 = vmul.f32 %v4142_v45, %v4140_v29  ;;  %v2488_v56 = vmul.f32 %v4144_v53, %v4136_v61  ;;  %v4146_v4 = vpop.eup %4145 }
0x13a8   :  { %3785 = vmatprep.subr.bf16.mxu0 %v2495_v38  ;;  %v2676_v41 = vpop.f32.mrb[53].mxu1  ;;  %v2693_v27 = vmul.f32 0.25, %v3805_v40  ;;  %v2491_v58 = vmul.f32 %v4146_v4, %v4977_v5 }
0x13a9   :  { %v2691_v43 = vmul.f32 0.25, %v2676_v41  ;;  %v3806_v44 = vpop.f32.mrb[54].mxu1  ;;  %v2492_v57 = vpack.c.bf16 %v2489_v1, %v2488_v56 }
0x13aa   :  { %v2694_v28 = vmul.f32 0.25, %v3806_v44  ;;  %v2679_v46 = vpop.f32.mrb[55].mxu1  ;;  %v5011_v16 = vadd.f32 %v4850_v62, %v2693_v27 }
0x13ab   :  { %v5000_v48 = vadd.f32 %v4830_v19, %v2691_v43  ;;  %v2692_v49 = vmul.f32 0.25, %v2679_v46 }
0x13ac   :  { %v5003_v10 = vadd.f32 %v4843_v60, %v2694_v28  ;;  %v2705_v62 = vsel %vm424_vm2, %v5011_v16, -inf }
0x13ad   :  { %v5006_v13 = vadd.f32 %v4837_v59, %v2692_v49  ;;  %v2699_v0 = vsel %vm424_vm2, %v5000_v48, -inf  ;;  %v4148_v59 = vpop.eup %4147 }
0x13ae   :  { %2700 = vmax.xlane.f32.xlu1 %v2699_v0  ;;  %v2708_v60 = vsel %vm424_vm2, %v5003_v10, -inf  ;;  %v2490_v11 = vmul.f32 %v4148_v59, %v4973_v47 }
0x13af   :  { %v2702_v19 = vsel %vm424_vm2, %v5006_v13, -inf }
0x13b0   :  { %2703 = vmax.xlane.f32.xlu0 %v2702_v19  ;;  %v2493_v52 = vpack.c.bf16 %v2491_v58, %v2490_v11 }
0x13b2   :  { %3774 = vmatmul.mubr.msk.bf16.vlgmr.msra.gmra.mrb[32].mxu0 %vm354_vm1, %v2060_v8  ;;  %2709 = vmax.xlane.f32.xlu1 %v2708_v60 }
0x13b3   :  { %3786 = vmatpush3.bf16.msra.mxu0 %v2495_v38  ;;  %3789 = vmatprep.mubr.msk.bf16.mxu0 %vm424_vm2, %v2492_v57  ;;  %v3999_v57 = vld [vmem:[%s5173_s5 + $0x30] sm:$0xff]  }
0x13b4   :  { %3787 = vmatprep.subr.bf16.mxu0 %v2497_v50  ;;  %2706 = vmax.xlane.f32.xlu0 %v2705_v62 }
0x13b7   :  { %3788 = vmatpush3.bf16.msra.mxu0 %v2497_v50  ;;  %v3831_v63 = vpop.f32.mrb[56].mxu1 }
0x13b8   :  { %v2953_v8 = vadd.f32 %v3831_v63, %v1589_v34  ;;  %v2944_v22 = vpop.f32.mrb[57].mxu1  ;;  %3793 = vmatprep.subr.bf16.mxu0 %v3999_v57 }
0x13b9   :  { %v2945_v17 = vadd.f32 %v2944_v22, %v1589_v34  ;;  %v3832_v20 = vpop.f32.mrb[58].mxu1 }
0x13ba   :  { %v2965_v18 = vmul.f32 0.044715, %v2953_v8  ;;  %v2956_v25 = vadd.f32 %v3832_v20, %v1589_v34  ;;  %3790 = vmatmul.mubr.msk.bf16.vlgmr.msra.gmra.mrb[36].mxu0 %vm424_vm2, %v2493_v52  ;;  %v2947_v14 = vpop.f32.mrb[59].mxu1  ;;  %v2961_v45 = vmul.f32 0.5, %v2953_v8 }
0x13bb   :  { %v2963_v3 = vmul.f32 0.044715, %v2945_v17  ;;  %v2948_v21 = vadd.f32 %v2947_v14, %v1589_v34  ;;  %v2959_v27 = vmul.f32 0.5, %v2945_v17  ;;  %3794 = vmatpush3.bf16.msra.mxu0 %v3999_v57  ;;  %v4005_v57 = vld [vmem:[%s5174_s7 + $0x60] sm:$0xff]  }
0x13bc   :  { %v2969_v61 = vmul.f32 %v2965_v18, %v2953_v8  ;;  %v2966_v5 = vmul.f32 0.044715, %v2956_v25  ;;  %v2962_v28 = vmul.f32 0.5, %v2956_v25 }
0x13bd   :  { %v2967_v6 = vmul.f32 %v2963_v3, %v2945_v17  ;;  %v2964_v26 = vmul.f32 0.044715, %v2948_v21  ;;  %v2960_v49 = vmul.f32 0.5, %v2948_v21 }
0x13be   :  { %v2973_v29 = vmul.f32 %v2969_v61, %v2953_v8  ;;  %v2970_v47 = vmul.f32 %v2966_v5, %v2956_v25 }
0x13bf   :  { %v2971_v7 = vmul.f32 %v2967_v6, %v2945_v17  ;;  %v2968_v15 = vmul.f32 %v2964_v26, %v2948_v21 }
0x13c0   :  { %v2977_v30 = vadd.f32 %v2973_v29, %v2953_v8  ;;  %v2974_v12 = vmul.f32 %v2970_v47, %v2956_v25 }
0x13c1   :  { %v2972_v2 = vmul.f32 %v2968_v15, %v2948_v21  ;;  %v2975_v31 = vadd.f32 %v2971_v7, %v2945_v17 }
0x13c2   :  { %v2981_v32 = vmul.f32 0.7978846, %v2977_v30  ;;  %v2978_v33 = vadd.f32 %v2974_v12, %v2956_v25  ;;  %v4000_v12 = vld [vmem:[%s5173_s5 + $0x38] sm:$0xff]  }
0x13c3   :  { %v2976_v35 = vadd.f32 %v2972_v2, %v2948_v21  ;;  %v2979_v24 = vmul.f32 0.7978846, %v2975_v31 }
0x13c4   :  { %4149 = vtanh.f32 %v2981_v32  ;;  %v2982_v23 = vmul.f32 0.7978846, %v2978_v33 }
0x13c5   :  { %v2980_v51 = vmul.f32 0.7978846, %v2976_v35  ;;  %4151 = vtanh.f32 %v2979_v24 }
0x13c6   :  { %4153 = vtanh.f32 %v2982_v23 }
0x13c7   :  { %4155 = vtanh.f32 %v2980_v51 }
0x13ce   :  { %v4150_v36 = vpop.eup %4149 }
0x13cf   :  { %v4152_v38 = vpop.eup %4151  ;;  %v2989_v40 = vadd.f32 1.0, %v4150_v36 }
0x13d0   :  { %v4154_v41 = vpop.eup %4153  ;;  %v2987_v43 = vadd.f32 1.0, %v4152_v38 }
0x13d1   :  { %v4156_v44 = vpop.eup %4155  ;;  %v2990_v46 = vadd.f32 1.0, %v4154_v41  ;;  %v5030_v0 = vmul.f32 %v2989_v40, %v2961_v45  ;;  %v4001_v40 = vld [vmem:[%s5174_s7 + $0x40] sm:$0xff]  }
0x13d2   :  { %v2988_v53 = vadd.f32 1.0, %v4156_v44  ;;  %v5034_v19 = vmul.f32 %v2987_v43, %v2959_v27  ;;  %v4002_v27 = vld [vmem:[%s5174_s7 + $0x48] sm:$0xff]  }
0x13d3   :  { %v5032_v1 = vmul.f32 %v2990_v46, %v2962_v28 }
0x13d4   :  { %v5036_v56 = vmul.f32 %v2988_v53, %v2960_v49  ;;  %v4003_v49 = vld [vmem:[%s5174_s7 + $0x50] sm:$0xff]   ;;  %v4004_v53 = vld [vmem:[%s5174_s7 + $0x58] sm:$0xff]  }
0x13d5   :  { %v2996_v4 = vpack.c.bf16 %v5032_v1, %v5030_v0  ;;  %v4200_v0 = vld [vmem:[%s5167_s0 + $0x8] sm:$0xff] }
0x13d6   :  { %v2995_v60 = vpack.c.bf16 %v5036_v56, %v5034_v19  ;;  %v4006_v19 = vld [vmem:[%s5174_s7 + $0x68] sm:$0xff]   ;;  %v4007_v56 = vld [vmem:[%s5174_s7 + $0x70] sm:$0xff]  }
0x143b   :  { %v2701_v59 = vpop.xlane.xlu1 %2700 }
0x143c   :  { %v2711_v34 = vsub.f32 %v5000_v48, %v2701_v59  ;;  %v4197_v59 = vld [vmem:[%s5169_s3 + $0x3] ss:$0 sm:$0xff] }
0x143d   :  { %v2704_v50 = vpop.xlane.xlu0 %2703 }
0x143e   :  { %v2712_v62 = vsub.f32 %v5006_v13, %v2704_v50  ;;  %v2715_v17 = vmul.f32 1.442695, %v2711_v34  ;;  %v1340_v50 = vadd.f32 nan, %v4197_v59  ;;  %v4199_v34 = vld [vmem:[%s5167_s0 + $0x18] sm:$0xff] }
0x143f   :  { %v2710_v58 = vpop.xlane.xlu1 %2709  ;;  %v4012_v59 = vld [vmem:[%s5175_s8 + $0x18] sm:$0xff]  }
0x1440   :  { %v2714_v11 = vsub.f32 %v5003_v10, %v2710_v58  ;;  %v2717_v63 = vmul.f32 1.442695, %v2712_v62  ;;  %v4198_v62 = vld [vmem:[%s5169_s3 + $0x5] ss:$0 sm:$0xff]  ;;  %v1577_v1 = vadd.f32 %v4200_v0, %v1340_v50 }
0x1441   :  { %v2707_v8 = vpop.xlane.xlu0 %2706  ;;  %v1573_v58 = vadd.f32 %v4198_v62, %v4701_v42  ;;  %v1562_v42 = vadd.f32 %v4198_v62, %v4697_v39 }
0x1442   :  { %v2721_v22 = vmul.f32 1.442695, %v2714_v11  ;;  %v2713_v52 = vsub.f32 %v5011_v16, %v2707_v8  ;;  %v1579_v11 = vadd.f32 %v4199_v34, %v1340_v50  ;;  %v4201_v8 = vld [vmem:[%s5167_s0 + $0x10] sm:$0xff] }
0x1444   :  { %4157 = vpow2.f32 %v2721_v22  ;;  %v2719_v20 = vmul.f32 1.442695, %v2713_v52  ;;  %v1578_v22 = vadd.f32 %v4201_v8, %v1340_v50  ;;  %v4202_v52 = vld [vmem:[%s5167_s0] sm:$0xff] }
0x1445   :  { %4159 = vpow2.f32 %v2717_v63  ;;  %v1565_v63 = vadd.f32 %v4198_v62, %v4703_v9  ;;  %v1583_v9 = vadd.f32 %v1579_v11, %v1573_v58 }
0x1446   :  { %4161 = vpow2.f32 %v2719_v20 }
0x1447   :  { %4163 = vpow2.f32 %v2715_v17  ;;  %v1576_v17 = vadd.f32 %v4202_v52, %v1340_v50  ;;  %v1581_v20 = vadd.f32 %v1577_v1, %v1565_v63 }
0x144e   :  { %v4158_v18 = vpop.eup %4157 }
0x144f   :  { %v4160_v25 = vpop.eup %4159  ;;  %v2732_v13 = vsel %vm424_vm2, %v4158_v18, 0.0 }
0x1450   :  { %v4162_v14 = vpop.eup %4161  ;;  %2733 = vadd.xlane.f32.xlu1 %v2732_v13  ;;  %v2726_v3 = vsel %vm424_vm2, %v4160_v25, 0.0 }
0x1451   :  { %v2729_v48 = vsel %vm424_vm2, %v4162_v14, 0.0  ;;  %v4164_v10 = vpop.eup %4163 }
0x1452   :  { %2730 = vadd.xlane.f32.xlu0 %v2729_v48  ;;  %v2723_v16 = vsel %vm424_vm2, %v4164_v10, 0.0 }
0x1454   :  { %2727 = vadd.xlane.f32.xlu1 %v2726_v3 }
0x1456   :  { %2724 = vadd.xlane.f32.xlu0 %v2723_v16 }
0x1465   :  { %2747 = vrot.lane.b32.xlu1 %v4813_v54, %s4210_s14 }
0x146c   :  { %2745 = vrot.lane.b32.xlu0 %v4815_v55, %s4210_s14 }
0x148d   :  { %v3791_v21 = vpop.f32.mrb[36].mxu0 }
0x148e   :  { %v2540_v61 = vpop.f32.mrb[37].mxu0 }
0x148f   :  { %v3792_v5 = vpop.f32.mrb[38].mxu0 }
0x1490   :  { %v2556_v6 = vpack.c.bf16 %v3792_v5, %v3791_v21  ;;  %v2543_v26 = vpop.f32.mrb[39].mxu0 }
0x1491   :  { %v2555_v29 = vpack.c.bf16 %v2543_v26, %v2540_v61 }
0x1493   :  { %3795 = vmatprep.mubr.msk.bf16.mxu0 %vm354_vm1, %v2555_v29 }
0x1494   :  { %3796 = vmatmul.mubr.msk.bf16.vlgmr.msra.gmra.mrb[32].mxu0 %vm354_vm1, %v2556_v6 }
0x14dd   :  { %v2734_v47 = vpop.xlane.xlu1 %2733 }
0x14df   :  { %v2731_v7 = vpop.xlane.xlu0 %2730 }
0x14e0   :  { %4165 = vrcp.f32 %v2731_v7 }
0x14e1   :  { %v2728_v15 = vpop.xlane.xlu1 %2727 }
0x14e2   :  { %4167 = vrcp.f32 %v2728_v15 }
0x14e3   :  { %4169 = vrcp.f32 %v2734_v47  ;;  %v2725_v54 = vpop.xlane.xlu0 %2724 }
0x14e4   :  { %4171 = vrcp.f32 %v2725_v54 }
0x14e5   :  { %v2748_v55 = vpop.permute.xlu1 %2747 }
0x14e7   :  { %v2746_v30 = vpop.permute.xlu0 %2745 }
0x14e8   :  { %3807 = vmatprep.subr.bf16.mxu0 %v2746_v30 }
0x14e9   :  { %3808 = vmatpush3.bf16.msra.mxu0 %v2746_v30 }
0x14ea   :  { %3809 = vmatprep.subr.bf16.mxu0 %v2748_v55  ;;  %v4166_v2 = vpop.eup %4165 }
0x14eb   :  { %v2741_v35 = vmul.f32 %v4166_v2, %v4162_v14  ;;  %v1590_v14 = vld [vmem:[%s5169_s3 + $0x1b] ss:$0 sm:$0xff] }
0x14ec   :  { %v4168_v31 = vpop.eup %4167 }
0x14ed   :  { %v4170_v32 = vpop.eup %4169  ;;  %3810 = vmatpush3.bf16.msra.mxu0 %v2748_v55  ;;  %v2740_v23 = vmul.f32 %v4168_v31, %v4160_v25  ;;  %v1580_v25 = vadd.f32 %v1576_v17, %v1562_v42  ;;  %v3119_v17 = vld [vmem:[%s5169_s3 + $0x1c] ss:$0 sm:$0xff] }
0x14ee   :  { %v4172_v33 = vpop.eup %4171  ;;  %3815 = vmatprep.subr.bf16.mxu0 %v4000_v12  ;;  %v2742_v51 = vmul.f32 %v4170_v32, %v4158_v18 }
0x14ef   :  { %v2739_v24 = vmul.f32 %v4172_v33, %v4164_v10 }
0x14f0   :  { %v2744_v38 = vpack.c.bf16 %v2742_v51, %v2741_v35 }
0x14f1   :  { %v2743_v36 = vpack.c.bf16 %v2740_v23, %v2739_v24 }
0x14f3   :  { %3811 = vmatprep.mubr.msk.bf16.mxu0 %vm424_vm2, %v2743_v36 }
0x14f4   :  { %3812 = vmatmul.mubr.msk.bf16.vlgmr.msra.gmra.mrb[40].mxu0 %vm424_vm2, %v2744_v38 }
0x14f5   :  { %3816 = vmatpush3.bf16.msra.mxu0 %v4000_v12 }
0x14f6   :  { %3833 = vmatprep.subr.bf16.mxu0 %v4001_v40 }
0x15c7   :  { %v3813_v41 = vpop.f32.mrb[40].mxu0 }
0x15c8   :  { %v2791_v43 = vpop.f32.mrb[41].mxu0 }
0x15c9   :  { %v3814_v44 = vpop.f32.mrb[42].mxu0 }
0x15ca   :  { %v2807_v45 = vpack.c.bf16 %v3814_v44, %v3813_v41  ;;  %v2794_v28 = vpop.f32.mrb[43].mxu0 }
0x15cb   :  { %v2806_v46 = vpack.c.bf16 %v2794_v28, %v2791_v43 }
0x15cd   :  { %3817 = vmatprep.mubr.msk.bf16.mxu0 %vm354_vm1, %v2806_v46 }
0x15ce   :  { %3818 = vmatmul.mubr.msk.bf16.vlgmr.msra.gmra.mrb[32].mxu0 %vm354_vm1, %v2807_v45 }
0x15cf   :  { %3834 = vmatpush3.bf16.msra.mxu0 %v4001_v40  ;;  %3849 = vmatprep.mubr.bf16.mxu0 %v2995_v60  ;;  %v4008_v60 = vld [vmem:[%s5174_s7 + $0x78] sm:$0xff]  }
0x15d0   :  { %3835 = vmatprep.subr.bf16.mxu0 %v4002_v27 }
0x15d3   :  { %3836 = vmatpush3.bf16.msra.mxu0 %v4002_v27 }
0x15d4   :  { %3837 = vmatprep.subr.bf16.mxu0 %v4003_v49 }
0x15d7   :  { %3838 = vmatpush3.bf16.msra.mxu0 %v4003_v49 }
0x15d8   :  { %3839 = vmatprep.subr.bf16.mxu0 %v4004_v53 }
0x15db   :  { %3840 = vmatpush3.bf16.msra.mxu0 %v4004_v53 }
0x15dc   :  { %3841 = vmatprep.subr.bf16.mxu0 %v4005_v57 }
0x15df   :  { %3842 = vmatpush3.bf16.msra.mxu0 %v4005_v57 }
0x15e0   :  { %3843 = vmatprep.subr.bf16.mxu0 %v4006_v19 }
0x15e3   :  { %3844 = vmatpush3.bf16.msra.mxu0 %v4006_v19  ;;  %v4009_v19 = vld [vmem:[%s5175_s8] sm:$0xff]  }
0x15e4   :  { %3845 = vmatprep.subr.bf16.mxu0 %v4007_v56  ;;  %3853 = vmatprep.subr.bf16.mxu1 %v4009_v19 }
0x15e5   :  { %3854 = vmatpush3.bf16.msra.mxu1 %v4009_v19 }
0x15e7   :  { %3846 = vmatpush3.bf16.msra.mxu0 %v4007_v56  ;;  %v4010_v56 = vld [vmem:[%s5175_s8 + $0x8] sm:$0xff]  }
0x15e8   :  { %3847 = vmatprep.subr.bf16.mxu0 %v4008_v60  ;;  %3855 = vmatprep.subr.bf16.mxu1 %v4010_v56 }
0x15e9   :  { %3856 = vmatpush3.bf16.msra.mxu1 %v4010_v56 }
0x15eb   :  { %3848 = vmatpush3.bf16.msra.mxu0 %v4008_v60  ;;  %v4011_v60 = vld [vmem:[%s5175_s8 + $0x10] sm:$0xff]  }
0x15ec   :  { %3857 = vmatprep.subr.bf16.mxu1 %v4011_v60 }
0x15ed   :  { %3858 = vmatpush3.bf16.msra.mxu1 %v4011_v60 }
0x15ee   :  { %3850 = vmatmul.mubr.bf16.vlgmr.msra.gmra.mrb[32].mxu0 %v2996_v4  ;;  %v1570_v4 = vadd.f32 %v4198_v62, %v4695_v37  ;;  %v1588_v37 = vld [vmem:[%s5169_s3 + $0x19] ss:$0 sm:$0xff]  ;;  %3859 = vmatprep.subr.bf16.mxu1 %v4012_v59 }
0x15ef   :  { %v3883_v13 = vadd.f32 %v1588_v37, %v1583_v9  ;;  %v3886_v48 = vadd.f32 %v1588_v37, %v1581_v20  ;;  %v3880_v3 = vadd.f32 %v1588_v37, %v1580_v25  ;;  %v3120_v25 = vld [vmem:[%s5169_s3 + $0x1d] ss:$0 sm:$0xff] }
0x15f0   :  { %v1582_v18 = vadd.f32 %v1578_v22, %v1570_v4 }
0x15f1   :  { %v3884_v61 = vadd.f32 %v3883_v13, %v1590_v14  ;;  %v3887_v26 = vadd.f32 %v3886_v48, %v1590_v14  ;;  %3860 = vmatpush3.bf16.msra.mxu1 %v4012_v59 }
0x15f2   :  { %v3877_v39 = vadd.f32 %v1588_v37, %v1582_v18 }
0x16c1   :  { %v3851_v10 = vpop.f32.mrb[32].mxu0 }
0x16c2   :  { %v3878_v16 = vadd.f32 %v3877_v39, %v3851_v10  ;;  %v3096_v21 = vpop.f32.mrb[33].mxu0 }
0x16c3   :  { %v3881_v5 = vadd.f32 %v3880_v3, %v3096_v21  ;;  %v3852_v6 = vpop.f32.mrb[34].mxu0 }
0x16c4   :  { %v3885_v29 = vadd.f32 %v3884_v61, %v3852_v6  ;;  %v3099_v47 = vpop.f32.mrb[35].mxu0  ;;  %v3879_v54 = vadd.f32 %v3878_v16, %v1590_v14 }
0x16c5   :  { %v3882_v7 = vadd.f32 %v3881_v5, %v1590_v14  ;;  %v3888_v15 = vadd.f32 %v3887_v26, %v3099_v47  ;;  %v3191_v47 = vld [vmem:[%s5169_s3 + $0x1e] ss:$0 sm:$0xff] }
0x16c6   :  { %v3127_v12 = vsel %vm56_vm0, %v3879_v54, 0.0  ;;  %v3130_v2 = vsel %vm56_vm0, %v3885_v29, 0.0 }
0x16c7   :  { %v3124_v30 = vsel %vm56_vm0, %v3888_v15, 0.0  ;;  %v3121_v55 = vsel %vm56_vm0, %v3882_v7, 0.0 }
0x16c8   :  { %3125 = vadd.xlane.f32.xlu0 %v3124_v30  ;;  %3122 = vadd.xlane.f32.xlu1 %v3121_v55 }
0x16cc   :  { %3128 = vadd.xlane.f32.xlu0 %v3127_v12  ;;  %3131 = vadd.xlane.f32.xlu1 %v3130_v2 }
0x1755   :  { %v3126_v31 = vpop.xlane.xlu0 %3125  ;;  %v3123_v32 = vpop.xlane.xlu1 %3122 }
0x1756   :  { %v3134_v33 = vmul.f32 0.015625, %v3126_v31  ;;  %v3133_v35 = vmul.f32 0.015625, %v3123_v32 }
0x1758   :  { %v3138_v24 = vsub.f32 %v3888_v15, %v3134_v33  ;;  %v3137_v23 = vsub.f32 %v3882_v7, %v3133_v35 }
0x1759   :  { %v3129_v51 = vpop.xlane.xlu0 %3128  ;;  %v3132_v36 = vpop.xlane.xlu1 %3131 }
0x175a   :  { %v3135_v38 = vmul.f32 0.015625, %v3129_v51  ;;  %v3136_v40 = vmul.f32 0.015625, %v3132_v36  ;;  %v3142_v41 = vmul.f32 %v3138_v24, %v3138_v24  ;;  %v3141_v43 = vmul.f32 %v3137_v23, %v3137_v23 }
0x175c   :  { %v3139_v44 = vsub.f32 %v3879_v54, %v3135_v38  ;;  %v3140_v45 = vsub.f32 %v3885_v29, %v3136_v40  ;;  %v3148_v28 = vsel %vm56_vm0, %v3142_v41, 0.0  ;;  %v3145_v46 = vsel %vm56_vm0, %v3141_v43, 0.0 }
0x175d   :  { %3149 = vadd.xlane.f32.xlu1 %v3148_v28  ;;  %3146 = vadd.xlane.f32.xlu0 %v3145_v46 }
0x175e   :  { %v3143_v27 = vmul.f32 %v3139_v44, %v3139_v44  ;;  %v3144_v49 = vmul.f32 %v3140_v45, %v3140_v45 }
0x1760   :  { %v3151_v53 = vsel %vm56_vm0, %v3143_v27, 0.0  ;;  %v3154_v57 = vsel %vm56_vm0, %v3144_v49, 0.0 }
0x1761   :  { %3152 = vadd.xlane.f32.xlu0 %v3151_v53  ;;  %3155 = vadd.xlane.f32.xlu1 %v3154_v57 }
0x17ea   :  { %v3147_v50 = vpop.xlane.xlu0 %3146  ;;  %v3150_v62 = vpop.xlane.xlu1 %3149 }
0x17eb   :  { %v3157_v58 = vmul.f32 0.015625, %v3147_v50  ;;  %v3158_v34 = vmul.f32 0.015625, %v3150_v62 }
0x17ed   :  { %v3161_v11 = vadd.f32 1e-05, %v3157_v58  ;;  %v3162_v63 = vadd.f32 1e-05, %v3158_v34 }
0x17ee   :  { %v3153_v0 = vpop.xlane.xlu0 %3152  ;;  %v3156_v1 = vpop.xlane.xlu1 %3155 }
0x17ef   :  { %4173 = vrsqrt.f32 %v3161_v11  ;;  %v3159_v4 = vmul.f32 0.015625, %v3153_v0  ;;  %v3160_v8 = vmul.f32 0.015625, %v3156_v1 }
0x17f0   :  { %4175 = vrsqrt.f32 %v3162_v63 }
0x17f1   :  { %v3163_v22 = vadd.f32 1e-05, %v3159_v4  ;;  %v3164_v42 = vadd.f32 1e-05, %v3160_v8 }
0x17f3   :  { %4177 = vrsqrt.f32 %v3163_v22 }
0x17f4   :  { %4179 = vrsqrt.f32 %v3164_v42 }
0x17f9   :  { %v4174_v52 = vpop.eup %4173 }
0x17fa   :  { %v4176_v9 = vpop.eup %4175  ;;  %v3169_v20 = vmul.f32 %v4174_v52, %v3137_v23 }
0x17fb   :  { %v3170_v18 = vmul.f32 %v4176_v9, %v3138_v24 }
0x17fc   :  { %v3173_v37 = vmul.f32 %v3169_v20, %v3119_v17 }
0x17fd   :  { %v4178_v13 = vpop.eup %4177  ;;  %v3174_v14 = vmul.f32 %v3170_v18, %v3119_v17 }
0x17fe   :  { %v4180_v48 = vpop.eup %4179  ;;  %v3171_v39 = vmul.f32 %v4178_v13, %v3139_v44  ;;  %v3177_v10 = vadd.f32 %v3173_v37, %v3120_v25 }
0x17ff   :  { %v3172_v3 = vmul.f32 %v4180_v48, %v3140_v45  ;;  %v3178_v16 = vadd.f32 %v3174_v14, %v3120_v25 }
0x1800   :  { %v3175_v21 = vmul.f32 %v3171_v39, %v3119_v17 }
0x1801   :  { %v3176_v61 = vmul.f32 %v3172_v3, %v3119_v17  ;;  %v3181_v5 = vpack.c.bf16 %v3178_v16, %v3177_v10 }
0x1802   :  { %v3179_v6 = vadd.f32 %v3175_v21, %v3120_v25 }
0x1803   :  { %3861 = vmatprep.mubr.msk.bf16.mxu1 %vm56_vm0, %v3181_v5  ;;  %v3180_v26 = vadd.f32 %v3176_v61, %v3120_v25 }
0x1805   :  { %v3182_v29 = vpack.c.bf16 %v3180_v26, %v3179_v6 }
0x1807   :  { %3862 = vmatmul.mubr.msk.bf16.vlgmr.msra.gmra.mrb[60].mxu1 %vm56_vm0, %v3182_v29 }
0x18da   :  { %v3863_v7 = vpop.f32.mrb[60].mxu1 }
0x18db   :  { %v3265_v15 = vadd.f32 %v3863_v7, %v3191_v47  ;;  %v3256_v54 = vpop.f32.mrb[61].mxu1 }
0x18dc   :  { %v3257_v30 = vadd.f32 %v3256_v54, %v3191_v47  ;;  %v3864_v55 = vpop.f32.mrb[62].mxu1 }
0x18dd   :  { %3273 = vst [vmem:[%s5176_s9 + $0x10] sm:$0xff] %v3265_v15  ;;  %v3268_v12 = vadd.f32 %v3864_v55, %v3191_v47  ;;  %v3259_v2 = vpop.f32.mrb[63].mxu1 }
0x18de   :  { %3271 = vst [vmem:[%s5176_s9] sm:$0xff] %v3257_v30  ;;  %v3260_v31 = vadd.f32 %v3259_v2, %v3191_v47 }
0x18df   :  { %3274 = vst [vmem:[%s5176_s9 + $0x18] sm:$0xff] %v3268_v12 }
0x18e0   :  { %3272 = vst [vmem:[%s5176_s9 + $0x8] sm:$0xff] %v3260_v31 }

</bundles_post_ra>
